<compile_context>
chip_gen: v7x
topology: tpu7x:2x2x1
jax: 0.10.0
libtpu: 0.0.40
codegen_flags: <defaults>
</compile_context>

<pallas_src>
import jax
import jax.numpy as jnp
from jax import lax
from jax.experimental import pallas as pl
from jax.experimental.pallas import tpu as pltpu


K_FC1 = 3136          # 64 * 7 * 7
K_FC1_PAD = 3200      # next multiple of 128 (and of the 640-wide K tile)
FC1_TK = 640          # fc1 reduction-chunk width (multiple of 128)


def _round_up(x, m):
    return (x + m - 1) // m * m


# ----------------------------------------------------------------------------
# Kernel 1: M-tiled matmul + bias + ReLU (the three conv layers, on patches).
# ----------------------------------------------------------------------------
def _matmul_bias_relu_kernel(x_ref, w_ref, b_ref, o_ref):
    y = jnp.dot(x_ref[...], w_ref[...], preferred_element_type=jnp.float32)
    y = jnp.maximum(y + b_ref[...], 0.0)
    o_ref[...] = y.astype(o_ref.dtype)


def matmul_bias_relu(x, w, b, *, tm=256):
    """relu(x @ w + b). x:(M,K) f32, w:(K,N) f32, b:(N,) f32 -> (M,N) f32."""
    M, K = x.shape
    K2, N = w.shape
    assert K == K2, (K, K2)
    # Pick a tile that is a multiple of 8 and minimises row padding:
    # pad M up to a multiple of 8, then split evenly across the grid.
    m_pad8 = _round_up(M, 8)
    grid_m = max(1, pl.cdiv(m_pad8, tm))
    tm_adj = _round_up(pl.cdiv(m_pad8, grid_m), 8)
    m_pad = tm_adj * grid_m
    if m_pad != M:
        x = jnp.pad(x, ((0, m_pad - M), (0, 0)))
    out = pl.pallas_call(
        _matmul_bias_relu_kernel,
        out_shape=jax.ShapeDtypeStruct((m_pad, N), jnp.float32),
        grid=(grid_m,),
        in_specs=[
            pl.BlockSpec((tm_adj, K), lambda i: (i, 0)),
            pl.BlockSpec((K, N), lambda i: (0, 0)),       # resident weights
            pl.BlockSpec((1, N), lambda i: (0, 0)),       # resident bias
        ],
        out_specs=pl.BlockSpec((tm_adj, N), lambda i: (i, 0)),
        compiler_params=pltpu.CompilerParams(
            dimension_semantics=("parallel",),
            vmem_limit_bytes=32 * 1024 * 1024,
        ),
    )(x, w, b.reshape(1, N))
    return out[:M] if m_pad != M else out


# ----------------------------------------------------------------------------
# Kernel 2: fused fc1 (K streamed over a reduction grid, bf16 weights, f32
# VMEM accumulator) + ReLU + fc2 epilogue on the last step.
# ----------------------------------------------------------------------------
def _fc_fused_kernel(x_ref, w1_ref, b1_ref, w2_ref, b2_ref, o_ref, acc_ref):
    k = pl.program_id(0)

    @pl.when(k == 0)
    def _():
        acc_ref[...] = jnp.zeros_like(acc_ref)

    acc_ref[...] += jnp.dot(
        x_ref[...], w1_ref[...].astype(jnp.float32),
        preferred_element_type=jnp.float32)

    @pl.when(k == pl.num_programs(0) - 1)
    def _():
        h = jnp.maximum(acc_ref[...] + b1_ref[...], 0.0)
        y = jnp.dot(h, w2_ref[...], preferred_element_type=jnp.float32)
        o_ref[...] = (y + b2_ref[...]).astype(o_ref.dtype)


def fc1_fc2_fused(x, w1_bf16, b1, w2, b2, *, tk=FC1_TK):
    """relu(x @ w1 + b1) @ w2 + b2 with fc1's K streamed in `tk`-wide chunks."""
    M, K = x.shape
    K2, H = w1_bf16.shape
    assert K == K2 and K % tk == 0 and tk % 128 == 0, (K, K2, tk)
    H2, A = w2.shape
    assert H == H2, (H, H2)
    grid_k = K // tk
    return pl.pallas_call(
        _fc_fused_kernel,
        out_shape=jax.ShapeDtypeStruct((M, A), jnp.float32),
        grid=(grid_k,),
        in_specs=[
            pl.BlockSpec((M, tk), lambda k: (0, k)),
            pl.BlockSpec((tk, H), lambda k: (k, 0)),      # streamed bf16 weights
            pl.BlockSpec((1, H), lambda k: (0, 0)),
            pl.BlockSpec((H, A), lambda k: (0, 0)),
            pl.BlockSpec((1, A), lambda k: (0, 0)),
        ],
        out_specs=pl.BlockSpec((M, A), lambda k: (0, 0)),
        scratch_shapes=[pltpu.VMEM((M, H), jnp.float32)],
        compiler_params=pltpu.CompilerParams(
            dimension_semantics=("arbitrary",),
            vmem_limit_bytes=32 * 1024 * 1024,
        ),
    )(x, w1_bf16, b1.reshape(1, H), w2, b2.reshape(1, A))


# ----------------------------------------------------------------------------
# NHWC im2col (wrapper-side XLA glue; patch feature order = (kh, kw, c)).
# ----------------------------------------------------------------------------
def _im2col_nhwc(x, k, s):
    N, H, W, C = x.shape
    OH = (H - k) // s + 1
    OW = (W - k) // s + 1
    cols = [x[:, i:i + s * OH:s, j:j + s * OW:s, :]
            for i in range(k) for j in range(k)]
    p = jnp.concatenate(cols, axis=-1)            # (N, OH, OW, k*k*C)
    return p.reshape(N * OH * OW, k * k * C), OH, OW


def _conv_relu_nhwc(x, wmat, b, k, s):
    """x: (N,H,W,C); wmat: (k*k*C, OutC) -> (N,OH,OW,OutC)."""
    N = x.shape[0]
    patches, OH, OW = _im2col_nhwc(x, k, s)
    y = matmul_bias_relu(patches, wmat, b)        # (N*OH*OW, OutC)
    return y.reshape(N, OH, OW, wmat.shape[1])


# ----------------------------------------------------------------------------
# DQN forward pass (Pallas path) and a pure-JAX reference.
# ----------------------------------------------------------------------------
def dqn_forward(kp, x_nchw):
    x = x_nchw.transpose(0, 2, 3, 1)              # one-time NCHW -> NHWC
    x = _conv_relu_nhwc(x, kp["conv1_w"], kp["conv1_b"], 8, 4)   # (N,20,20,32)
    x = _conv_relu_nhwc(x, kp["conv2_w"], kp["conv2_b"], 4, 2)   # (N,9,9,64)
    x = _conv_relu_nhwc(x, kp["conv3_w"], kp["conv3_b"], 3, 1)   # (N,7,7,64)
    n = x.shape[0]
    x = x.reshape(n, K_FC1)                       # (h, w, c)-ordered flatten
    x = jnp.pad(x, ((0, 0), (0, K_FC1_PAD - K_FC1)))
    return fc1_fc2_fused(x, kp["fc1_w"], kp["fc1_b"], kp["fc2_w"], kp["fc2_b"])


def reference_forward(p, x):
    def conv(x, w, b, s):
        y = lax.conv_general_dilated(
            x, w, window_strides=(s, s), padding="VALID",
            dimension_numbers=("NCHW", "OIHW", "NCHW"))
        return jnp.maximum(y + b[None, :, None, None], 0.0)

    x = conv(x, p["conv1_w"], p["conv1_b"], 4)
    x = conv(x, p["conv2_w"], p["conv2_b"], 2)
    x = conv(x, p["conv3_w"], p["conv3_b"], 1)
    x = x.reshape(x.shape[0], -1)
    x = jnp.maximum(x @ p["fc1_w"].T + p["fc1_b"], 0.0)
    return x @ p["fc2_w"].T + p["fc2_b"]


# ----------------------------------------------------------------------------
# Parameter init (PyTorch layouts) and one-time Pallas-friendly preparation.
# ----------------------------------------------------------------------------
def init_params(key, n_actions):
    def u(k, shape, fan_in):
        bound = 1.0 / float(fan_in) ** 0.5
        return jax.random.uniform(k, shape, jnp.float32, -bound, bound)

    ks = jax.random.split(key, 10)
    return {
        "conv1_w": u(ks[0], (32, 4, 8, 8), 4 * 8 * 8),
        "conv1_b": u(ks[1], (32,), 4 * 8 * 8),
        "conv2_w": u(ks[2], (64, 32, 4, 4), 32 * 4 * 4),
        "conv2_b": u(ks[3], (64,), 32 * 4 * 4),
        "conv3_w": u(ks[4], (64, 64, 3, 3), 64 * 3 * 3),
        "conv3_b": u(ks[5], (64,), 64 * 3 * 3),
        "fc1_w": u(ks[6], (512, 3136), 3136),     # PyTorch Linear layout (out, in)
        "fc1_b": u(ks[7], (512,), 3136),
        "fc2_w": u(ks[8], (n_actions, 512), 512),
        "fc2_b": u(ks[9], (n_actions,), 512),
    }


def prepare_params(p):
    """PyTorch-layout f32 params -> Pallas-friendly layouts (one-time)."""
    def conv_mat(w):          # (OutC, InC, kh, kw) -> (kh*kw*InC, OutC)
        outc, inc, kh, kw = w.shape
        return w.transpose(2, 3, 1, 0).reshape(kh * kw * inc, outc)

    # fc1: PyTorch columns are (c,h,w)-ordered (flatten of NCHW); reorder to the
    # (h,w,c) order produced by the NHWC pipeline, transpose to (K, 512),
    # zero-pad K 3136 -> 3200 and store in bf16 (this layer is weight-DMA bound).
    fc1 = (p["fc1_w"].reshape(512, 64, 7, 7)
           .transpose(0, 2, 3, 1).reshape(512, K_FC1).T)
    fc1 = jnp.pad(fc1, ((0, K_FC1_PAD - K_FC1), (0, 0))).astype(jnp.bfloat16)

    return {
        "conv1_w": conv_mat(p["conv1_w"]), "conv1_b": p["conv1_b"],
        "conv2_w": conv_mat(p["conv2_w"]), "conv2_b": p["conv2_b"],
        "conv3_w": conv_mat(p["conv3_w"]), "conv3_b": p["conv3_b"],
        "fc1_w": fc1, "fc1_b": p["fc1_b"],
        "fc2_w": p["fc2_w"].T, "fc2_b": p["fc2_b"],
    }


if __name__ == "__main__":
    n_actions = 4            # env_config['n_actions']
    batch = 2

    key = jax.random.PRNGKey(0)
    pkey, xkey = jax.random.split(key)
    params = init_params(pkey, n_actions)
    kparams = prepare_params(params)

    # fc1 in_features = 3136 = 64*7*7 -> 84x84 Atari frames with 4 stacked
    # channels; batch kept small.
    x = jax.random.normal(xkey, (batch, 4, 84, 84), dtype=jnp.float32)

    out = jax.block_until_ready(jax.jit(dqn_forward)(kparams, x))
    assert out.shape == (batch, n_actions), out.shape

    # Reference uses the same bf16-rounded fc1 weights so the comparison
    # isolates kernel correctness from the (intentional) weight quantization.
    ref_params = dict(
        params,
        fc1_w=params["fc1_w"].astype(jnp.bfloat16).astype(jnp.float32))
    ref = jax.block_until_ready(jax.jit(reference_forward)(ref_params, x))
    assert jnp.allclose(out, ref, rtol=2e-3, atol=2e-3), (
        float(jnp.max(jnp.abs(out - ref))))

    print("KERNEL_OK")
</pallas_src>

<mosaic_0001>
module attributes {stable_mosaic.version = 11 : i64} {
  func.func @_matmul_bias_relu_kernel(%arg0: i32, %arg1: memref<200x256xf32, #tpu.memory_space<vmem>>, %arg2: memref<256x32xf32, #tpu.memory_space<vmem>>, %arg3: memref<1x32xf32, #tpu.memory_space<vmem>>, %arg4: memref<200x32xf32, #tpu.memory_space<vmem>>) attributes {dimension_semantics = [#tpu.dimension_semantics<parallel>], iteration_bounds = array<i64: 4>, scalar_prefetch = 0 : i64, scratch_operands = 0 : i64, tpu.core_type = #tpu.core_type<tc>, window_params = [{transform_indices = @transform_0, window_bounds = array<i64: 200, 256>}, {pipeline_mode = #tpu.pipeline_mode<synchronous>, transform_indices = @transform_1, window_bounds = array<i64: 256, 32>}, {pipeline_mode = #tpu.pipeline_mode<synchronous>, transform_indices = @transform_2, window_bounds = array<i64: 1, 32>}, {transform_indices = @transform_3, window_bounds = array<i64: 200, 32>}]} {
    %c0 = arith.constant 0 : index
    %c0_0 = arith.constant 0 : index
    %0 = vector.load %arg1[%c0, %c0_0] : memref<200x256xf32, #tpu.memory_space<vmem>>, vector<200x256xf32>
    %c0_1 = arith.constant 0 : index
    %c0_2 = arith.constant 0 : index
    %1 = vector.load %arg2[%c0_1, %c0_2] : memref<256x32xf32, #tpu.memory_space<vmem>>, vector<256x32xf32>
    %cst = arith.constant dense<0.000000e+00> : vector<200x32xf32>
    %2 = tpu.matmul %0, %1, %cst {dimension_numbers = #tpu.dot_dimension_numbers<[1], [0], [0], [1], [0, 0, 1, 1], [], []>} : vector<200x256xf32>, vector<256x32xf32>, vector<200x32xf32> -> vector<200x32xf32>
    %c0_3 = arith.constant 0 : index
    %c0_4 = arith.constant 0 : index
    %3 = vector.load %arg3[%c0_3, %c0_4] : memref<1x32xf32, #tpu.memory_space<vmem>>, vector<1x32xf32>
    %4 = vector.broadcast %3 : vector<1x32xf32> to vector<200x32xf32>
    %5 = arith.addf %2, %4 : vector<200x32xf32>
    %cst_5 = arith.constant 0.000000e+00 : f32
    %6 = vector.broadcast %cst_5 : f32 to vector<200x32xf32>
    %7 = arith.maximumf %5, %6 : vector<200x32xf32>
    %c0_6 = arith.constant 0 : index
    %c0_7 = arith.constant 0 : index
    %8 = vector.load %arg4[%c0_6, %c0_7] : memref<200x32xf32, #tpu.memory_space<vmem>>, vector<200x32xf32>
    tpu.vector_store %arg4[%c0_6, %c0_7], %7 {strides = array<i32>} : memref<200x32xf32, #tpu.memory_space<vmem>>, vector<200x32xf32>,
    return
  }
  func.func @transform_0(%arg0: i32) -> (i32, i32) {
    %c0_i32 = arith.constant 0 : i32
    %c0_i32_0 = arith.constant 0 : i32
    return %arg0, %c0_i32 : i32, i32
  }
  func.func @transform_1(%arg0: i32) -> (i32, i32) {
    %c0_i32 = arith.constant 0 : i32
    %c0_i32_0 = arith.constant 0 : i32
    %c0_i32_1 = arith.constant 0 : i32
    return %c0_i32, %c0_i32_0 : i32, i32
  }
  func.func @transform_2(%arg0: i32) -> (i32, i32) {
    %c0_i32 = arith.constant 0 : i32
    %c0_i32_0 = arith.constant 0 : i32
    %c0_i32_1 = arith.constant 0 : i32
    return %c0_i32, %c0_i32_0 : i32, i32
  }
  func.func @transform_3(%arg0: i32) -> (i32, i32) {
    %c0_i32 = arith.constant 0 : i32
    %c0_i32_0 = arith.constant 0 : i32
    return %arg0, %c0_i32 : i32, i32
  }
}

module attributes {stable_mosaic.version = 11 : i64} {
  func.func @_matmul_bias_relu_kernel(%arg0: i32, %arg1: memref<168x512xf32, #tpu.memory_space<vmem>>, %arg2: memref<512x64xf32, #tpu.memory_space<vmem>>, %arg3: memref<1x64xf32, #tpu.memory_space<vmem>>, %arg4: memref<168x64xf32, #tpu.memory_space<vmem>>) attributes {dimension_semantics = [#tpu.dimension_semantics<parallel>], iteration_bounds = array<i64: 1>, scalar_prefetch = 0 : i64, scratch_operands = 0 : i64, tpu.core_type = #tpu.core_type<tc>, window_params = [{transform_indices = @transform_0, window_bounds = array<i64: 168, 512>}, {pipeline_mode = #tpu.pipeline_mode<synchronous>, transform_indices = @transform_1, window_bounds = array<i64: 512, 64>}, {pipeline_mode = #tpu.pipeline_mode<synchronous>, transform_indices = @transform_2, window_bounds = array<i64: 1, 64>}, {transform_indices = @transform_3, window_bounds = array<i64: 168, 64>}]} {
    %c0 = arith.constant 0 : index
    %c0_0 = arith.constant 0 : index
    %0 = vector.load %arg1[%c0, %c0_0] : memref<168x512xf32, #tpu.memory_space<vmem>>, vector<168x512xf32>
    %c0_1 = arith.constant 0 : index
    %c0_2 = arith.constant 0 : index
    %1 = vector.load %arg2[%c0_1, %c0_2] : memref<512x64xf32, #tpu.memory_space<vmem>>, vector<512x64xf32>
    %cst = arith.constant dense<0.000000e+00> : vector<168x64xf32>
    %2 = tpu.matmul %0, %1, %cst {dimension_numbers = #tpu.dot_dimension_numbers<[1], [0], [0], [1], [0, 0, 1, 1], [], []>} : vector<168x512xf32>, vector<512x64xf32>, vector<168x64xf32> -> vector<168x64xf32>
    %c0_3 = arith.constant 0 : index
    %c0_4 = arith.constant 0 : index
    %3 = vector.load %arg3[%c0_3, %c0_4] : memref<1x64xf32, #tpu.memory_space<vmem>>, vector<1x64xf32>
    %4 = vector.broadcast %3 : vector<1x64xf32> to vector<168x64xf32>
    %5 = arith.addf %2, %4 : vector<168x64xf32>
    %cst_5 = arith.constant 0.000000e+00 : f32
    %6 = vector.broadcast %cst_5 : f32 to vector<168x64xf32>
    %7 = arith.maximumf %5, %6 : vector<168x64xf32>
    %c0_6 = arith.constant 0 : index
    %c0_7 = arith.constant 0 : index
    %8 = vector.load %arg4[%c0_6, %c0_7] : memref<168x64xf32, #tpu.memory_space<vmem>>, vector<168x64xf32>
    tpu.vector_store %arg4[%c0_6, %c0_7], %7 {strides = array<i32>} : memref<168x64xf32, #tpu.memory_space<vmem>>, vector<168x64xf32>,
    return
  }
  func.func @transform_0(%arg0: i32) -> (i32, i32) {
    %c0_i32 = arith.constant 0 : i32
    %c0_i32_0 = arith.constant 0 : i32
    return %arg0, %c0_i32 : i32, i32
  }
  func.func @transform_1(%arg0: i32) -> (i32, i32) {
    %c0_i32 = arith.constant 0 : i32
    %c0_i32_0 = arith.constant 0 : i32
    %c0_i32_1 = arith.constant 0 : i32
    return %c0_i32, %c0_i32_0 : i32, i32
  }
  func.func @transform_2(%arg0: i32) -> (i32, i32) {
    %c0_i32 = arith.constant 0 : i32
    %c0_i32_0 = arith.constant 0 : i32
    %c0_i32_1 = arith.constant 0 : i32
    return %c0_i32, %c0_i32_0 : i32, i32
  }
  func.func @transform_3(%arg0: i32) -> (i32, i32) {
    %c0_i32 = arith.constant 0 : i32
    %c0_i32_0 = arith.constant 0 : i32
    return %arg0, %c0_i32 : i32, i32
  }
}

module attributes {stable_mosaic.version = 11 : i64} {
  func.func @_matmul_bias_relu_kernel(%arg0: i32, %arg1: memref<104x576xf32, #tpu.memory_space<vmem>>, %arg2: memref<576x64xf32, #tpu.memory_space<vmem>>, %arg3: memref<1x64xf32, #tpu.memory_space<vmem>>, %arg4: memref<104x64xf32, #tpu.memory_space<vmem>>) attributes {dimension_semantics = [#tpu.dimension_semantics<parallel>], iteration_bounds = array<i64: 1>, scalar_prefetch = 0 : i64, scratch_operands = 0 : i64, tpu.core_type = #tpu.core_type<tc>, window_params = [{transform_indices = @transform_0, window_bounds = array<i64: 104, 576>}, {pipeline_mode = #tpu.pipeline_mode<synchronous>, transform_indices = @transform_1, window_bounds = array<i64: 576, 64>}, {pipeline_mode = #tpu.pipeline_mode<synchronous>, transform_indices = @transform_2, window_bounds = array<i64: 1, 64>}, {transform_indices = @transform_3, window_bounds = array<i64: 104, 64>}]} {
    %c0 = arith.constant 0 : index
    %c0_0 = arith.constant 0 : index
    %0 = vector.load %arg1[%c0, %c0_0] : memref<104x576xf32, #tpu.memory_space<vmem>>, vector<104x576xf32>
    %c0_1 = arith.constant 0 : index
    %c0_2 = arith.constant 0 : index
    %1 = vector.load %arg2[%c0_1, %c0_2] : memref<576x64xf32, #tpu.memory_space<vmem>>, vector<576x64xf32>
    %cst = arith.constant dense<0.000000e+00> : vector<104x64xf32>
    %2 = tpu.matmul %0, %1, %cst {dimension_numbers = #tpu.dot_dimension_numbers<[1], [0], [0], [1], [0, 0, 1, 1], [], []>} : vector<104x576xf32>, vector<576x64xf32>, vector<104x64xf32> -> vector<104x64xf32>
    %c0_3 = arith.constant 0 : index
    %c0_4 = arith.constant 0 : index
    %3 = vector.load %arg3[%c0_3, %c0_4] : memref<1x64xf32, #tpu.memory_space<vmem>>, vector<1x64xf32>
    %4 = vector.broadcast %3 : vector<1x64xf32> to vector<104x64xf32>
    %5 = arith.addf %2, %4 : vector<104x64xf32>
    %cst_5 = arith.constant 0.000000e+00 : f32
    %6 = vector.broadcast %cst_5 : f32 to vector<104x64xf32>
    %7 = arith.maximumf %5, %6 : vector<104x64xf32>
    %c0_6 = arith.constant 0 : index
    %c0_7 = arith.constant 0 : index
    %8 = vector.load %arg4[%c0_6, %c0_7] : memref<104x64xf32, #tpu.memory_space<vmem>>, vector<104x64xf32>
    tpu.vector_store %arg4[%c0_6, %c0_7], %7 {strides = array<i32>} : memref<104x64xf32, #tpu.memory_space<vmem>>, vector<104x64xf32>,
    return
  }
  func.func @transform_0(%arg0: i32) -> (i32, i32) {
    %c0_i32 = arith.constant 0 : i32
    %c0_i32_0 = arith.constant 0 : i32
    return %arg0, %c0_i32 : i32, i32
  }
  func.func @transform_1(%arg0: i32) -> (i32, i32) {
    %c0_i32 = arith.constant 0 : i32
    %c0_i32_0 = arith.constant 0 : i32
    %c0_i32_1 = arith.constant 0 : i32
    return %c0_i32, %c0_i32_0 : i32, i32
  }
  func.func @transform_2(%arg0: i32) -> (i32, i32) {
    %c0_i32 = arith.constant 0 : i32
    %c0_i32_0 = arith.constant 0 : i32
    %c0_i32_1 = arith.constant 0 : i32
    return %c0_i32, %c0_i32_0 : i32, i32
  }
  func.func @transform_3(%arg0: i32) -> (i32, i32) {
    %c0_i32 = arith.constant 0 : i32
    %c0_i32_0 = arith.constant 0 : i32
    return %arg0, %c0_i32 : i32, i32
  }
}

module attributes {stable_mosaic.version = 11 : i64} {
  func.func @_fc_fused_kernel(%arg0: i32, %arg1: memref<2x640xf32, #tpu.memory_space<vmem>>, %arg2: memref<640x512xbf16, #tpu.memory_space<vmem>>, %arg3: memref<1x512xf32, #tpu.memory_space<vmem>>, %arg4: memref<512x4xf32, #tpu.memory_space<vmem>>, %arg5: memref<1x4xf32, #tpu.memory_space<vmem>>, %arg6: memref<2x4xf32, #tpu.memory_space<vmem>>, %arg7: memref<2x512xf32, #tpu.memory_space<vmem>>) attributes {dimension_semantics = [#tpu.dimension_semantics<arbitrary>], iteration_bounds = array<i64: 5>, scalar_prefetch = 0 : i64, scratch_operands = 1 : i64, tpu.core_type = #tpu.core_type<tc>, window_params = [{transform_indices = @transform_0, window_bounds = array<i64: 2, 640>}, {transform_indices = @transform_1, window_bounds = array<i64: 640, 512>}, {pipeline_mode = #tpu.pipeline_mode<synchronous>, transform_indices = @transform_2, window_bounds = array<i64: 1, 512>}, {pipeline_mode = #tpu.pipeline_mode<synchronous>, transform_indices = @transform_3, window_bounds = array<i64: 512, 4>}, {pipeline_mode = #tpu.pipeline_mode<synchronous>, transform_indices = @transform_4, window_bounds = array<i64: 1, 4>}, {pipeline_mode = #tpu.pipeline_mode<synchronous>, transform_indices = @transform_5, window_bounds = array<i64: 2, 4>}]} {
    %c0_i32 = arith.constant 0 : i32
    %0 = arith.cmpi eq, %arg0, %c0_i32 : i32
    %1 = arith.extui %0 : i1 to i32
    %c0_i32_0 = arith.constant 0 : i32
    %2 = arith.cmpi ne, %1, %c0_i32_0 : i32
    scf.if %2 {
      %cst_9 = arith.constant 0.000000e+00 : f32
      %13 = vector.broadcast %cst_9 : f32 to vector<2x512xf32>
      %c0_10 = arith.constant 0 : index
      %c0_11 = arith.constant 0 : index
      %14 = vector.load %arg7[%c0_10, %c0_11] : memref<2x512xf32, #tpu.memory_space<vmem>>, vector<2x512xf32>
      tpu.vector_store %arg7[%c0_10, %c0_11], %13 {strides = array<i32>} : memref<2x512xf32, #tpu.memory_space<vmem>>, vector<2x512xf32>,
    } else {
    }
    %c0 = arith.constant 0 : index
    %c0_1 = arith.constant 0 : index
    %3 = vector.load %arg7[%c0, %c0_1] : memref<2x512xf32, #tpu.memory_space<vmem>>, vector<2x512xf32>
    %c0_2 = arith.constant 0 : index
    %c0_3 = arith.constant 0 : index
    %4 = vector.load %arg1[%c0_2, %c0_3] : memref<2x640xf32, #tpu.memory_space<vmem>>, vector<2x640xf32>
    %c0_4 = arith.constant 0 : index
    %c0_5 = arith.constant 0 : index
    %5 = vector.load %arg2[%c0_4, %c0_5] : memref<640x512xbf16, #tpu.memory_space<vmem>>, vector<640x512xbf16>
    %6 = arith.extf %5 : vector<640x512xbf16> to vector<640x512xf32>
    %cst = arith.constant dense<0.000000e+00> : vector<2x512xf32>
    %7 = tpu.matmul %4, %6, %cst {dimension_numbers = #tpu.dot_dimension_numbers<[1], [0], [0], [1], [0, 0, 1, 1], [], []>} : vector<2x640xf32>, vector<640x512xf32>, vector<2x512xf32> -> vector<2x512xf32>
    %8 = arith.addf %3, %7 : vector<2x512xf32>
    %c0_6 = arith.constant 0 : index
    %c0_7 = arith.constant 0 : index
    %9 = vector.load %arg7[%c0_6, %c0_7] : memref<2x512xf32, #tpu.memory_space<vmem>>, vector<2x512xf32>
    tpu.vector_store %arg7[%c0_6, %c0_7], %8 {strides = array<i32>} : memref<2x512xf32, #tpu.memory_space<vmem>>, vector<2x512xf32>,
    %c4_i32 = arith.constant 4 : i32
    %10 = arith.cmpi eq, %arg0, %c4_i32 : i32
    %11 = arith.extui %10 : i1 to i32
    %c0_i32_8 = arith.constant 0 : i32
    %12 = arith.cmpi ne, %11, %c0_i32_8 : i32
    scf.if %12 {
      %c0_9 = arith.constant 0 : index
      %c0_10 = arith.constant 0 : index
      %13 = vector.load %arg7[%c0_9, %c0_10] : memref<2x512xf32, #tpu.memory_space<vmem>>, vector<2x512xf32>
      %c0_11 = arith.constant 0 : index
      %c0_12 = arith.constant 0 : index
      %14 = vector.load %arg3[%c0_11, %c0_12] : memref<1x512xf32, #tpu.memory_space<vmem>>, vector<1x512xf32>
      %15 = vector.broadcast %14 : vector<1x512xf32> to vector<2x512xf32>
      %16 = arith.addf %13, %15 : vector<2x512xf32>
      %cst_13 = arith.constant 0.000000e+00 : f32
      %17 = vector.broadcast %cst_13 : f32 to vector<2x512xf32>
      %18 = arith.maximumf %16, %17 : vector<2x512xf32>
      %c0_14 = arith.constant 0 : index
      %c0_15 = arith.constant 0 : index
      %19 = vector.load %arg4[%c0_14, %c0_15] : memref<512x4xf32, #tpu.memory_space<vmem>>, vector<512x4xf32>
      %cst_16 = arith.constant dense<0.000000e+00> : vector<2x4xf32>
      %20 = tpu.matmul %18, %19, %cst_16 {dimension_numbers = #tpu.dot_dimension_numbers<[1], [0], [0], [1], [0, 0, 1, 1], [], []>} : vector<2x512xf32>, vector<512x4xf32>, vector<2x4xf32> -> vector<2x4xf32>
      %c0_17 = arith.constant 0 : index
      %c0_18 = arith.constant 0 : index
      %21 = vector.load %arg5[%c0_17, %c0_18] : memref<1x4xf32, #tpu.memory_space<vmem>>, vector<1x4xf32>
      %22 = vector.broadcast %21 : vector<1x4xf32> to vector<2x4xf32>
      %23 = arith.addf %20, %22 : vector<2x4xf32>
      %c0_19 = arith.constant 0 : index
      %c0_20 = arith.constant 0 : index
      %24 = vector.load %arg6[%c0_19, %c0_20] : memref<2x4xf32, #tpu.memory_space<vmem>>, vector<2x4xf32>
      tpu.vector_store %arg6[%c0_19, %c0_20], %23 {strides = array<i32>} : memref<2x4xf32, #tpu.memory_space<vmem>>, vector<2x4xf32>,
    } else {
    }
    return
  }
  func.func @transform_0(%arg0: i32) -> (i32, i32) {
    %c0_i32 = arith.constant 0 : i32
    %c0_i32_0 = arith.constant 0 : i32
    return %c0_i32, %arg0 : i32, i32
  }
  func.func @transform_1(%arg0: i32) -> (i32, i32) {
    %c0_i32 = arith.constant 0 : i32
    %c0_i32_0 = arith.constant 0 : i32
    return %arg0, %c0_i32 : i32, i32
  }
  func.func @transform_2(%arg0: i32) -> (i32, i32) {
    %c0_i32 = arith.constant 0 : i32
    %c0_i32_0 = arith.constant 0 : i32
    %c0_i32_1 = arith.constant 0 : i32
    return %c0_i32, %c0_i32_0 : i32, i32
  }
  func.func @transform_3(%arg0: i32) -> (i32, i32) {
    %c0_i32 = arith.constant 0 : i32
    %c0_i32_0 = arith.constant 0 : i32
    %c0_i32_1 = arith.constant 0 : i32
    return %c0_i32, %c0_i32_0 : i32, i32
  }
  func.func @transform_4(%arg0: i32) -> (i32, i32) {
    %c0_i32 = arith.constant 0 : i32
    %c0_i32_0 = arith.constant 0 : i32
    %c0_i32_1 = arith.constant 0 : i32
    return %c0_i32, %c0_i32_0 : i32, i32
  }
  func.func @transform_5(%arg0: i32) -> (i32, i32) {
    %c0_i32 = arith.constant 0 : i32
    %c0_i32_0 = arith.constant 0 : i32
    %c0_i32_1 = arith.constant 0 : i32
    return %c0_i32, %c0_i32_0 : i32, i32
  }
}

</mosaic_0001>

<bundles_post_ra>
// kernel: dqn_forward.4
= control target key start
LH: loop header
LB: loop body
LE: loop exit
PB: predicated region body
PF: predicated region fallthrough
CT: control target
= control target key end

     0   :  { %s693_s12 = smov 0   ;;  %s976_s0 = inlined_call_operand.vmem [shape: f32[800,256], index: 0, kind: input, shape index: {}]   ;;  %s977_s1 = inlined_call_operand.vmem [shape: f32[256,32], index: 1, kind: input, shape index: {}]   ;;  %s978_s2 = inlined_call_operand.vmem [shape: f32[1,32], index: 2, kind: input, shape index: {}]   ;;  %s979_s3 = inlined_call_operand.vmem [shape: f32[800,32], index: 3, kind: output, shape index: {}]  }
   0x1 LB: > { %s563_s13 = sadd.s32 4294967295, %s670_s12   ;;  %p567_p0 = scmp.ge.s32.totalorder %s670_s12, 1  ;;  %s670_s12 = sphi %s693_s12, %s13_s12  }
   0x2   : > { %p139_p1 = scmp.lt.s32.totalorder %s670_s12, 5 }
   0x4   : > { %p140_p2 = pnand %p567_p0, %p139_p1 }
   0x5   : > { %v227_v0 = vld [vmem:[%s977_s1] sm:$0xff] (!%p140_p2)  ;;  %v228_v1 = vld [vmem:[%s977_s1 + $0x8] sm:$0xff] (!%p140_p2)  ;;  %v229_v2 = vld [vmem:[%s977_s1 + $0x10] sm:$0xff] (!%p140_p2)  ;;  %s164_s20 = smul.u32 (!%p140_p2), 25, %s563_s13  ;;  %v672_v3 = vmov (!%p140_p2), 0.0|0.0   ;;  %vm481_vm0 = vcmask (!%p140_p2), 261120  }
   0x6   : > { %143 = sbr.rel (%p140_p2) target bundleno = 336 (0x150), region = 32  ;;  %575 = vmatprep.subr.bf16.mxu0 (!%p140_p2), %v672_v3  ;;  %v576_v4 = vpack.c.bf16 (!%p140_p2), %v228_v1, %v227_v0  ;;  %623 = vmatprep.subr.bf16.mxu1 (!%p140_p2), %v672_v3  ;;  %v230_v5 = vld [vmem:[%s977_s1 + $0x18] sm:$0xff] (!%p140_p2)  ;;  %v231_v7 = vld [vmem:[%s977_s1 + $0x20] sm:$0xff] (!%p140_p2)  ;;  %v232_v8 = vld [vmem:[%s977_s1 + $0x28] sm:$0xff] (!%p140_p2) }
   0x7   : > { %p165_p3 = scmp.lt.s32.totalorder (!%p140_p2), %s164_s20, 99  ;;  %v579_v6 = vpack.c.bf16 (!%p140_p2), %v230_v5, %v229_v2  ;;  %v582_v9 = vpack.c.bf16 (!%p140_p2), %v232_v8, %v231_v7  ;;  %v233_v10 = vld [vmem:[%s977_s1 + $0x30] sm:$0xff] (!%p140_p2)  ;;  %v234_v11 = vld [vmem:[%s977_s1 + $0x38] sm:$0xff] (!%p140_p2)  ;;  %v235_v15 = vld [vmem:[%s977_s1 + $0x40] sm:$0xff] (!%p140_p2) }
   0x8   : > { %577 = vmatpush1.bf16.msra.mxu0 (!%p140_p2), %v576_v4  ;;  %639 = vmatpush1.bf16.msra.mxu1 (!%p140_p2), %v576_v4  ;;  %v585_v13 = vpack.c.bf16 (!%p140_p2), %v234_v11, %v233_v10  ;;  %v236_v16 = vld [vmem:[%s977_s1 + $0x48] sm:$0xff] (!%p140_p2)  ;;  %v237_v18 = vld [vmem:[%s977_s1 + $0x50] sm:$0xff] (!%p140_p2)  ;;  %v238_v19 = vld [vmem:[%s977_s1 + $0x58] sm:$0xff] (!%p140_p2) }
   0x9   : > { %578 = vmatprep.subr.bf16.mxu0 (!%p140_p2), %v672_v3  ;;  %624 = vmatprep.subr.bf16.mxu1 (!%p140_p2), %v672_v3  ;;  %v588_v17 = vpack.c.bf16 (!%p140_p2), %v236_v16, %v235_v15  ;;  %v591_v20 = vpack.c.bf16 (!%p140_p2), %v238_v19, %v237_v18  ;;  %v239_v21 = vld [vmem:[%s977_s1 + $0x60] sm:$0xff] (!%p140_p2)  ;;  %v240_v22 = vld [vmem:[%s977_s1 + $0x68] sm:$0xff] (!%p140_p2)  ;;  %v241_v24 = vld [vmem:[%s977_s1 + $0x70] sm:$0xff] (!%p140_p2) }
   0xa   : > { %v594_v23 = vpack.c.bf16 (!%p140_p2), %v240_v22, %v239_v21  ;;  %v242_v25 = vld [vmem:[%s977_s1 + $0x78] sm:$0xff] (!%p140_p2)  ;;  %v243_v27 = vld [vmem:[%s977_s1 + $0x80] sm:$0xff] (!%p140_p2)  ;;  %v244_v28 = vld [vmem:[%s977_s1 + $0x88] sm:$0xff] (!%p140_p2) }
   0xb   : > { %v597_v26 = vpack.c.bf16 (!%p140_p2), %v242_v25, %v241_v24  ;;  %v600_v29 = vpack.c.bf16 (!%p140_p2), %v244_v28, %v243_v27  ;;  %v245_v30 = vld [vmem:[%s977_s1 + $0x90] sm:$0xff] (!%p140_p2)  ;;  %v246_v31 = vld [vmem:[%s977_s1 + $0x98] sm:$0xff] (!%p140_p2)  ;;  %v247_v33 = vld [vmem:[%s977_s1 + $0xa0] sm:$0xff] (!%p140_p2) }
   0xc   : > { %580 = vmatpush1.bf16.msra.mxu0 (!%p140_p2), %v579_v6  ;;  %640 = vmatpush1.bf16.msra.mxu1 (!%p140_p2), %v579_v6  ;;  %v603_v32 = vpack.c.bf16 (!%p140_p2), %v246_v31, %v245_v30  ;;  %v248_v34 = vld [vmem:[%s977_s1 + $0xa8] sm:$0xff] (!%p140_p2)  ;;  %v249_v36 = vld [vmem:[%s977_s1 + $0xb0] sm:$0xff] (!%p140_p2)  ;;  %v250_v37 = vld [vmem:[%s977_s1 + $0xb8] sm:$0xff] (!%p140_p2) }
   0xd   : > { %s981_s20 = smov (!%p165_p3, %s164_s20), 99  ;;  %581 = vmatprep.subr.bf16.mxu0 %v672_v3  ;;  %625 = vmatprep.subr.bf16.mxu1 %v672_v3  ;;  %v606_v35 = vpack.c.bf16 %v248_v34, %v247_v33  ;;  %v609_v38 = vpack.c.bf16 %v250_v37, %v249_v36  ;;  %v251_v39 = vld [vmem:[%s977_s1 + $0xc0] sm:$0xff]  ;;  %v252_v40 = vld [vmem:[%s977_s1 + $0xc8] sm:$0xff]  ;;  %v253_v42 = vld [vmem:[%s977_s1 + $0xd0] sm:$0xff] }
   0xe   : > { %s574_s27 = sshll.u32 %s981_s20, 4  ;;  %v612_v41 = vpack.c.bf16 %v252_v40, %v251_v39  ;;  %v254_v43 = vld [vmem:[%s977_s1 + $0xd8] sm:$0xff]  ;;  %v255_v45 = vld [vmem:[%s977_s1 + $0xe0] sm:$0xff]  ;;  %v256_v46 = vld [vmem:[%s977_s1 + $0xe8] sm:$0xff]  ;;  %s570_s10 = sshll.u32 %s981_s20, 3 }
   0xf   : > { %s729_s30 = scalar_lea.vmem %s976_s0, %s574_s27  ;;  %v615_v44 = vpack.c.bf16 %v254_v43, %v253_v42  ;;  %v618_v47 = vpack.c.bf16 %v256_v46, %v255_v45  ;;  %v257_v48 = vld [vmem:[%s977_s1 + $0xf0] sm:$0xff]  ;;  %v258_v49 = vld [vmem:[%s977_s1 + $0xf8] sm:$0xff]  ;;  %s898_s14 = scalar_lea.vmem %s979_s3, %s570_s10 }
  0x10   : > { %v178_v12 = vld [vmem:[%s729_s30 + $0x8] sm:$0xff]  ;;  %583 = vmatpush1.bf16.msra.mxu0 %v582_v9  ;;  %641 = vmatpush1.bf16.msra.mxu1 %v582_v9  ;;  %v204_v14 = vld [vmem:[%s729_s30 + $0xd8] sm:$0xff]  ;;  %v621_v50 = vpack.c.bf16 %v258_v49, %v257_v48  ;;  %v177_v51 = vld [vmem:[%s729_s30] sm:$0xff] }
  0x11   : > { %584 = vmatprep.subr.bf16.mxu0 %v672_v3  ;;  %626 = vmatprep.subr.bf16.mxu1 %v672_v3  ;;  %v203_v52 = vld [vmem:[%s729_s30 + $0xd0] sm:$0xff]  ;;  %v180_v53 = vld [vmem:[%s729_s30 + $0x18] sm:$0xff]  ;;  %v206_v54 = vld [vmem:[%s729_s30 + $0xe8] sm:$0xff] }
  0x12   : > { %330 = vmatprep.mubr.f32.mxu0 %v178_v12  ;;  %395 = vmatprep.mubr.f32.mxu1 %v204_v14  ;;  %v179_v55 = vld [vmem:[%s729_s30 + $0x10] sm:$0xff]  ;;  %v205_v56 = vld [vmem:[%s729_s30 + $0xe0] sm:$0xff]  ;;  %v182_v57 = vld [vmem:[%s729_s30 + $0x28] sm:$0xff] }
  0x13   : > { %v208_v58 = vld [vmem:[%s729_s30 + $0xf8] sm:$0xff]  ;;  %v181_v59 = vld [vmem:[%s729_s30 + $0x20] sm:$0xff]  ;;  %v207_v60 = vld [vmem:[%s729_s30 + $0xf0] sm:$0xff] }
  0x14   : > { %586 = vmatpush1.bf16.msra.mxu0 %v585_v13  ;;  %642 = vmatpush1.bf16.msra.mxu1 %v585_v13  ;;  %v184_v61 = vld [vmem:[%s729_s30 + $0x38] sm:$0xff]  ;;  %v210_v62 = vld [vmem:[%s729_s30 + $0x108] sm:$0xff]  ;;  %v183_v63 = vld [vmem:[%s729_s30 + $0x30] sm:$0xff] }
  0x15   : > { %587 = vmatprep.subr.bf16.mxu0 %v672_v3  ;;  %627 = vmatprep.subr.bf16.mxu1 %v672_v3  ;;  %v209_v0 = vld [vmem:[%s729_s30 + $0x100] sm:$0xff]  ;;  %v186_v1 = vld [vmem:[%s729_s30 + $0x48] sm:$0xff]  ;;  %v212_v2 = vld [vmem:[%s729_s30 + $0x118] sm:$0xff] }
  0x16   : > { %v211_v4 = vld [vmem:[%s729_s30 + $0x110] sm:$0xff]  ;;  %v188_v5 = vld [vmem:[%s729_s30 + $0x58] sm:$0xff]  ;;  %v214_v6 = vld [vmem:[%s729_s30 + $0x128] sm:$0xff] }
  0x17   : > { %v187_v7 = vld [vmem:[%s729_s30 + $0x50] sm:$0xff]  ;;  %v213_v8 = vld [vmem:[%s729_s30 + $0x120] sm:$0xff]  ;;  %v190_v9 = vld [vmem:[%s729_s30 + $0x68] sm:$0xff] }
  0x18   : > { %589 = vmatpush1.bf16.msra.mxu0 %v588_v17  ;;  %643 = vmatpush1.bf16.msra.mxu1 %v588_v17  ;;  %v216_v10 = vld [vmem:[%s729_s30 + $0x138] sm:$0xff]  ;;  %v189_v11 = vld [vmem:[%s729_s30 + $0x60] sm:$0xff]  ;;  %v215_v12 = vld [vmem:[%s729_s30 + $0x130] sm:$0xff] }
  0x19   : > { %590 = vmatprep.subr.bf16.mxu0 %v672_v3  ;;  %628 = vmatprep.subr.bf16.mxu1 %v672_v3  ;;  %v192_v13 = vld [vmem:[%s729_s30 + $0x78] sm:$0xff]  ;;  %v218_v14 = vld [vmem:[%s729_s30 + $0x148] sm:$0xff]  ;;  %v191_v15 = vld [vmem:[%s729_s30 + $0x70] sm:$0xff] }
  0x1a   : > { %v217_v16 = vld [vmem:[%s729_s30 + $0x140] sm:$0xff]  ;;  %v194_v17 = vld [vmem:[%s729_s30 + $0x88] sm:$0xff]  ;;  %v220_v18 = vld [vmem:[%s729_s30 + $0x158] sm:$0xff] }
  0x1b   : > { %v193_v19 = vld [vmem:[%s729_s30 + $0x80] sm:$0xff]  ;;  %v196_v21 = vld [vmem:[%s729_s30 + $0x98] sm:$0xff]  ;;  %v222_v22 = vld [vmem:[%s729_s30 + $0x168] sm:$0xff] }
  0x1c   : > { %592 = vmatpush1.bf16.msra.mxu0 %v591_v20  ;;  %644 = vmatpush1.bf16.msra.mxu1 %v591_v20  ;;  %v219_v20 = vld [vmem:[%s729_s30 + $0x150] sm:$0xff]  ;;  %v221_v24 = vld [vmem:[%s729_s30 + $0x160] sm:$0xff]  ;;  %v198_v25 = vld [vmem:[%s729_s30 + $0xa8] sm:$0xff] }
  0x1d   : > { %593 = vmatprep.subr.bf16.mxu0 %v672_v3  ;;  %629 = vmatprep.subr.bf16.mxu1 %v672_v3  ;;  %v197_v27 = vld [vmem:[%s729_s30 + $0xa0] sm:$0xff]  ;;  %v223_v28 = vld [vmem:[%s729_s30 + $0x170] sm:$0xff]  ;;  %v226_v30 = vld [vmem:[%s729_s30 + $0x188] sm:$0xff] }
  0x1e   : > { %v199_v31 = vld [vmem:[%s729_s30 + $0xb0] sm:$0xff]  ;;  %v202_v33 = vld [vmem:[%s729_s30 + $0xc8] sm:$0xff]  ;;  %v201_v34 = vld [vmem:[%s729_s30 + $0xc0] sm:$0xff] }
  0x20   : > { %595 = vmatpush1.bf16.msra.mxu0 %v594_v23  ;;  %645 = vmatpush1.bf16.msra.mxu1 %v594_v23  ;;  %v195_v23 = vld [vmem:[%s729_s30 + $0x90] sm:$0xff] }
  0x21   : > { %596 = vmatprep.subr.bf16.mxu0 %v672_v3  ;;  %630 = vmatprep.subr.bf16.mxu1 %v672_v3 }
  0x24   : > { %598 = vmatpush1.bf16.msra.mxu0 %v597_v26  ;;  %646 = vmatpush1.bf16.msra.mxu1 %v597_v26  ;;  %v224_v26 = vld [vmem:[%s729_s30 + $0x178] sm:$0xff] }
  0x25   : > { %599 = vmatprep.subr.bf16.mxu0 %v672_v3  ;;  %631 = vmatprep.subr.bf16.mxu1 %v672_v3 }
  0x28   : > { %601 = vmatpush1.bf16.msra.mxu0 %v600_v29  ;;  %647 = vmatpush1.bf16.msra.mxu1 %v600_v29  ;;  %v200_v29 = vld [vmem:[%s729_s30 + $0xb8] sm:$0xff] }
  0x29   : > { %602 = vmatprep.subr.bf16.mxu0 %v672_v3  ;;  %632 = vmatprep.subr.bf16.mxu1 %v672_v3 }
  0x2c   : > { %604 = vmatpush1.bf16.msra.mxu0 %v603_v32  ;;  %648 = vmatpush1.bf16.msra.mxu1 %v603_v32  ;;  %v225_v32 = vld [vmem:[%s729_s30 + $0x180] sm:$0xff] }
  0x2d   : > { %605 = vmatprep.subr.bf16.mxu0 %v672_v3  ;;  %633 = vmatprep.subr.bf16.mxu1 %v672_v3 }
  0x30   : > { %607 = vmatpush1.bf16.msra.mxu0 %v606_v35  ;;  %649 = vmatpush1.bf16.msra.mxu1 %v606_v35  ;;  %v890_v35 = vld [vmem:[%s978_s2] ss:$0 sm:$0xff] }
  0x31   : > { %608 = vmatprep.subr.bf16.mxu0 %v672_v3  ;;  %634 = vmatprep.subr.bf16.mxu1 %v672_v3 }
  0x34   : > { %610 = vmatpush1.bf16.msra.mxu0 %v609_v38  ;;  %650 = vmatpush1.bf16.msra.mxu1 %v609_v38 }
  0x35   : > { %611 = vmatprep.subr.bf16.mxu0 %v672_v3  ;;  %635 = vmatprep.subr.bf16.mxu1 %v672_v3 }
  0x38   : > { %613 = vmatpush1.bf16.msra.mxu0 %v612_v41  ;;  %651 = vmatpush1.bf16.msra.mxu1 %v612_v41 }
  0x39   : > { %614 = vmatprep.subr.bf16.mxu0 %v672_v3  ;;  %636 = vmatprep.subr.bf16.mxu1 %v672_v3 }
  0x3c   : > { %616 = vmatpush1.bf16.msra.mxu0 %v615_v44  ;;  %652 = vmatpush1.bf16.msra.mxu1 %v615_v44 }
  0x3d   : > { %617 = vmatprep.subr.bf16.mxu0 %v672_v3  ;;  %637 = vmatprep.subr.bf16.mxu1 %v672_v3 }
  0x40   : > { %619 = vmatpush1.bf16.msra.mxu0 %v618_v47  ;;  %653 = vmatpush1.bf16.msra.mxu1 %v618_v47 }
  0x41   : > { %620 = vmatprep.subr.bf16.mxu0 %v672_v3  ;;  %638 = vmatprep.subr.bf16.mxu1 %v672_v3  ;;  %v185_v3 = vld [vmem:[%s729_s30 + $0x40] sm:$0xff] }
  0x44   : > { %622 = vmatpush1.bf16.msra.mxu0 %v621_v50  ;;  %654 = vmatpush1.bf16.msra.mxu1 %v621_v50 }
  0x47   : > { %331 = vmatmul.mubr.f32.vlgmr.msra.gmra.mrb[0].mxu0 %v177_v51  ;;  %396 = vmatmul.mubr.f32.vlgmr.msra.gmra.mrb[0].mxu1 %v203_v52 }
  0x48   : > { %335 = vmatprep.mubr.f32.mxu0 %v180_v53  ;;  %400 = vmatprep.mubr.f32.mxu1 %v206_v54 }
  0x4b   : > { %336 = vmatmul.mubr.f32.gmra.mrb[2].mxu0 %v179_v55  ;;  %401 = vmatmul.mubr.f32.gmra.mrb[2].mxu1 %v205_v56 }
  0x4c   : > { %340 = vmatprep.mubr.f32.mxu0 %v182_v57  ;;  %405 = vmatprep.mubr.f32.mxu1 %v208_v58 }
  0x4f   : > { %341 = vmatmul.mubr.f32.gmra.mrb[4].mxu0 %v181_v59  ;;  %406 = vmatmul.mubr.f32.gmra.mrb[4].mxu1 %v207_v60 }
  0x50   : > { %345 = vmatprep.mubr.f32.mxu0 %v184_v61  ;;  %410 = vmatprep.mubr.f32.mxu1 %v210_v62 }
  0x53   : > { %346 = vmatmul.mubr.f32.gmra.mrb[6].mxu0 %v183_v63  ;;  %411 = vmatmul.mubr.f32.gmra.mrb[6].mxu1 %v209_v0 }
  0x54   : > { %350 = vmatprep.mubr.f32.mxu0 %v186_v1  ;;  %415 = vmatprep.mubr.f32.mxu1 %v212_v2 }
  0x57   : > { %351 = vmatmul.mubr.f32.gmra.mrb[8].mxu0 %v185_v3  ;;  %416 = vmatmul.mubr.f32.gmra.mrb[8].mxu1 %v211_v4 }
  0x58   : > { %355 = vmatprep.mubr.f32.mxu0 %v188_v5  ;;  %420 = vmatprep.mubr.f32.mxu1 %v214_v6 }
  0x5b   : > { %356 = vmatmul.mubr.f32.gmra.mrb[10].mxu0 %v187_v7  ;;  %421 = vmatmul.mubr.f32.gmra.mrb[10].mxu1 %v213_v8 }
  0x5c   : > { %360 = vmatprep.mubr.f32.mxu0 %v190_v9  ;;  %425 = vmatprep.mubr.f32.mxu1 %v216_v10 }
  0x5f   : > { %361 = vmatmul.mubr.f32.gmra.mrb[12].mxu0 %v189_v11  ;;  %426 = vmatmul.mubr.f32.gmra.mrb[12].mxu1 %v215_v12 }
  0x60   : > { %365 = vmatprep.mubr.f32.mxu0 %v192_v13  ;;  %430 = vmatprep.mubr.f32.mxu1 %v218_v14 }
  0x63   : > { %366 = vmatmul.mubr.f32.gmra.mrb[14].mxu0 %v191_v15  ;;  %431 = vmatmul.mubr.f32.gmra.mrb[14].mxu1 %v217_v16 }
  0x64   : > { %370 = vmatprep.mubr.f32.mxu0 %v194_v17  ;;  %435 = vmatprep.mubr.f32.mxu1 %v220_v18 }
  0x67   : > { %371 = vmatmul.mubr.f32.gmra.mrb[16].mxu0 %v193_v19  ;;  %436 = vmatmul.mubr.f32.gmra.mrb[16].mxu1 %v219_v20 }
  0x68   : > { %375 = vmatprep.mubr.f32.mxu0 %v196_v21  ;;  %440 = vmatprep.mubr.f32.mxu1 %v222_v22 }
  0x6b   : > { %376 = vmatmul.mubr.f32.gmra.mrb[18].mxu0 %v195_v23  ;;  %441 = vmatmul.mubr.f32.gmra.mrb[18].mxu1 %v221_v24 }
  0x6c   : > { %380 = vmatprep.mubr.f32.mxu0 %v198_v25  ;;  %445 = vmatprep.mubr.f32.mxu1 %v224_v26 }
  0x6f   : > { %381 = vmatmul.mubr.f32.gmra.mrb[20].mxu0 %v197_v27  ;;  %446 = vmatmul.mubr.f32.gmra.mrb[20].mxu1 %v223_v28 }
  0x70   : > { %385 = vmatprep.mubr.f32.mxu0 %v200_v29  ;;  %450 = vmatprep.mubr.f32.mxu1 %v226_v30 }
  0x73   : > { %386 = vmatmul.mubr.f32.gmra.mrb[22].mxu0 %v199_v31  ;;  %451 = vmatmul.mubr.f32.gmra.mrb[22].mxu1 %v225_v32 }
  0x74   : > { %390 = vmatprep.mubr.f32.mxu0 %v202_v33 }
  0x77   : > { %391 = vmatmul.mubr.f32.gmra.mrb[24].mxu0 %v201_v34 }
 0x11a   : > { %v332_v36 = vpop.f32.mrb[0].mxu0  ;;  %v397_v37 = vpop.f32.mrb[0].mxu1 }
 0x11b   : > { %v333_v38 = vadd.f32 %v890_v35, %v332_v36  ;;  %v334_v39 = vpop.f32.mrb[1].mxu0  ;;  %v398_v40 = vadd.f32 %v890_v35, %v397_v37  ;;  %v399_v41 = vpop.f32.mrb[1].mxu1 }
 0x11d   : > { %v456_v42 = vmax.f32 %v333_v38, 0.0  ;;  %v469_v43 = vmax.f32 %v398_v40, 0.0 }
 0x11e   : > { %v337_v44 = vpop.f32.mrb[2].mxu0  ;;  %v402_v45 = vpop.f32.mrb[2].mxu1 }
 0x11f   : > { %482 = vst.msk [vmem:[%s898_s14] sm:$0xff] %vm481_vm0, %v456_v42  ;;  %495 = vst.msk [vmem:[%s898_s14 + $0x68] sm:$0xff] %vm481_vm0, %v469_v43  ;;  %v338_v46 = vadd.f32 %v890_v35, %v337_v44  ;;  %v339_v47 = vpop.f32.mrb[3].mxu0  ;;  %v403_v48 = vadd.f32 %v890_v35, %v402_v45  ;;  %v404_v49 = vpop.f32.mrb[3].mxu1 }
 0x121   : > { %v457_v50 = vmax.f32 %v338_v46, 0.0  ;;  %v470_v51 = vmax.f32 %v403_v48, 0.0 }
 0x122   : > { %v342_v52 = vpop.f32.mrb[4].mxu0  ;;  %v407_v53 = vpop.f32.mrb[4].mxu1 }
 0x123   : > { %483 = vst.msk [vmem:[%s898_s14 + $0x8] sm:$0xff] %vm481_vm0, %v457_v50  ;;  %496 = vst.msk [vmem:[%s898_s14 + $0x70] sm:$0xff] %vm481_vm0, %v470_v51  ;;  %v343_v54 = vadd.f32 %v890_v35, %v342_v52  ;;  %v344_v55 = vpop.f32.mrb[5].mxu0  ;;  %v408_v56 = vadd.f32 %v890_v35, %v407_v53  ;;  %v409_v57 = vpop.f32.mrb[5].mxu1 }
 0x125   : > { %v458_v58 = vmax.f32 %v343_v54, 0.0  ;;  %v471_v59 = vmax.f32 %v408_v56, 0.0 }
 0x126   : > { %v347_v60 = vpop.f32.mrb[6].mxu0  ;;  %v412_v61 = vpop.f32.mrb[6].mxu1 }
 0x127   : > { %484 = vst.msk [vmem:[%s898_s14 + $0x10] sm:$0xff] %vm481_vm0, %v458_v58  ;;  %497 = vst.msk [vmem:[%s898_s14 + $0x78] sm:$0xff] %vm481_vm0, %v471_v59  ;;  %v348_v62 = vadd.f32 %v890_v35, %v347_v60  ;;  %v349_v63 = vpop.f32.mrb[7].mxu0  ;;  %v413_v0 = vadd.f32 %v890_v35, %v412_v61  ;;  %v414_v1 = vpop.f32.mrb[7].mxu1 }
 0x129   : > { %v459_v2 = vmax.f32 %v348_v62, 0.0  ;;  %v472_v3 = vmax.f32 %v413_v0, 0.0 }
 0x12a   : > { %v352_v4 = vpop.f32.mrb[8].mxu0  ;;  %v417_v5 = vpop.f32.mrb[8].mxu1 }
 0x12b   : > { %485 = vst.msk [vmem:[%s898_s14 + $0x18] sm:$0xff] %vm481_vm0, %v459_v2  ;;  %498 = vst.msk [vmem:[%s898_s14 + $0x80] sm:$0xff] %vm481_vm0, %v472_v3  ;;  %v353_v6 = vadd.f32 %v890_v35, %v352_v4  ;;  %v354_v7 = vpop.f32.mrb[9].mxu0  ;;  %v418_v8 = vadd.f32 %v890_v35, %v417_v5  ;;  %v419_v9 = vpop.f32.mrb[9].mxu1 }
 0x12d   : > { %v460_v10 = vmax.f32 %v353_v6, 0.0  ;;  %v473_v11 = vmax.f32 %v418_v8, 0.0 }
 0x12e   : > { %v357_v12 = vpop.f32.mrb[10].mxu0  ;;  %v422_v13 = vpop.f32.mrb[10].mxu1 }
 0x12f   : > { %486 = vst.msk [vmem:[%s898_s14 + $0x20] sm:$0xff] %vm481_vm0, %v460_v10  ;;  %499 = vst.msk [vmem:[%s898_s14 + $0x88] sm:$0xff] %vm481_vm0, %v473_v11  ;;  %v358_v14 = vadd.f32 %v890_v35, %v357_v12  ;;  %v359_v15 = vpop.f32.mrb[11].mxu0  ;;  %v423_v16 = vadd.f32 %v890_v35, %v422_v13  ;;  %v424_v17 = vpop.f32.mrb[11].mxu1 }
 0x131   : > { %v461_v18 = vmax.f32 %v358_v14, 0.0  ;;  %v474_v19 = vmax.f32 %v423_v16, 0.0 }
 0x132   : > { %v362_v20 = vpop.f32.mrb[12].mxu0  ;;  %v427_v21 = vpop.f32.mrb[12].mxu1 }
 0x133   : > { %487 = vst.msk [vmem:[%s898_s14 + $0x28] sm:$0xff] %vm481_vm0, %v461_v18  ;;  %500 = vst.msk [vmem:[%s898_s14 + $0x90] sm:$0xff] %vm481_vm0, %v474_v19  ;;  %v363_v22 = vadd.f32 %v890_v35, %v362_v20  ;;  %v364_v23 = vpop.f32.mrb[13].mxu0  ;;  %v428_v24 = vadd.f32 %v890_v35, %v427_v21  ;;  %v429_v25 = vpop.f32.mrb[13].mxu1 }
 0x135   : > { %v462_v26 = vmax.f32 %v363_v22, 0.0  ;;  %v475_v27 = vmax.f32 %v428_v24, 0.0 }
 0x136   : > { %v367_v28 = vpop.f32.mrb[14].mxu0  ;;  %v432_v29 = vpop.f32.mrb[14].mxu1 }
 0x137   : > { %488 = vst.msk [vmem:[%s898_s14 + $0x30] sm:$0xff] %vm481_vm0, %v462_v26  ;;  %501 = vst.msk [vmem:[%s898_s14 + $0x98] sm:$0xff] %vm481_vm0, %v475_v27  ;;  %v368_v30 = vadd.f32 %v890_v35, %v367_v28  ;;  %v369_v31 = vpop.f32.mrb[15].mxu0  ;;  %v433_v32 = vadd.f32 %v890_v35, %v432_v29  ;;  %v434_v33 = vpop.f32.mrb[15].mxu1 }
 0x139   : > { %v463_v34 = vmax.f32 %v368_v30, 0.0  ;;  %v476_v36 = vmax.f32 %v433_v32, 0.0 }
 0x13a   : > { %v372_v37 = vpop.f32.mrb[16].mxu0  ;;  %v437_v38 = vpop.f32.mrb[16].mxu1 }
 0x13b   : > { %489 = vst.msk [vmem:[%s898_s14 + $0x38] sm:$0xff] %vm481_vm0, %v463_v34  ;;  %502 = vst.msk [vmem:[%s898_s14 + $0xa0] sm:$0xff] %vm481_vm0, %v476_v36  ;;  %v373_v39 = vadd.f32 %v890_v35, %v372_v37  ;;  %v374_v40 = vpop.f32.mrb[17].mxu0  ;;  %v438_v41 = vadd.f32 %v890_v35, %v437_v38  ;;  %v439_v42 = vpop.f32.mrb[17].mxu1 }
 0x13d   : > { %v464_v43 = vmax.f32 %v373_v39, 0.0  ;;  %v477_v44 = vmax.f32 %v438_v41, 0.0 }
 0x13e   : > { %v377_v45 = vpop.f32.mrb[18].mxu0  ;;  %v442_v46 = vpop.f32.mrb[18].mxu1 }
 0x13f   : > { %490 = vst.msk [vmem:[%s898_s14 + $0x40] sm:$0xff] %vm481_vm0, %v464_v43  ;;  %503 = vst.msk [vmem:[%s898_s14 + $0xa8] sm:$0xff] %vm481_vm0, %v477_v44  ;;  %v378_v47 = vadd.f32 %v890_v35, %v377_v45  ;;  %v379_v48 = vpop.f32.mrb[19].mxu0  ;;  %v443_v49 = vadd.f32 %v890_v35, %v442_v46  ;;  %v444_v50 = vpop.f32.mrb[19].mxu1 }
 0x141   : > { %v465_v51 = vmax.f32 %v378_v47, 0.0  ;;  %v478_v52 = vmax.f32 %v443_v49, 0.0 }
 0x142   : > { %v382_v53 = vpop.f32.mrb[20].mxu0  ;;  %v447_v54 = vpop.f32.mrb[20].mxu1 }
 0x143   : > { %491 = vst.msk [vmem:[%s898_s14 + $0x48] sm:$0xff] %vm481_vm0, %v465_v51  ;;  %504 = vst.msk [vmem:[%s898_s14 + $0xb0] sm:$0xff] %vm481_vm0, %v478_v52  ;;  %v383_v55 = vadd.f32 %v890_v35, %v382_v53  ;;  %v384_v56 = vpop.f32.mrb[21].mxu0  ;;  %v448_v57 = vadd.f32 %v890_v35, %v447_v54  ;;  %v449_v58 = vpop.f32.mrb[21].mxu1 }
 0x145   : > { %v466_v59 = vmax.f32 %v383_v55, 0.0  ;;  %v479_v60 = vmax.f32 %v448_v57, 0.0 }
 0x146   : > { %v387_v61 = vpop.f32.mrb[22].mxu0  ;;  %v452_v62 = vpop.f32.mrb[22].mxu1 }
 0x147   : > { %492 = vst.msk [vmem:[%s898_s14 + $0x50] sm:$0xff] %vm481_vm0, %v466_v59  ;;  %505 = vst.msk [vmem:[%s898_s14 + $0xb8] sm:$0xff] %vm481_vm0, %v479_v60  ;;  %v388_v63 = vadd.f32 %v890_v35, %v387_v61  ;;  %v389_v0 = vpop.f32.mrb[23].mxu0  ;;  %v453_v1 = vadd.f32 %v890_v35, %v452_v62  ;;  %v454_v2 = vpop.f32.mrb[23].mxu1 }
 0x149   : > { %v467_v3 = vmax.f32 %v388_v63, 0.0  ;;  %v480_v4 = vmax.f32 %v453_v1, 0.0 }
 0x14a   : > { %v392_v5 = vpop.f32.mrb[24].mxu0 }
 0x14b   : > { %493 = vst.msk [vmem:[%s898_s14 + $0x58] sm:$0xff] %vm481_vm0, %v467_v3  ;;  %506 = vst.msk [vmem:[%s898_s14 + $0xc0] sm:$0xff] %vm481_vm0, %v480_v4  ;;  %v393_v6 = vadd.f32 %v890_v35, %v392_v5  ;;  %v394_v7 = vpop.f32.mrb[25].mxu0 }
 0x14d   : > { %v468_v8 = vmax.f32 %v393_v6, 0.0 }
 0x14f   : > { %494 = vst.msk [vmem:[%s898_s14 + $0x60] sm:$0xff] %vm481_vm0, %v468_v8 }
 0x150 PF: > { %s13_s12 = sadd.s32 1, %s670_s12  }
 0x151   : > { %p10_p4 = scmp.ge.s32.totalorder %s13_s12, 6  }
 0x153   :  { %12 = sbr.rel (!%p10_p4) target bundleno = 1 (0x1), region = 62 }

// kernel: dqn_forward.5
= control target key start
LH: loop header
LB: loop body
LE: loop exit
PB: predicated region body
PF: predicated region fallthrough
CT: control target
= control target key end

     0   :  { %v696_v0 = vmov 0.0|0.0   ;;  %vm530_vm0 = vcmask 523264   ;;  %s1303_s1 = inlined_call_operand.vmem [shape: f32[512,64], index: 1, kind: input, shape index: {}]   ;;  %s1304_s0 = inlined_call_operand.vmem [shape: f32[168,512], index: 0, kind: input, shape index: {}]   ;;  %s1305_s2 = inlined_call_operand.vmem [shape: f32[1,64], index: 2, kind: input, shape index: {}]   ;;  %s1306_s3 = inlined_call_operand.vmem [shape: f32[168,64], index: 3, kind: output, shape index: {}]  }
   0x1   :  { %557 = vmatprep.subr.bf16.mxu1 %v696_v0  ;;  %v98_v1 = vld [vmem:[%s1303_s1] sm:$0xff]  ;;  %v99_v2 = vld [vmem:[%s1303_s1 + $0x8] sm:$0xff]  ;;  %605 = vmatprep.subr.bf16.mxu0 %v696_v0  ;;  %v100_v6 = vld [vmem:[%s1303_s1 + $0x10] sm:$0xff] }
   0x2   :  { %v130_v3 = vld [vmem:[%s1303_s1 + $0x100] sm:$0xff]  ;;  %v558_v4 = vpack.c.bf16 %v99_v2, %v98_v1  ;;  %v131_v5 = vld [vmem:[%s1303_s1 + $0x108] sm:$0xff]  ;;  %v101_v7 = vld [vmem:[%s1303_s1 + $0x18] sm:$0xff] }
   0x3   :  { %v606_v8 = vpack.c.bf16 %v131_v5, %v130_v3  ;;  %v132_v9 = vld [vmem:[%s1303_s1 + $0x110] sm:$0xff]  ;;  %v133_v10 = vld [vmem:[%s1303_s1 + $0x118] sm:$0xff]  ;;  %v561_v11 = vpack.c.bf16 %v101_v7, %v100_v6  ;;  %v102_v13 = vld [vmem:[%s1303_s1 + $0x20] sm:$0xff] }
   0x4   :  { %559 = vmatpush1.bf16.msra.mxu1 %v558_v4  ;;  %v609_v12 = vpack.c.bf16 %v133_v10, %v132_v9  ;;  %v103_v14 = vld [vmem:[%s1303_s1 + $0x28] sm:$0xff]  ;;  %v134_v15 = vld [vmem:[%s1303_s1 + $0x120] sm:$0xff]  ;;  %v104_v19 = vld [vmem:[%s1303_s1 + $0x30] sm:$0xff] }
   0x5   :  { %607 = vmatpush1.bf16.msra.mxu0 %v606_v8  ;;  %560 = vmatprep.subr.bf16.mxu1 %v696_v0  ;;  %v135_v16 = vld [vmem:[%s1303_s1 + $0x128] sm:$0xff]  ;;  %v564_v17 = vpack.c.bf16 %v103_v14, %v102_v13  ;;  %v105_v20 = vld [vmem:[%s1303_s1 + $0x38] sm:$0xff]  ;;  %v136_v21 = vld [vmem:[%s1303_s1 + $0x130] sm:$0xff] }
   0x6   :  { %608 = vmatprep.subr.bf16.mxu0 %v696_v0  ;;  %v612_v18 = vpack.c.bf16 %v135_v16, %v134_v15  ;;  %v137_v22 = vld [vmem:[%s1303_s1 + $0x138] sm:$0xff]  ;;  %v567_v23 = vpack.c.bf16 %v105_v20, %v104_v19  ;;  %v106_v25 = vld [vmem:[%s1303_s1 + $0x40] sm:$0xff]  ;;  %v107_v26 = vld [vmem:[%s1303_s1 + $0x48] sm:$0xff] }
   0x7   :  { %v615_v24 = vpack.c.bf16 %v137_v22, %v136_v21  ;;  %v138_v27 = vld [vmem:[%s1303_s1 + $0x140] sm:$0xff]  ;;  %v139_v28 = vld [vmem:[%s1303_s1 + $0x148] sm:$0xff]  ;;  %v570_v29 = vpack.c.bf16 %v107_v26, %v106_v25  ;;  %v108_v31 = vld [vmem:[%s1303_s1 + $0x50] sm:$0xff] }
   0x8   :  { %562 = vmatpush1.bf16.msra.mxu1 %v561_v11  ;;  %v618_v30 = vpack.c.bf16 %v139_v28, %v138_v27  ;;  %v109_v32 = vld [vmem:[%s1303_s1 + $0x58] sm:$0xff]  ;;  %v140_v33 = vld [vmem:[%s1303_s1 + $0x150] sm:$0xff]  ;;  %v110_v37 = vld [vmem:[%s1303_s1 + $0x60] sm:$0xff] }
   0x9   :  { %610 = vmatpush1.bf16.msra.mxu0 %v609_v12  ;;  %563 = vmatprep.subr.bf16.mxu1 %v696_v0  ;;  %v141_v34 = vld [vmem:[%s1303_s1 + $0x158] sm:$0xff]  ;;  %v573_v35 = vpack.c.bf16 %v109_v32, %v108_v31  ;;  %v111_v38 = vld [vmem:[%s1303_s1 + $0x68] sm:$0xff]  ;;  %v142_v39 = vld [vmem:[%s1303_s1 + $0x160] sm:$0xff] }
   0xa   :  { %611 = vmatprep.subr.bf16.mxu0 %v696_v0  ;;  %v621_v36 = vpack.c.bf16 %v141_v34, %v140_v33  ;;  %v143_v40 = vld [vmem:[%s1303_s1 + $0x168] sm:$0xff]  ;;  %v17_v42 = vld [vmem:[%s1304_s0 + $0x18] sm:$0xff]  ;;  %v576_v43 = vpack.c.bf16 %v111_v38, %v110_v37  ;;  %v112_v45 = vld [vmem:[%s1303_s1 + $0x70] sm:$0xff] }
   0xb   :  { %v15_v41 = vld [vmem:[%s1304_s0 + $0x8] sm:$0xff]  ;;  %403 = vmatprep.mubr.f32.mxu0 %v17_v42  ;;  %v624_v44 = vpack.c.bf16 %v143_v40, %v142_v39  ;;  %v113_v46 = vld [vmem:[%s1303_s1 + $0x78] sm:$0xff]  ;;  %v144_v47 = vld [vmem:[%s1303_s1 + $0x170] sm:$0xff] }
   0xc   :  { %565 = vmatpush1.bf16.msra.mxu1 %v564_v17  ;;  %233 = vmatprep.mubr.f32.mxu1 %v15_v41  ;;  %v145_v48 = vld [vmem:[%s1303_s1 + $0x178] sm:$0xff]  ;;  %v579_v49 = vpack.c.bf16 %v113_v46, %v112_v45  ;;  %v114_v51 = vld [vmem:[%s1303_s1 + $0x80] sm:$0xff]  ;;  %v115_v52 = vld [vmem:[%s1303_s1 + $0x88] sm:$0xff] }
   0xd   :  { %613 = vmatpush1.bf16.msra.mxu0 %v612_v18  ;;  %566 = vmatprep.subr.bf16.mxu1 %v696_v0  ;;  %v627_v50 = vpack.c.bf16 %v145_v48, %v144_v47  ;;  %v146_v53 = vld [vmem:[%s1303_s1 + $0x180] sm:$0xff]  ;;  %v147_v54 = vld [vmem:[%s1303_s1 + $0x188] sm:$0xff]  ;;  %v582_v55 = vpack.c.bf16 %v115_v52, %v114_v51  ;;  %v116_v57 = vld [vmem:[%s1303_s1 + $0x90] sm:$0xff] }
   0xe   :  { %614 = vmatprep.subr.bf16.mxu0 %v696_v0  ;;  %v630_v56 = vpack.c.bf16 %v147_v54, %v146_v53  ;;  %v117_v58 = vld [vmem:[%s1303_s1 + $0x98] sm:$0xff]  ;;  %v148_v59 = vld [vmem:[%s1303_s1 + $0x190] sm:$0xff]  ;;  %v118_v63 = vld [vmem:[%s1303_s1 + $0xa0] sm:$0xff] }
   0xf   :  { %v149_v60 = vld [vmem:[%s1303_s1 + $0x198] sm:$0xff]  ;;  %v585_v61 = vpack.c.bf16 %v117_v58, %v116_v57  ;;  %v119_v1 = vld [vmem:[%s1303_s1 + $0xa8] sm:$0xff]  ;;  %v150_v2 = vld [vmem:[%s1303_s1 + $0x1a0] sm:$0xff] }
  0x10   :  { %568 = vmatpush1.bf16.msra.mxu1 %v567_v23  ;;  %v633_v62 = vpack.c.bf16 %v149_v60, %v148_v59  ;;  %v151_v3 = vld [vmem:[%s1303_s1 + $0x1a8] sm:$0xff]  ;;  %v588_v4 = vpack.c.bf16 %v119_v1, %v118_v63  ;;  %v120_v6 = vld [vmem:[%s1303_s1 + $0xb0] sm:$0xff]  ;;  %v121_v7 = vld [vmem:[%s1303_s1 + $0xb8] sm:$0xff] }
  0x11   :  { %616 = vmatpush1.bf16.msra.mxu0 %v615_v24  ;;  %569 = vmatprep.subr.bf16.mxu1 %v696_v0  ;;  %v636_v5 = vpack.c.bf16 %v151_v3, %v150_v2  ;;  %v152_v8 = vld [vmem:[%s1303_s1 + $0x1b0] sm:$0xff]  ;;  %v153_v9 = vld [vmem:[%s1303_s1 + $0x1b8] sm:$0xff]  ;;  %v591_v10 = vpack.c.bf16 %v121_v7, %v120_v6  ;;  %v122_v12 = vld [vmem:[%s1303_s1 + $0xc0] sm:$0xff] }
  0x12   :  { %617 = vmatprep.subr.bf16.mxu0 %v696_v0  ;;  %v639_v11 = vpack.c.bf16 %v153_v9, %v152_v8  ;;  %v123_v13 = vld [vmem:[%s1303_s1 + $0xc8] sm:$0xff]  ;;  %v154_v14 = vld [vmem:[%s1303_s1 + $0x1c0] sm:$0xff]  ;;  %v124_v18 = vld [vmem:[%s1303_s1 + $0xd0] sm:$0xff] }
  0x13   :  { %v155_v15 = vld [vmem:[%s1303_s1 + $0x1c8] sm:$0xff]  ;;  %v594_v16 = vpack.c.bf16 %v123_v13, %v122_v12  ;;  %v125_v19 = vld [vmem:[%s1303_s1 + $0xd8] sm:$0xff]  ;;  %v156_v20 = vld [vmem:[%s1303_s1 + $0x1d0] sm:$0xff] }
  0x14   :  { %571 = vmatpush1.bf16.msra.mxu1 %v570_v29  ;;  %v642_v17 = vpack.c.bf16 %v155_v15, %v154_v14  ;;  %v157_v21 = vld [vmem:[%s1303_s1 + $0x1d8] sm:$0xff]  ;;  %v597_v22 = vpack.c.bf16 %v125_v19, %v124_v18  ;;  %v126_v24 = vld [vmem:[%s1303_s1 + $0xe0] sm:$0xff]  ;;  %v127_v25 = vld [vmem:[%s1303_s1 + $0xe8] sm:$0xff] }
  0x15   :  { %619 = vmatpush1.bf16.msra.mxu0 %v618_v30  ;;  %572 = vmatprep.subr.bf16.mxu1 %v696_v0  ;;  %v645_v23 = vpack.c.bf16 %v157_v21, %v156_v20  ;;  %v158_v26 = vld [vmem:[%s1303_s1 + $0x1e0] sm:$0xff]  ;;  %v159_v27 = vld [vmem:[%s1303_s1 + $0x1e8] sm:$0xff]  ;;  %v600_v28 = vpack.c.bf16 %v127_v25, %v126_v24  ;;  %v128_v30 = vld [vmem:[%s1303_s1 + $0xf0] sm:$0xff] }
  0x16   :  { %620 = vmatprep.subr.bf16.mxu0 %v696_v0  ;;  %v648_v29 = vpack.c.bf16 %v159_v27, %v158_v26  ;;  %v129_v31 = vld [vmem:[%s1303_s1 + $0xf8] sm:$0xff]  ;;  %v160_v32 = vld [vmem:[%s1303_s1 + $0x1f0] sm:$0xff]  ;;  %v19_v38 = vld [vmem:[%s1304_s0 + $0x28] sm:$0xff] }
  0x17   :  { %v161_v33 = vld [vmem:[%s1303_s1 + $0x1f8] sm:$0xff]  ;;  %v603_v34 = vpack.c.bf16 %v129_v31, %v128_v30  ;;  %v16_v37 = vld [vmem:[%s1304_s0 + $0x10] sm:$0xff]  ;;  %v23_v41 = vld [vmem:[%s1304_s0 + $0x48] sm:$0xff] }
  0x18   :  { %574 = vmatpush1.bf16.msra.mxu1 %v573_v35  ;;  %v651_v35 = vpack.c.bf16 %v161_v33, %v160_v32  ;;  %v21_v39 = vld [vmem:[%s1304_s0 + $0x38] sm:$0xff]  ;;  %v20_v40 = vld [vmem:[%s1304_s0 + $0x30] sm:$0xff]  ;;  %v27_v45 = vld [vmem:[%s1304_s0 + $0x68] sm:$0xff] }
  0x19   :  { %622 = vmatpush1.bf16.msra.mxu0 %v621_v36  ;;  %575 = vmatprep.subr.bf16.mxu1 %v696_v0  ;;  %v14_v36 = vld [vmem:[%s1304_s0] sm:$0xff]  ;;  %v25_v42 = vld [vmem:[%s1304_s0 + $0x58] sm:$0xff]  ;;  %v28_v48 = vld [vmem:[%s1304_s0 + $0x70] sm:$0xff] }
  0x1a   :  { %623 = vmatprep.subr.bf16.mxu0 %v696_v0  ;;  %v29_v46 = vld [vmem:[%s1304_s0 + $0x78] sm:$0xff]  ;;  %v26_v47 = vld [vmem:[%s1304_s0 + $0x60] sm:$0xff]  ;;  %v32_v52 = vld [vmem:[%s1304_s0 + $0x90] sm:$0xff] }
  0x1b   :  { %v30_v51 = vld [vmem:[%s1304_s0 + $0x80] sm:$0xff]  ;;  %v35_v53 = vld [vmem:[%s1304_s0 + $0xa8] sm:$0xff]  ;;  %v37_v54 = vld [vmem:[%s1304_s0 + $0xb8] sm:$0xff] }
  0x1c   :  { %577 = vmatpush1.bf16.msra.mxu1 %v576_v43  ;;  %v22_v43 = vld [vmem:[%s1304_s0 + $0x40] sm:$0xff]  ;;  %v39_v57 = vld [vmem:[%s1304_s0 + $0xc8] sm:$0xff]  ;;  %v41_v58 = vld [vmem:[%s1304_s0 + $0xd8] sm:$0xff] }
  0x1d   :  { %625 = vmatpush1.bf16.msra.mxu0 %v624_v44  ;;  %578 = vmatprep.subr.bf16.mxu1 %v696_v0  ;;  %v24_v44 = vld [vmem:[%s1304_s0 + $0x50] sm:$0xff]  ;;  %v38_v59 = vld [vmem:[%s1304_s0 + $0xc0] sm:$0xff]  ;;  %v47_v2 = vld [vmem:[%s1304_s0 + $0x108] sm:$0xff] }
  0x1e   :  { %626 = vmatprep.subr.bf16.mxu0 %v696_v0  ;;  %v40_v60 = vld [vmem:[%s1304_s0 + $0xd0] sm:$0xff]  ;;  %v42_v63 = vld [vmem:[%s1304_s0 + $0xe0] sm:$0xff]  ;;  %v49_v3 = vld [vmem:[%s1304_s0 + $0x118] sm:$0xff] }
  0x1f   :  { %v44_v1 = vld [vmem:[%s1304_s0 + $0xf0] sm:$0xff]  ;;  %v51_v6 = vld [vmem:[%s1304_s0 + $0x128] sm:$0xff]  ;;  %v53_v7 = vld [vmem:[%s1304_s0 + $0x138] sm:$0xff] }
  0x20   :  { %580 = vmatpush1.bf16.msra.mxu1 %v579_v49  ;;  %v31_v49 = vld [vmem:[%s1304_s0 + $0x88] sm:$0xff]  ;;  %v50_v8 = vld [vmem:[%s1304_s0 + $0x120] sm:$0xff]  ;;  %v52_v9 = vld [vmem:[%s1304_s0 + $0x130] sm:$0xff] }
  0x21   :  { %628 = vmatpush1.bf16.msra.mxu0 %v627_v50  ;;  %581 = vmatprep.subr.bf16.mxu1 %v696_v0  ;;  %v33_v50 = vld [vmem:[%s1304_s0 + $0x98] sm:$0xff]  ;;  %v54_v12 = vld [vmem:[%s1304_s0 + $0x140] sm:$0xff]  ;;  %v56_v13 = vld [vmem:[%s1304_s0 + $0x150] sm:$0xff] }
  0x22   :  { %629 = vmatprep.subr.bf16.mxu0 %v696_v0  ;;  %v59_v14 = vld [vmem:[%s1304_s0 + $0x168] sm:$0xff]  ;;  %v61_v15 = vld [vmem:[%s1304_s0 + $0x178] sm:$0xff]  ;;  %v62_v20 = vld [vmem:[%s1304_s0 + $0x180] sm:$0xff] }
  0x23   :  { %v63_v18 = vld [vmem:[%s1304_s0 + $0x188] sm:$0xff]  ;;  %v65_v19 = vld [vmem:[%s1304_s0 + $0x198] sm:$0xff]  ;;  %v64_v21 = vld [vmem:[%s1304_s0 + $0x190] sm:$0xff] }
  0x24   :  { %583 = vmatpush1.bf16.msra.mxu1 %v582_v55  ;;  %v34_v55 = vld [vmem:[%s1304_s0 + $0xa0] sm:$0xff]  ;;  %v68_v25 = vld [vmem:[%s1304_s0 + $0x1b0] sm:$0xff]  ;;  %v71_v26 = vld [vmem:[%s1304_s0 + $0x1c8] sm:$0xff] }
  0x25   :  { %631 = vmatpush1.bf16.msra.mxu0 %v630_v56  ;;  %584 = vmatprep.subr.bf16.mxu1 %v696_v0  ;;  %v36_v56 = vld [vmem:[%s1304_s0 + $0xb0] sm:$0xff]  ;;  %v66_v24 = vld [vmem:[%s1304_s0 + $0x1a0] sm:$0xff]  ;;  %v73_v27 = vld [vmem:[%s1304_s0 + $0x1d8] sm:$0xff] }
  0x26   :  { %632 = vmatprep.subr.bf16.mxu0 %v696_v0  ;;  %v75_v30 = vld [vmem:[%s1304_s0 + $0x1e8] sm:$0xff]  ;;  %v77_v31 = vld [vmem:[%s1304_s0 + $0x1f8] sm:$0xff]  ;;  %v74_v32 = vld [vmem:[%s1304_s0 + $0x1e0] sm:$0xff] }
  0x27   :  { %v76_v33 = vld [vmem:[%s1304_s0 + $0x1f0] sm:$0xff] }
  0x28   :  { %586 = vmatpush1.bf16.msra.mxu1 %v585_v61  ;;  %v43_v61 = vld [vmem:[%s1304_s0 + $0xe8] sm:$0xff] }
  0x29   :  { %634 = vmatpush1.bf16.msra.mxu0 %v633_v62  ;;  %587 = vmatprep.subr.bf16.mxu1 %v696_v0  ;;  %v45_v62 = vld [vmem:[%s1304_s0 + $0xf8] sm:$0xff] }
  0x2a   :  { %635 = vmatprep.subr.bf16.mxu0 %v696_v0 }
  0x2c   :  { %589 = vmatpush1.bf16.msra.mxu1 %v588_v4  ;;  %v46_v4 = vld [vmem:[%s1304_s0 + $0x100] sm:$0xff] }
  0x2d   :  { %637 = vmatpush1.bf16.msra.mxu0 %v636_v5  ;;  %590 = vmatprep.subr.bf16.mxu1 %v696_v0  ;;  %v48_v5 = vld [vmem:[%s1304_s0 + $0x110] sm:$0xff] }
  0x2e   :  { %638 = vmatprep.subr.bf16.mxu0 %v696_v0 }
  0x30   :  { %592 = vmatpush1.bf16.msra.mxu1 %v591_v10  ;;  %v55_v10 = vld [vmem:[%s1304_s0 + $0x148] sm:$0xff] }
  0x31   :  { %640 = vmatpush1.bf16.msra.mxu0 %v639_v11  ;;  %593 = vmatprep.subr.bf16.mxu1 %v696_v0  ;;  %v57_v11 = vld [vmem:[%s1304_s0 + $0x158] sm:$0xff] }
  0x32   :  { %641 = vmatprep.subr.bf16.mxu0 %v696_v0 }
  0x34   :  { %595 = vmatpush1.bf16.msra.mxu1 %v594_v16  ;;  %v58_v16 = vld [vmem:[%s1304_s0 + $0x160] sm:$0xff] }
  0x35   :  { %643 = vmatpush1.bf16.msra.mxu0 %v642_v17  ;;  %596 = vmatprep.subr.bf16.mxu1 %v696_v0  ;;  %v60_v17 = vld [vmem:[%s1304_s0 + $0x170] sm:$0xff] }
  0x36   :  { %644 = vmatprep.subr.bf16.mxu0 %v696_v0 }
  0x38   :  { %598 = vmatpush1.bf16.msra.mxu1 %v597_v22  ;;  %v67_v22 = vld [vmem:[%s1304_s0 + $0x1a8] sm:$0xff] }
  0x39   :  { %646 = vmatpush1.bf16.msra.mxu0 %v645_v23  ;;  %599 = vmatprep.subr.bf16.mxu1 %v696_v0  ;;  %v69_v23 = vld [vmem:[%s1304_s0 + $0x1b8] sm:$0xff] }
  0x3a   :  { %647 = vmatprep.subr.bf16.mxu0 %v696_v0 }
  0x3c   :  { %601 = vmatpush1.bf16.msra.mxu1 %v600_v28  ;;  %v70_v28 = vld [vmem:[%s1304_s0 + $0x1c0] sm:$0xff] }
  0x3d   :  { %649 = vmatpush1.bf16.msra.mxu0 %v648_v29  ;;  %602 = vmatprep.subr.bf16.mxu1 %v696_v0  ;;  %v72_v29 = vld [vmem:[%s1304_s0 + $0x1d0] sm:$0xff] }
  0x3e   :  { %650 = vmatprep.subr.bf16.mxu0 %v696_v0  ;;  %v18_v0 = vld [vmem:[%s1304_s0 + $0x20] sm:$0xff] }
  0x40   :  { %604 = vmatpush1.bf16.msra.mxu1 %v603_v34  ;;  %v79_v34 = vld [vmem:[%s1304_s0 + $0x208] sm:$0xff] }
  0x41   :  { %652 = vmatpush1.bf16.msra.mxu0 %v651_v35  ;;  %v81_v35 = vld [vmem:[%s1304_s0 + $0x218] sm:$0xff] }
  0x43   :  { %234 = vmatmul.mubr.f32.vlgmr.msra.gmra.mrb[0].mxu1 %v14_v36  ;;  %v78_v36 = vld [vmem:[%s1304_s0 + $0x200] sm:$0xff] }
  0x44   :  { %404 = vmatmul.mubr.f32.vlgmr.msra.gmra.mrb[0].mxu0 %v16_v37  ;;  %238 = vmatprep.mubr.f32.mxu1 %v19_v38  ;;  %v80_v37 = vld [vmem:[%s1304_s0 + $0x210] sm:$0xff]  ;;  %v83_v38 = vld [vmem:[%s1304_s0 + $0x228] sm:$0xff] }
  0x45   :  { %408 = vmatprep.mubr.f32.mxu0 %v21_v39  ;;  %v85_v39 = vld [vmem:[%s1304_s0 + $0x238] sm:$0xff] }
  0x47   :  { %239 = vmatmul.mubr.f32.gmra.mrb[2].mxu1 %v18_v0  ;;  %v82_v0 = vld [vmem:[%s1304_s0 + $0x220] sm:$0xff] }
  0x48   :  { %409 = vmatmul.mubr.f32.gmra.mrb[2].mxu0 %v20_v40  ;;  %243 = vmatprep.mubr.f32.mxu1 %v23_v41  ;;  %v84_v40 = vld [vmem:[%s1304_s0 + $0x230] sm:$0xff]  ;;  %v87_v41 = vld [vmem:[%s1304_s0 + $0x248] sm:$0xff] }
  0x49   :  { %413 = vmatprep.mubr.f32.mxu0 %v25_v42  ;;  %v89_v42 = vld [vmem:[%s1304_s0 + $0x258] sm:$0xff] }
  0x4b   :  { %244 = vmatmul.mubr.f32.gmra.mrb[4].mxu1 %v22_v43  ;;  %v86_v43 = vld [vmem:[%s1304_s0 + $0x240] sm:$0xff] }
  0x4c   :  { %414 = vmatmul.mubr.f32.gmra.mrb[4].mxu0 %v24_v44  ;;  %248 = vmatprep.mubr.f32.mxu1 %v27_v45  ;;  %v88_v44 = vld [vmem:[%s1304_s0 + $0x250] sm:$0xff]  ;;  %v91_v45 = vld [vmem:[%s1304_s0 + $0x268] sm:$0xff] }
  0x4d   :  { %418 = vmatprep.mubr.f32.mxu0 %v29_v46  ;;  %v93_v46 = vld [vmem:[%s1304_s0 + $0x278] sm:$0xff] }
  0x4f   :  { %249 = vmatmul.mubr.f32.gmra.mrb[6].mxu1 %v26_v47  ;;  %v90_v47 = vld [vmem:[%s1304_s0 + $0x260] sm:$0xff] }
  0x50   :  { %419 = vmatmul.mubr.f32.gmra.mrb[6].mxu0 %v28_v48  ;;  %253 = vmatprep.mubr.f32.mxu1 %v31_v49  ;;  %v92_v48 = vld [vmem:[%s1304_s0 + $0x270] sm:$0xff]  ;;  %v95_v49 = vld [vmem:[%s1304_s0 + $0x288] sm:$0xff] }
  0x51   :  { %423 = vmatprep.mubr.f32.mxu0 %v33_v50  ;;  %v97_v50 = vld [vmem:[%s1304_s0 + $0x298] sm:$0xff] }
  0x53   :  { %254 = vmatmul.mubr.f32.gmra.mrb[8].mxu1 %v30_v51  ;;  %v94_v51 = vld [vmem:[%s1304_s0 + $0x280] sm:$0xff] }
  0x54   :  { %424 = vmatmul.mubr.f32.gmra.mrb[8].mxu0 %v32_v52  ;;  %258 = vmatprep.mubr.f32.mxu1 %v35_v53  ;;  %v96_v52 = vld [vmem:[%s1304_s0 + $0x290] sm:$0xff]  ;;  %v1196_v53 = vld [vmem:[%s1305_s2] ss:$0 sm:$0xff] }
  0x55   :  { %428 = vmatprep.mubr.f32.mxu0 %v37_v54 }
  0x57   :  { %259 = vmatmul.mubr.f32.gmra.mrb[10].mxu1 %v34_v55 }
  0x58   :  { %429 = vmatmul.mubr.f32.gmra.mrb[10].mxu0 %v36_v56  ;;  %263 = vmatprep.mubr.f32.mxu1 %v39_v57 }
  0x59   :  { %433 = vmatprep.mubr.f32.mxu0 %v41_v58 }
  0x5b   :  { %264 = vmatmul.mubr.f32.gmra.mrb[12].mxu1 %v38_v59 }
  0x5c   :  { %434 = vmatmul.mubr.f32.gmra.mrb[12].mxu0 %v40_v60  ;;  %268 = vmatprep.mubr.f32.mxu1 %v43_v61 }
  0x5d   :  { %438 = vmatprep.mubr.f32.mxu0 %v45_v62 }
  0x5f   :  { %269 = vmatmul.mubr.f32.gmra.mrb[14].mxu1 %v42_v63 }
  0x60   :  { %439 = vmatmul.mubr.f32.gmra.mrb[14].mxu0 %v44_v1  ;;  %273 = vmatprep.mubr.f32.mxu1 %v47_v2 }
  0x61   :  { %443 = vmatprep.mubr.f32.mxu0 %v49_v3 }
  0x63   :  { %274 = vmatmul.mubr.f32.gmra.mrb[16].mxu1 %v46_v4 }
  0x64   :  { %444 = vmatmul.mubr.f32.gmra.mrb[16].mxu0 %v48_v5  ;;  %278 = vmatprep.mubr.f32.mxu1 %v51_v6 }
  0x65   :  { %448 = vmatprep.mubr.f32.mxu0 %v53_v7 }
  0x67   :  { %279 = vmatmul.mubr.f32.gmra.mrb[18].mxu1 %v50_v8 }
  0x68   :  { %449 = vmatmul.mubr.f32.gmra.mrb[18].mxu0 %v52_v9  ;;  %283 = vmatprep.mubr.f32.mxu1 %v55_v10 }
  0x69   :  { %453 = vmatprep.mubr.f32.mxu0 %v57_v11 }
  0x6b   :  { %284 = vmatmul.mubr.f32.gmra.mrb[20].mxu1 %v54_v12 }
  0x6c   :  { %454 = vmatmul.mubr.f32.gmra.mrb[20].mxu0 %v56_v13  ;;  %288 = vmatprep.mubr.f32.mxu1 %v59_v14 }
  0x6d   :  { %458 = vmatprep.mubr.f32.mxu0 %v61_v15 }
  0x6f   :  { %289 = vmatmul.mubr.f32.gmra.mrb[22].mxu1 %v58_v16 }
  0x70   :  { %459 = vmatmul.mubr.f32.gmra.mrb[22].mxu0 %v60_v17  ;;  %293 = vmatprep.mubr.f32.mxu1 %v63_v18 }
  0x71   :  { %463 = vmatprep.mubr.f32.mxu0 %v65_v19 }
  0x73   :  { %294 = vmatmul.mubr.f32.gmra.mrb[24].mxu1 %v62_v20 }
  0x74   :  { %464 = vmatmul.mubr.f32.gmra.mrb[24].mxu0 %v64_v21  ;;  %298 = vmatprep.mubr.f32.mxu1 %v67_v22 }
  0x75   :  { %468 = vmatprep.mubr.f32.mxu0 %v69_v23 }
  0x77   :  { %299 = vmatmul.mubr.f32.gmra.mrb[26].mxu1 %v66_v24 }
  0x78   :  { %469 = vmatmul.mubr.f32.gmra.mrb[26].mxu0 %v68_v25  ;;  %303 = vmatprep.mubr.f32.mxu1 %v71_v26 }
  0x79   :  { %473 = vmatprep.mubr.f32.mxu0 %v73_v27 }
  0x7b   :  { %304 = vmatmul.mubr.f32.gmra.mrb[28].mxu1 %v70_v28 }
  0x7c   :  { %474 = vmatmul.mubr.f32.gmra.mrb[28].mxu0 %v72_v29  ;;  %308 = vmatprep.mubr.f32.mxu1 %v75_v30 }
  0x7d   :  { %478 = vmatprep.mubr.f32.mxu0 %v77_v31 }
  0x7f   :  { %309 = vmatmul.mubr.f32.gmra.mrb[30].mxu1 %v74_v32 }
  0x80   :  { %479 = vmatmul.mubr.f32.gmra.mrb[30].mxu0 %v76_v33  ;;  %313 = vmatprep.mubr.f32.mxu1 %v79_v34 }
  0x81   :  { %483 = vmatprep.mubr.f32.mxu0 %v81_v35 }
  0x83   :  { %314 = vmatmul.mubr.f32.gmra.mrb[32].mxu1 %v78_v36 }
  0x84   :  { %484 = vmatmul.mubr.f32.gmra.mrb[32].mxu0 %v80_v37  ;;  %318 = vmatprep.mubr.f32.mxu1 %v83_v38 }
  0x85   :  { %488 = vmatprep.mubr.f32.mxu0 %v85_v39 }
  0x87   :  { %319 = vmatmul.mubr.f32.gmra.mrb[34].mxu1 %v82_v0 }
  0x88   :  { %489 = vmatmul.mubr.f32.gmra.mrb[34].mxu0 %v84_v40  ;;  %323 = vmatprep.mubr.f32.mxu1 %v87_v41 }
  0x89   :  { %493 = vmatprep.mubr.f32.mxu0 %v89_v42 }
  0x8b   :  { %324 = vmatmul.mubr.f32.gmra.mrb[36].mxu1 %v86_v43 }
  0x8c   :  { %494 = vmatmul.mubr.f32.gmra.mrb[36].mxu0 %v88_v44  ;;  %328 = vmatprep.mubr.f32.mxu1 %v91_v45 }
  0x8d   :  { %498 = vmatprep.mubr.f32.mxu0 %v93_v46 }
  0x8f   :  { %329 = vmatmul.mubr.f32.gmra.mrb[38].mxu1 %v90_v47 }
  0x90   :  { %499 = vmatmul.mubr.f32.gmra.mrb[38].mxu0 %v92_v48  ;;  %333 = vmatprep.mubr.f32.mxu1 %v95_v49 }
  0x91   :  { %503 = vmatprep.mubr.f32.mxu0 %v97_v50 }
  0x93   :  { %334 = vmatmul.mubr.f32.gmra.mrb[40].mxu1 %v94_v51 }
  0x94   :  { %504 = vmatmul.mubr.f32.gmra.mrb[40].mxu0 %v96_v52 }
 0x116   :  { %v235_v54 = vpop.f32.mrb[0].mxu1 }
 0x117   :  { %v236_v55 = vadd.f32 %v1196_v53, %v235_v54  ;;  %v237_v56 = vpop.f32.mrb[1].mxu1  ;;  %v405_v57 = vpop.f32.mrb[0].mxu0 }
 0x118   :  { %v407_v58 = vpop.f32.mrb[1].mxu0 }
 0x119   :  { %v406_v59 = vadd.f32 %v405_v57, %v236_v55 }
 0x11a   :  { %v240_v60 = vpop.f32.mrb[2].mxu1 }
 0x11b   :  { %v509_v61 = vmax.f32 %v406_v59, 0.0  ;;  %v241_v62 = vadd.f32 %v1196_v53, %v240_v60  ;;  %v242_v63 = vpop.f32.mrb[3].mxu1  ;;  %v410_v1 = vpop.f32.mrb[2].mxu0 }
 0x11c   :  { %v412_v2 = vpop.f32.mrb[3].mxu0 }
 0x11d   :  { %531 = vst.msk [vmem:[%s1306_s3] sm:$0xff] %vm530_vm0, %v509_v61  ;;  %v411_v3 = vadd.f32 %v410_v1, %v241_v62 }
 0x11e   :  { %v245_v4 = vpop.f32.mrb[4].mxu1 }
 0x11f   :  { %v510_v5 = vmax.f32 %v411_v3, 0.0  ;;  %v246_v6 = vadd.f32 %v1196_v53, %v245_v4  ;;  %v247_v7 = vpop.f32.mrb[5].mxu1  ;;  %v415_v8 = vpop.f32.mrb[4].mxu0 }
 0x120   :  { %v417_v9 = vpop.f32.mrb[5].mxu0 }
 0x121   :  { %532 = vst.msk [vmem:[%s1306_s3 + $0x8] sm:$0xff] %vm530_vm0, %v510_v5  ;;  %v416_v10 = vadd.f32 %v415_v8, %v246_v6 }
 0x122   :  { %v250_v11 = vpop.f32.mrb[6].mxu1 }
 0x123   :  { %v511_v12 = vmax.f32 %v416_v10, 0.0  ;;  %v251_v13 = vadd.f32 %v1196_v53, %v250_v11  ;;  %v252_v14 = vpop.f32.mrb[7].mxu1  ;;  %v420_v15 = vpop.f32.mrb[6].mxu0 }
 0x124   :  { %v422_v16 = vpop.f32.mrb[7].mxu0 }
 0x125   :  { %533 = vst.msk [vmem:[%s1306_s3 + $0x10] sm:$0xff] %vm530_vm0, %v511_v12  ;;  %v421_v17 = vadd.f32 %v420_v15, %v251_v13 }
 0x126   :  { %v255_v18 = vpop.f32.mrb[8].mxu1 }
 0x127   :  { %v512_v19 = vmax.f32 %v421_v17, 0.0  ;;  %v256_v20 = vadd.f32 %v1196_v53, %v255_v18  ;;  %v257_v21 = vpop.f32.mrb[9].mxu1  ;;  %v425_v22 = vpop.f32.mrb[8].mxu0 }
 0x128   :  { %v427_v23 = vpop.f32.mrb[9].mxu0 }
 0x129   :  { %534 = vst.msk [vmem:[%s1306_s3 + $0x18] sm:$0xff] %vm530_vm0, %v512_v19  ;;  %v426_v24 = vadd.f32 %v425_v22, %v256_v20 }
 0x12a   :  { %v260_v25 = vpop.f32.mrb[10].mxu1 }
 0x12b   :  { %v513_v26 = vmax.f32 %v426_v24, 0.0  ;;  %v261_v27 = vadd.f32 %v1196_v53, %v260_v25  ;;  %v262_v28 = vpop.f32.mrb[11].mxu1  ;;  %v430_v29 = vpop.f32.mrb[10].mxu0 }
 0x12c   :  { %v432_v30 = vpop.f32.mrb[11].mxu0 }
 0x12d   :  { %535 = vst.msk [vmem:[%s1306_s3 + $0x20] sm:$0xff] %vm530_vm0, %v513_v26  ;;  %v431_v31 = vadd.f32 %v430_v29, %v261_v27 }
 0x12e   :  { %v265_v32 = vpop.f32.mrb[12].mxu1 }
 0x12f   :  { %v514_v33 = vmax.f32 %v431_v31, 0.0  ;;  %v266_v34 = vadd.f32 %v1196_v53, %v265_v32  ;;  %v267_v35 = vpop.f32.mrb[13].mxu1  ;;  %v435_v36 = vpop.f32.mrb[12].mxu0 }
 0x130   :  { %v437_v37 = vpop.f32.mrb[13].mxu0 }
 0x131   :  { %536 = vst.msk [vmem:[%s1306_s3 + $0x28] sm:$0xff] %vm530_vm0, %v514_v33  ;;  %v436_v38 = vadd.f32 %v435_v36, %v266_v34 }
 0x132   :  { %v270_v39 = vpop.f32.mrb[14].mxu1 }
 0x133   :  { %v515_v0 = vmax.f32 %v436_v38, 0.0  ;;  %v271_v40 = vadd.f32 %v1196_v53, %v270_v39  ;;  %v272_v41 = vpop.f32.mrb[15].mxu1  ;;  %v440_v42 = vpop.f32.mrb[14].mxu0 }
 0x134   :  { %v442_v43 = vpop.f32.mrb[15].mxu0 }
 0x135   :  { %537 = vst.msk [vmem:[%s1306_s3 + $0x30] sm:$0xff] %vm530_vm0, %v515_v0  ;;  %v441_v44 = vadd.f32 %v440_v42, %v271_v40 }
 0x136   :  { %v275_v45 = vpop.f32.mrb[16].mxu1 }
 0x137   :  { %v516_v46 = vmax.f32 %v441_v44, 0.0  ;;  %v276_v47 = vadd.f32 %v1196_v53, %v275_v45  ;;  %v277_v48 = vpop.f32.mrb[17].mxu1  ;;  %v445_v49 = vpop.f32.mrb[16].mxu0 }
 0x138   :  { %v447_v50 = vpop.f32.mrb[17].mxu0 }
 0x139   :  { %538 = vst.msk [vmem:[%s1306_s3 + $0x38] sm:$0xff] %vm530_vm0, %v516_v46  ;;  %v446_v51 = vadd.f32 %v445_v49, %v276_v47 }
 0x13a   :  { %v280_v52 = vpop.f32.mrb[18].mxu1 }
 0x13b   :  { %v517_v54 = vmax.f32 %v446_v51, 0.0  ;;  %v281_v55 = vadd.f32 %v1196_v53, %v280_v52  ;;  %v282_v56 = vpop.f32.mrb[19].mxu1  ;;  %v450_v57 = vpop.f32.mrb[18].mxu0 }
 0x13c   :  { %v452_v58 = vpop.f32.mrb[19].mxu0 }
 0x13d   :  { %539 = vst.msk [vmem:[%s1306_s3 + $0x40] sm:$0xff] %vm530_vm0, %v517_v54  ;;  %v451_v59 = vadd.f32 %v450_v57, %v281_v55 }
 0x13e   :  { %v285_v60 = vpop.f32.mrb[20].mxu1 }
 0x13f   :  { %v518_v61 = vmax.f32 %v451_v59, 0.0  ;;  %v286_v62 = vadd.f32 %v1196_v53, %v285_v60  ;;  %v287_v63 = vpop.f32.mrb[21].mxu1  ;;  %v455_v1 = vpop.f32.mrb[20].mxu0 }
 0x140   :  { %v457_v2 = vpop.f32.mrb[21].mxu0 }
 0x141   :  { %540 = vst.msk [vmem:[%s1306_s3 + $0x48] sm:$0xff] %vm530_vm0, %v518_v61  ;;  %v456_v3 = vadd.f32 %v455_v1, %v286_v62 }
 0x142   :  { %v290_v4 = vpop.f32.mrb[22].mxu1 }
 0x143   :  { %v519_v5 = vmax.f32 %v456_v3, 0.0  ;;  %v291_v6 = vadd.f32 %v1196_v53, %v290_v4  ;;  %v292_v7 = vpop.f32.mrb[23].mxu1  ;;  %v460_v8 = vpop.f32.mrb[22].mxu0 }
 0x144   :  { %v462_v9 = vpop.f32.mrb[23].mxu0 }
 0x145   :  { %541 = vst.msk [vmem:[%s1306_s3 + $0x50] sm:$0xff] %vm530_vm0, %v519_v5  ;;  %v461_v10 = vadd.f32 %v460_v8, %v291_v6 }
 0x146   :  { %v295_v11 = vpop.f32.mrb[24].mxu1 }
 0x147   :  { %v520_v12 = vmax.f32 %v461_v10, 0.0  ;;  %v296_v13 = vadd.f32 %v1196_v53, %v295_v11  ;;  %v297_v14 = vpop.f32.mrb[25].mxu1  ;;  %v465_v15 = vpop.f32.mrb[24].mxu0 }
 0x148   :  { %v467_v16 = vpop.f32.mrb[25].mxu0 }
 0x149   :  { %542 = vst.msk [vmem:[%s1306_s3 + $0x58] sm:$0xff] %vm530_vm0, %v520_v12  ;;  %v466_v17 = vadd.f32 %v465_v15, %v296_v13 }
 0x14a   :  { %v300_v18 = vpop.f32.mrb[26].mxu1 }
 0x14b   :  { %v521_v19 = vmax.f32 %v466_v17, 0.0  ;;  %v301_v20 = vadd.f32 %v1196_v53, %v300_v18  ;;  %v302_v21 = vpop.f32.mrb[27].mxu1  ;;  %v470_v22 = vpop.f32.mrb[26].mxu0 }
 0x14c   :  { %v472_v23 = vpop.f32.mrb[27].mxu0 }
 0x14d   :  { %543 = vst.msk [vmem:[%s1306_s3 + $0x60] sm:$0xff] %vm530_vm0, %v521_v19  ;;  %v471_v24 = vadd.f32 %v470_v22, %v301_v20 }
 0x14e   :  { %v305_v25 = vpop.f32.mrb[28].mxu1 }
 0x14f   :  { %v522_v26 = vmax.f32 %v471_v24, 0.0  ;;  %v306_v27 = vadd.f32 %v1196_v53, %v305_v25  ;;  %v307_v28 = vpop.f32.mrb[29].mxu1  ;;  %v475_v29 = vpop.f32.mrb[28].mxu0 }
 0x150   :  { %v477_v30 = vpop.f32.mrb[29].mxu0 }
 0x151   :  { %544 = vst.msk [vmem:[%s1306_s3 + $0x68] sm:$0xff] %vm530_vm0, %v522_v26  ;;  %v476_v31 = vadd.f32 %v475_v29, %v306_v27 }
 0x152   :  { %v310_v32 = vpop.f32.mrb[30].mxu1 }
 0x153   :  { %v523_v33 = vmax.f32 %v476_v31, 0.0  ;;  %v311_v34 = vadd.f32 %v1196_v53, %v310_v32  ;;  %v312_v35 = vpop.f32.mrb[31].mxu1  ;;  %v480_v36 = vpop.f32.mrb[30].mxu0 }
 0x154   :  { %v482_v37 = vpop.f32.mrb[31].mxu0 }
 0x155   :  { %545 = vst.msk [vmem:[%s1306_s3 + $0x70] sm:$0xff] %vm530_vm0, %v523_v33  ;;  %v481_v38 = vadd.f32 %v480_v36, %v311_v34 }
 0x156   :  { %v315_v39 = vpop.f32.mrb[32].mxu1 }
 0x157   :  { %v524_v0 = vmax.f32 %v481_v38, 0.0  ;;  %v316_v40 = vadd.f32 %v1196_v53, %v315_v39  ;;  %v317_v41 = vpop.f32.mrb[33].mxu1  ;;  %v485_v42 = vpop.f32.mrb[32].mxu0 }
 0x158   :  { %v487_v43 = vpop.f32.mrb[33].mxu0 }
 0x159   :  { %546 = vst.msk [vmem:[%s1306_s3 + $0x78] sm:$0xff] %vm530_vm0, %v524_v0  ;;  %v486_v44 = vadd.f32 %v485_v42, %v316_v40 }
 0x15a   :  { %v320_v45 = vpop.f32.mrb[34].mxu1 }
 0x15b   :  { %v525_v46 = vmax.f32 %v486_v44, 0.0  ;;  %v321_v47 = vadd.f32 %v1196_v53, %v320_v45  ;;  %v322_v48 = vpop.f32.mrb[35].mxu1  ;;  %v490_v49 = vpop.f32.mrb[34].mxu0 }
 0x15c   :  { %v492_v50 = vpop.f32.mrb[35].mxu0 }
 0x15d   :  { %547 = vst.msk [vmem:[%s1306_s3 + $0x80] sm:$0xff] %vm530_vm0, %v525_v46  ;;  %v491_v51 = vadd.f32 %v490_v49, %v321_v47 }
 0x15e   :  { %v325_v52 = vpop.f32.mrb[36].mxu1 }
 0x15f   :  { %v526_v54 = vmax.f32 %v491_v51, 0.0  ;;  %v326_v55 = vadd.f32 %v1196_v53, %v325_v52  ;;  %v327_v56 = vpop.f32.mrb[37].mxu1  ;;  %v495_v57 = vpop.f32.mrb[36].mxu0 }
 0x160   :  { %v497_v58 = vpop.f32.mrb[37].mxu0 }
 0x161   :  { %548 = vst.msk [vmem:[%s1306_s3 + $0x88] sm:$0xff] %vm530_vm0, %v526_v54  ;;  %v496_v59 = vadd.f32 %v495_v57, %v326_v55 }
 0x162   :  { %v330_v60 = vpop.f32.mrb[38].mxu1 }
 0x163   :  { %v527_v61 = vmax.f32 %v496_v59, 0.0  ;;  %v331_v62 = vadd.f32 %v1196_v53, %v330_v60  ;;  %v332_v63 = vpop.f32.mrb[39].mxu1  ;;  %v500_v1 = vpop.f32.mrb[38].mxu0 }
 0x164   :  { %v502_v2 = vpop.f32.mrb[39].mxu0 }
 0x165   :  { %549 = vst.msk [vmem:[%s1306_s3 + $0x90] sm:$0xff] %vm530_vm0, %v527_v61  ;;  %v501_v3 = vadd.f32 %v500_v1, %v331_v62 }
 0x166   :  { %v335_v4 = vpop.f32.mrb[40].mxu1 }
 0x167   :  { %v528_v5 = vmax.f32 %v501_v3, 0.0  ;;  %v336_v6 = vadd.f32 %v1196_v53, %v335_v4  ;;  %v337_v7 = vpop.f32.mrb[41].mxu1  ;;  %v505_v8 = vpop.f32.mrb[40].mxu0 }
 0x168   :  { %v507_v9 = vpop.f32.mrb[41].mxu0 }
 0x169   :  { %550 = vst.msk [vmem:[%s1306_s3 + $0x98] sm:$0xff] %vm530_vm0, %v528_v5  ;;  %v506_v10 = vadd.f32 %v505_v8, %v336_v6 }
 0x16b   :  { %v529_v11 = vmax.f32 %v506_v10, 0.0 }
 0x16d   :  { %551 = vst.msk [vmem:[%s1306_s3 + $0xa0] sm:$0xff] %vm530_vm0, %v529_v11 }

// kernel: dqn_forward.6
= control target key start
LH: loop header
LB: loop body
LE: loop exit
PB: predicated region body
PF: predicated region fallthrough
CT: control target
= control target key end

     0   :  { %vm938_vm0 = vmmov 0   ;;  %vm158_vm1 = vcmask 523264   ;;  %s1488_s1 = inlined_call_operand.vmem [shape: f32[576,64], index: 1, kind: input, shape index: {}]   ;;  %s1489_s0 = inlined_call_operand.vmem [shape: f32[104,576], index: 0, kind: input, shape index: {}]   ;;  %s1490_s2 = inlined_call_operand.vmem [shape: f32[1,64], index: 2, kind: input, shape index: {}]   ;;  %s1491_s3 = inlined_call_operand.vmem [shape: f32[104,64], index: 3, kind: output, shape index: {}]  }
   0x1   :  { %v95_v0 = vld [vmem:[%s1488_s1 + $0x80] sm:$0xff]  ;;  %v96_v1 = vld [vmem:[%s1488_s1 + $0x88] sm:$0xff]  ;;  %v97_v11 = vld [vmem:[%s1488_s1 + $0x90] sm:$0xff] }
   0x2   :  { %v127_v2 = vld [vmem:[%s1488_s1 + $0x180] sm:$0xff]  ;;  %v850_v3 = vpack.c.bf16 %v96_v1, %v95_v0  ;;  %v128_v4 = vld [vmem:[%s1488_s1 + $0x188] sm:$0xff]  ;;  %v98_v13 = vld [vmem:[%s1488_s1 + $0x98] sm:$0xff] }
   0x3   :  { %v79_v5 = vld [vmem:[%s1488_s1] sm:$0xff]  ;;  %v80_v6 = vld [vmem:[%s1488_s1 + $0x8] sm:$0xff]  ;;  %v882_v7 = vpack.c.bf16 %v128_v4, %v127_v2  ;;  %v129_v14 = vld [vmem:[%s1488_s1 + $0x190] sm:$0xff]  ;;  %v854_v16 = vpack.c.bf16 %v98_v13, %v97_v11 }
   0x4   :  { %v852_v8 = vpack.c.bf16 %v80_v6, %v79_v5  ;;  %v111_v9 = vld [vmem:[%s1488_s1 + $0x100] sm:$0xff]  ;;  %v112_v10 = vld [vmem:[%s1488_s1 + $0x108] sm:$0xff]  ;;  %851 = vmatprep.subr.bf16.mxu0 %v850_v3  ;;  %v130_v15 = vld [vmem:[%s1488_s1 + $0x198] sm:$0xff] }
   0x5   :  { %v884_v12 = vpack.c.bf16 %v112_v10, %v111_v9  ;;  %883 = vmatprep.subr.bf16.mxu1 %v882_v7  ;;  %v886_v17 = vpack.c.bf16 %v130_v15, %v129_v14  ;;  %v81_v18 = vld [vmem:[%s1488_s1 + $0x10] sm:$0xff]  ;;  %v82_v19 = vld [vmem:[%s1488_s1 + $0x18] sm:$0xff]  ;;  %v99_v23 = vld [vmem:[%s1488_s1 + $0xa0] sm:$0xff] }
   0x6   :  { %853 = vmatpush3.bf16.msra.mxu0 %v852_v8  ;;  %v113_v20 = vld [vmem:[%s1488_s1 + $0x110] sm:$0xff]  ;;  %v856_v21 = vpack.c.bf16 %v82_v19, %v81_v18  ;;  %v114_v22 = vld [vmem:[%s1488_s1 + $0x118] sm:$0xff]  ;;  %v100_v24 = vld [vmem:[%s1488_s1 + $0xa8] sm:$0xff] }
   0x7   :  { %885 = vmatpush3.bf16.msra.mxu1 %v884_v12  ;;  %855 = vmatprep.subr.bf16.mxu0 %v854_v16  ;;  %v888_v25 = vpack.c.bf16 %v114_v22, %v113_v20  ;;  %v858_v26 = vpack.c.bf16 %v100_v24, %v99_v23  ;;  %v131_v27 = vld [vmem:[%s1488_s1 + $0x1a0] sm:$0xff]  ;;  %v132_v28 = vld [vmem:[%s1488_s1 + $0x1a8] sm:$0xff]  ;;  %v101_v35 = vld [vmem:[%s1488_s1 + $0xb0] sm:$0xff] }
   0x8   :  { %887 = vmatprep.subr.bf16.mxu1 %v886_v17  ;;  %v83_v29 = vld [vmem:[%s1488_s1 + $0x20] sm:$0xff]  ;;  %v890_v30 = vpack.c.bf16 %v132_v28, %v131_v27  ;;  %v84_v31 = vld [vmem:[%s1488_s1 + $0x28] sm:$0xff]  ;;  %v102_v36 = vld [vmem:[%s1488_s1 + $0xb8] sm:$0xff] }
   0x9   :  { %v115_v32 = vld [vmem:[%s1488_s1 + $0x120] sm:$0xff]  ;;  %v116_v33 = vld [vmem:[%s1488_s1 + $0x128] sm:$0xff]  ;;  %v860_v34 = vpack.c.bf16 %v84_v31, %v83_v29  ;;  %v133_v37 = vld [vmem:[%s1488_s1 + $0x1b0] sm:$0xff]  ;;  %v862_v39 = vpack.c.bf16 %v102_v36, %v101_v35 }
   0xa   :  { %857 = vmatpush3.bf16.msra.mxu0 %v856_v21  ;;  %v892_v38 = vpack.c.bf16 %v116_v33, %v115_v32  ;;  %v134_v40 = vld [vmem:[%s1488_s1 + $0x1b8] sm:$0xff]  ;;  %v85_v41 = vld [vmem:[%s1488_s1 + $0x30] sm:$0xff]  ;;  %v103_v46 = vld [vmem:[%s1488_s1 + $0xc0] sm:$0xff] }
   0xb   :  { %889 = vmatpush3.bf16.msra.mxu1 %v888_v25  ;;  %859 = vmatprep.subr.bf16.mxu0 %v858_v26  ;;  %v86_v42 = vld [vmem:[%s1488_s1 + $0x38] sm:$0xff]  ;;  %v894_v43 = vpack.c.bf16 %v134_v40, %v133_v37  ;;  %v117_v44 = vld [vmem:[%s1488_s1 + $0x130] sm:$0xff]  ;;  %v104_v47 = vld [vmem:[%s1488_s1 + $0xc8] sm:$0xff] }
   0xc   :  { %891 = vmatprep.subr.bf16.mxu1 %v890_v30  ;;  %v118_v45 = vld [vmem:[%s1488_s1 + $0x138] sm:$0xff]  ;;  %v135_v48 = vld [vmem:[%s1488_s1 + $0x1c0] sm:$0xff]  ;;  %v136_v49 = vld [vmem:[%s1488_s1 + $0x1c8] sm:$0xff]  ;;  %v864_v50 = vpack.c.bf16 %v86_v42, %v85_v41  ;;  %v866_v52 = vpack.c.bf16 %v104_v47, %v103_v46 }
   0xd   :  { %v896_v51 = vpack.c.bf16 %v118_v45, %v117_v44  ;;  %v87_v53 = vld [vmem:[%s1488_s1 + $0x40] sm:$0xff]  ;;  %v88_v54 = vld [vmem:[%s1488_s1 + $0x48] sm:$0xff]  ;;  %v898_v56 = vpack.c.bf16 %v136_v49, %v135_v48  ;;  %v105_v58 = vld [vmem:[%s1488_s1 + $0xd0] sm:$0xff] }
   0xe   :  { %861 = vmatpush3.bf16.msra.mxu0 %v860_v34  ;;  %v119_v55 = vld [vmem:[%s1488_s1 + $0x140] sm:$0xff]  ;;  %v120_v57 = vld [vmem:[%s1488_s1 + $0x148] sm:$0xff]  ;;  %v106_v59 = vld [vmem:[%s1488_s1 + $0xd8] sm:$0xff]  ;;  %v868_v62 = vpack.c.bf16 %v88_v54, %v87_v53 }
   0xf   :  { %893 = vmatpush3.bf16.msra.mxu1 %v892_v38  ;;  %863 = vmatprep.subr.bf16.mxu0 %v862_v39  ;;  %v137_v60 = vld [vmem:[%s1488_s1 + $0x1d0] sm:$0xff]  ;;  %v138_v61 = vld [vmem:[%s1488_s1 + $0x1d8] sm:$0xff]  ;;  %v900_v63 = vpack.c.bf16 %v120_v57, %v119_v55  ;;  %v870_v0 = vpack.c.bf16 %v106_v59, %v105_v58  ;;  %v107_v6 = vld [vmem:[%s1488_s1 + $0xe0] sm:$0xff]  ;;  %v937_v39 = vmov 0.0|0.0  }
  0x10   :  { %895 = vmatprep.subr.bf16.mxu1 %v894_v43  ;;  %v89_v1 = vld [vmem:[%s1488_s1 + $0x50] sm:$0xff]  ;;  %v90_v2 = vld [vmem:[%s1488_s1 + $0x58] sm:$0xff]  ;;  %v902_v4 = vpack.c.bf16 %v138_v61, %v137_v60  ;;  %v108_v7 = vld [vmem:[%s1488_s1 + $0xe8] sm:$0xff] }
  0x11   :  { %v121_v3 = vld [vmem:[%s1488_s1 + $0x150] sm:$0xff]  ;;  %v122_v5 = vld [vmem:[%s1488_s1 + $0x158] sm:$0xff]  ;;  %v139_v8 = vld [vmem:[%s1488_s1 + $0x1e0] sm:$0xff]  ;;  %v872_v10 = vpack.c.bf16 %v90_v2, %v89_v1  ;;  %v874_v14 = vpack.c.bf16 %v108_v7, %v107_v6 }
  0x12   :  { %865 = vmatpush3.bf16.msra.mxu0 %v864_v50  ;;  %v140_v9 = vld [vmem:[%s1488_s1 + $0x1e8] sm:$0xff]  ;;  %v91_v11 = vld [vmem:[%s1488_s1 + $0x60] sm:$0xff]  ;;  %v904_v13 = vpack.c.bf16 %v122_v5, %v121_v3  ;;  %v17_v17 = vld [vmem:[%s1489_s0 + $0x18] sm:$0xff] }
  0x13   :  { %897 = vmatpush3.bf16.msra.mxu1 %v896_v51  ;;  %867 = vmatprep.subr.bf16.mxu0 %v866_v52  ;;  %v92_v12 = vld [vmem:[%s1488_s1 + $0x68] sm:$0xff]  ;;  %v123_v15 = vld [vmem:[%s1488_s1 + $0x160] sm:$0xff]  ;;  %v906_v18 = vpack.c.bf16 %v140_v9, %v139_v8  ;;  %v109_v20 = vld [vmem:[%s1488_s1 + $0xf0] sm:$0xff] }
  0x14   :  { %899 = vmatprep.subr.bf16.mxu1 %v898_v56  ;;  %v15_v16 = vld [vmem:[%s1489_s0 + $0x8] sm:$0xff]  ;;  %v110_v21 = vld [vmem:[%s1488_s1 + $0xf8] sm:$0xff]  ;;  %v141_v22 = vld [vmem:[%s1488_s1 + $0x1f0] sm:$0xff]  ;;  %392 = vmatprep.mubr.f32.mxu1 %v17_v17  ;;  %v876_v24 = vpack.c.bf16 %v92_v12, %v91_v11 }
  0x15   :  { %v124_v19 = vld [vmem:[%s1488_s1 + $0x168] sm:$0xff]  ;;  %262 = vmatprep.mubr.f32.mxu0 %v15_v16  ;;  %v142_v23 = vld [vmem:[%s1488_s1 + $0x1f8] sm:$0xff]  ;;  %v878_v26 = vpack.c.bf16 %v110_v21, %v109_v20  ;;  %v93_v27 = vld [vmem:[%s1488_s1 + $0x70] sm:$0xff] }
  0x16   :  { %869 = vmatpush3.bf16.msra.mxu0 %v868_v62  ;;  %v908_v25 = vpack.c.bf16 %v124_v19, %v123_v15  ;;  %v94_v28 = vld [vmem:[%s1488_s1 + $0x78] sm:$0xff]  ;;  %v910_v29 = vpack.c.bf16 %v142_v23, %v141_v22  ;;  %v125_v30 = vld [vmem:[%s1488_s1 + $0x170] sm:$0xff]  ;;  %v143_v34 = vld [vmem:[%s1488_s1 + $0x200] sm:$0xff] }
  0x17   :  { %901 = vmatpush3.bf16.msra.mxu1 %v900_v63  ;;  %871 = vmatprep.subr.bf16.mxu0 %v870_v0  ;;  %v126_v31 = vld [vmem:[%s1488_s1 + $0x178] sm:$0xff]  ;;  %v880_v32 = vpack.c.bf16 %v94_v28, %v93_v27  ;;  %v144_v35 = vld [vmem:[%s1488_s1 + $0x208] sm:$0xff]  ;;  %v14_v36 = vld [vmem:[%s1489_s0] sm:$0xff] }
  0x18   :  { %903 = vmatprep.subr.bf16.mxu1 %v902_v4  ;;  %v912_v33 = vpack.c.bf16 %v126_v31, %v125_v30  ;;  %v915_v37 = vpack.c.bf16 %v144_v35, %v143_v34  ;;  %v16_v38 = vld [vmem:[%s1489_s0 + $0x10] sm:$0xff]  ;;  %v22_v41 = vld [vmem:[%s1489_s0 + $0x40] sm:$0xff]  ;;  %v146_v43 = vld [vmem:[%s1488_s1 + $0x218] sm:$0xff] }
  0x19   :  { %v20_v40 = vld [vmem:[%s1489_s0 + $0x30] sm:$0xff]  ;;  %v19_v44 = vld [vmem:[%s1489_s0 + $0x28] sm:$0xff]  ;;  %v21_v45 = vld [vmem:[%s1489_s0 + $0x38] sm:$0xff] }
  0x1a   :  { %873 = vmatpush3.bf16.msra.mxu0 %v872_v10  ;;  %v145_v42 = vld [vmem:[%s1488_s1 + $0x210] sm:$0xff]  ;;  %v25_v46 = vld [vmem:[%s1489_s0 + $0x58] sm:$0xff]  ;;  %v27_v48 = vld [vmem:[%s1489_s0 + $0x68] sm:$0xff] }
  0x1b   :  { %905 = vmatpush3.bf16.msra.mxu1 %v904_v13  ;;  %875 = vmatprep.subr.bf16.mxu0 %v874_v14  ;;  %v918_v47 = vpack.c.bf16 %v146_v43, %v145_v42  ;;  %v147_v49 = vld [vmem:[%s1488_s1 + $0x220] sm:$0xff]  ;;  %v148_v50 = vld [vmem:[%s1488_s1 + $0x228] sm:$0xff]  ;;  %v24_v51 = vld [vmem:[%s1489_s0 + $0x50] sm:$0xff] }
  0x1c   :  { %907 = vmatprep.subr.bf16.mxu1 %v906_v18  ;;  %v26_v52 = vld [vmem:[%s1489_s0 + $0x60] sm:$0xff]  ;;  %v921_v54 = vpack.c.bf16 %v148_v50, %v147_v49  ;;  %v32_v55 = vld [vmem:[%s1489_s0 + $0x90] sm:$0xff]  ;;  %v150_v57 = vld [vmem:[%s1488_s1 + $0x238] sm:$0xff] }
  0x1d   :  { %v30_v53 = vld [vmem:[%s1489_s0 + $0x80] sm:$0xff]  ;;  %v149_v56 = vld [vmem:[%s1488_s1 + $0x230] sm:$0xff]  ;;  %v29_v58 = vld [vmem:[%s1489_s0 + $0x78] sm:$0xff] }
  0x1e   :  { %877 = vmatpush3.bf16.msra.mxu0 %v876_v24  ;;  %v31_v59 = vld [vmem:[%s1489_s0 + $0x88] sm:$0xff]  ;;  %v924_v61 = vpack.c.bf16 %v150_v57, %v149_v56  ;;  %v37_v62 = vld [vmem:[%s1489_s0 + $0xb8] sm:$0xff]  ;;  %v34_v63 = vld [vmem:[%s1489_s0 + $0xa0] sm:$0xff] }
  0x1f   :  { %909 = vmatpush3.bf16.msra.mxu1 %v908_v25  ;;  %879 = vmatprep.subr.bf16.mxu0 %v878_v26  ;;  %v35_v60 = vld [vmem:[%s1489_s0 + $0xa8] sm:$0xff]  ;;  %v36_v0 = vld [vmem:[%s1489_s0 + $0xb0] sm:$0xff]  ;;  %v42_v2 = vld [vmem:[%s1489_s0 + $0xe0] sm:$0xff] }
  0x20   :  { %911 = vmatprep.subr.bf16.mxu1 %v910_v29  ;;  %v40_v1 = vld [vmem:[%s1489_s0 + $0xd0] sm:$0xff]  ;;  %v39_v3 = vld [vmem:[%s1489_s0 + $0xc8] sm:$0xff]  ;;  %v41_v4 = vld [vmem:[%s1489_s0 + $0xd8] sm:$0xff] }
  0x21   :  { %v45_v5 = vld [vmem:[%s1489_s0 + $0xf8] sm:$0xff]  ;;  %v47_v6 = vld [vmem:[%s1489_s0 + $0x108] sm:$0xff]  ;;  %v44_v7 = vld [vmem:[%s1489_s0 + $0xf0] sm:$0xff] }
  0x22   :  { %881 = vmatpush3.bf16.msra.mxu0 %v880_v32  ;;  %v46_v8 = vld [vmem:[%s1489_s0 + $0x100] sm:$0xff]  ;;  %v52_v10 = vld [vmem:[%s1489_s0 + $0x130] sm:$0xff]  ;;  %v49_v11 = vld [vmem:[%s1489_s0 + $0x118] sm:$0xff] }
  0x23   :  { %913 = vmatpush3.bf16.msra.mxu1 %v912_v33  ;;  %914 = vmatprep.subr.bf16.mxu0 %v937_v39  ;;  %v50_v9 = vld [vmem:[%s1489_s0 + $0x120] sm:$0xff]  ;;  %v51_v12 = vld [vmem:[%s1489_s0 + $0x128] sm:$0xff]  ;;  %v57_v14 = vld [vmem:[%s1489_s0 + $0x158] sm:$0xff]  ;;  %v939_v33 = vmov 0.0  }
  0x24   :  { %926 = vmatprep.subr.bf16.mxu1 %v937_v39  ;;  %v55_v13 = vld [vmem:[%s1489_s0 + $0x148] sm:$0xff]  ;;  %v54_v15 = vld [vmem:[%s1489_s0 + $0x140] sm:$0xff]  ;;  %v56_v16 = vld [vmem:[%s1489_s0 + $0x150] sm:$0xff] }
  0x25   :  { %263 = vmatmul.mubr.f32.vlgmr.msra.gmra.mrb[0].mxu0 %v14_v36  ;;  %v60_v17 = vld [vmem:[%s1489_s0 + $0x170] sm:$0xff]  ;;  %v62_v18 = vld [vmem:[%s1489_s0 + $0x180] sm:$0xff]  ;;  %v59_v19 = vld [vmem:[%s1489_s0 + $0x168] sm:$0xff] }
  0x26   :  { %393 = vmatmul.mubr.f32.vlgmr.msra.gmra.mrb[0].mxu1 %v16_v38  ;;  %916 = vmatpush3.bf16.msra.mxu0 %v915_v37  ;;  %v61_v20 = vld [vmem:[%s1489_s0 + $0x178] sm:$0xff]  ;;  %v67_v22 = vld [vmem:[%s1489_s0 + $0x1a8] sm:$0xff]  ;;  %v64_v23 = vld [vmem:[%s1489_s0 + $0x190] sm:$0xff] }
  0x27   :  { %267 = vmatprep.mubr.f32.mxu0 %v20_v40  ;;  %397 = vmatprep.mubr.f32.mxu1 %v22_v41  ;;  %v65_v21 = vld [vmem:[%s1489_s0 + $0x198] sm:$0xff]  ;;  %v66_v24 = vld [vmem:[%s1489_s0 + $0x1a0] sm:$0xff]  ;;  %v72_v26 = vld [vmem:[%s1489_s0 + $0x1d0] sm:$0xff] }
  0x28   :  { %930 = vmatpush3.bf16.msra.mxu1 %v915_v37  ;;  %917 = vmatprep.subr.bf16.mxu0 %v937_v39  ;;  %v70_v25 = vld [vmem:[%s1489_s0 + $0x1c0] sm:$0xff]  ;;  %v69_v27 = vld [vmem:[%s1489_s0 + $0x1b8] sm:$0xff]  ;;  %v71_v28 = vld [vmem:[%s1489_s0 + $0x1c8] sm:$0xff] }
  0x29   :  { %268 = vmatmul.mubr.f32.gmra.mrb[2].mxu0 %v19_v44  ;;  %927 = vmatprep.subr.bf16.mxu1 %v937_v39  ;;  %v75_v29 = vld [vmem:[%s1489_s0 + $0x1e8] sm:$0xff]  ;;  %v77_v30 = vld [vmem:[%s1489_s0 + $0x1f8] sm:$0xff]  ;;  %v74_v31 = vld [vmem:[%s1489_s0 + $0x1e0] sm:$0xff] }
  0x2a   :  { %398 = vmatmul.mubr.f32.gmra.mrb[2].mxu1 %v21_v45  ;;  %272 = vmatprep.mubr.f32.mxu0 %v25_v46  ;;  %v76_v32 = vld [vmem:[%s1489_s0 + $0x1f0] sm:$0xff]  ;;  %v18_v34 = vld [vmem:[%s1489_s0 + $0x20] sm:$0xff]  ;;  %v53_v35 = vld [vmem:[%s1489_s0 + $0x138] sm:$0xff] }
  0x2b   :  { %402 = vmatprep.mubr.f32.mxu1 %v27_v48  ;;  %919 = vmatpush3.bf16.msra.mxu0 %v918_v47  ;;  %v23_v36 = vld [vmem:[%s1489_s0 + $0x48] sm:$0xff]  ;;  %v58_v37 = vld [vmem:[%s1489_s0 + $0x160] sm:$0xff]  ;;  %v28_v38 = vld [vmem:[%s1489_s0 + $0x70] sm:$0xff] }
  0x2c   :  { %931 = vmatpush3.bf16.msra.mxu1 %v918_v47  ;;  %920 = vmatprep.subr.bf16.mxu0 %v937_v39  ;;  %v33_v40 = vld [vmem:[%s1489_s0 + $0x98] sm:$0xff]  ;;  %v68_v41 = vld [vmem:[%s1489_s0 + $0x1b0] sm:$0xff]  ;;  %v38_v42 = vld [vmem:[%s1489_s0 + $0xc0] sm:$0xff] }
  0x2d   :  { %273 = vmatmul.mubr.f32.gmra.mrb[4].mxu0 %v24_v51  ;;  %928 = vmatprep.subr.bf16.mxu1 %v937_v39  ;;  %v73_v43 = vld [vmem:[%s1489_s0 + $0x1d8] sm:$0xff]  ;;  %v43_v44 = vld [vmem:[%s1489_s0 + $0xe8] sm:$0xff]  ;;  %v78_v45 = vld [vmem:[%s1489_s0 + $0x200] sm:$0xff] }
  0x2e   :  { %403 = vmatmul.mubr.f32.gmra.mrb[4].mxu1 %v26_v52  ;;  %277 = vmatprep.mubr.f32.mxu0 %v30_v53  ;;  %v48_v46 = vld [vmem:[%s1489_s0 + $0x110] sm:$0xff]  ;;  %v1400_v48 = vld [vmem:[%s1490_s2] ss:$0 sm:$0xff] }
  0x2f   :  { %407 = vmatprep.mubr.f32.mxu1 %v32_v55  ;;  %922 = vmatpush3.bf16.msra.mxu0 %v921_v54 }
  0x30   :  { %932 = vmatpush3.bf16.msra.mxu1 %v921_v54  ;;  %923 = vmatprep.subr.bf16.mxu0 %v937_v39 }
  0x31   :  { %278 = vmatmul.mubr.f32.gmra.mrb[6].mxu0 %v29_v58  ;;  %929 = vmatprep.subr.bf16.mxu1 %v937_v39  ;;  %v63_v39 = vld [vmem:[%s1489_s0 + $0x188] sm:$0xff] }
  0x32   :  { %408 = vmatmul.mubr.f32.gmra.mrb[6].mxu1 %v31_v59  ;;  %282 = vmatprep.mubr.f32.mxu0 %v35_v60 }
  0x33   :  { %412 = vmatprep.mubr.f32.mxu1 %v37_v62  ;;  %925 = vmatpush3.bf16.msra.mxu0 %v924_v61 }
  0x34   :  { %933 = vmatpush3.bf16.msra.mxu1 %v924_v61 }
  0x35   :  { %283 = vmatmul.mubr.f32.gmra.mrb[8].mxu0 %v34_v63 }
  0x36   :  { %413 = vmatmul.mubr.f32.gmra.mrb[8].mxu1 %v36_v0  ;;  %287 = vmatprep.mubr.f32.mxu0 %v40_v1 }
  0x37   :  { %417 = vmatprep.mubr.f32.mxu1 %v42_v2 }
  0x39   :  { %288 = vmatmul.mubr.f32.gmra.mrb[10].mxu0 %v39_v3 }
  0x3a   :  { %418 = vmatmul.mubr.f32.gmra.mrb[10].mxu1 %v41_v4  ;;  %292 = vmatprep.mubr.f32.mxu0 %v45_v5 }
  0x3b   :  { %422 = vmatprep.mubr.f32.mxu1 %v47_v6 }
  0x3d   :  { %293 = vmatmul.mubr.f32.gmra.mrb[12].mxu0 %v44_v7 }
  0x3e   :  { %423 = vmatmul.mubr.f32.gmra.mrb[12].mxu1 %v46_v8  ;;  %297 = vmatprep.mubr.f32.mxu0 %v50_v9 }
  0x3f   :  { %427 = vmatprep.mubr.f32.mxu1 %v52_v10 }
  0x41   :  { %298 = vmatmul.mubr.f32.gmra.mrb[14].mxu0 %v49_v11 }
  0x42   :  { %428 = vmatmul.mubr.f32.gmra.mrb[14].mxu1 %v51_v12  ;;  %302 = vmatprep.mubr.f32.mxu0 %v55_v13 }
  0x43   :  { %432 = vmatprep.mubr.f32.mxu1 %v57_v14 }
  0x45   :  { %303 = vmatmul.mubr.f32.gmra.mrb[16].mxu0 %v54_v15 }
  0x46   :  { %433 = vmatmul.mubr.f32.gmra.mrb[16].mxu1 %v56_v16  ;;  %307 = vmatprep.mubr.f32.mxu0 %v60_v17 }
  0x47   :  { %437 = vmatprep.mubr.f32.mxu1 %v62_v18 }
  0x49   :  { %308 = vmatmul.mubr.f32.gmra.mrb[18].mxu0 %v59_v19 }
  0x4a   :  { %438 = vmatmul.mubr.f32.gmra.mrb[18].mxu1 %v61_v20  ;;  %312 = vmatprep.mubr.f32.mxu0 %v65_v21 }
  0x4b   :  { %442 = vmatprep.mubr.f32.mxu1 %v67_v22 }
  0x4d   :  { %313 = vmatmul.mubr.f32.gmra.mrb[20].mxu0 %v64_v23 }
  0x4e   :  { %443 = vmatmul.mubr.f32.gmra.mrb[20].mxu1 %v66_v24  ;;  %317 = vmatprep.mubr.f32.mxu0 %v70_v25 }
  0x4f   :  { %447 = vmatprep.mubr.f32.mxu1 %v72_v26 }
  0x51   :  { %318 = vmatmul.mubr.f32.gmra.mrb[22].mxu0 %v69_v27 }
  0x52   :  { %448 = vmatmul.mubr.f32.gmra.mrb[22].mxu1 %v71_v28  ;;  %322 = vmatprep.mubr.f32.mxu0 %v75_v29 }
  0x53   :  { %452 = vmatprep.mubr.f32.mxu1 %v77_v30 }
  0x55   :  { %323 = vmatmul.mubr.f32.gmra.mrb[24].mxu0 %v74_v31 }
  0x56   :  { %453 = vmatmul.mubr.f32.gmra.mrb[24].mxu1 %v76_v32  ;;  %811 = vmatprep.mubr.msk.f32.mxu0 %vm938_vm0, %v939_v33 }
  0x57   :  { %832 = vmatprep.mubr.msk.f32.mxu1 %vm938_vm0, %v939_v33 }
  0x59   :  { %812 = vmatmul.mubr.msk.f32.vlgmr.msra.gmra.mrb[26].mxu0 %vm158_vm1, %v18_v34 }
  0x5a   :  { %833 = vmatmul.mubr.msk.f32.vlgmr.msra.gmra.mrb[26].mxu1 %vm158_vm1, %v53_v35  ;;  %814 = vmatprep.mubr.msk.f32.mxu0 %vm938_vm0, %v939_v33 }
  0x5b   :  { %835 = vmatprep.mubr.msk.f32.mxu1 %vm938_vm0, %v939_v33 }
  0x5d   :  { %815 = vmatmul.mubr.msk.f32.gmra.mrb[28].mxu0 %vm158_vm1, %v23_v36 }
  0x5e   :  { %836 = vmatmul.mubr.msk.f32.gmra.mrb[28].mxu1 %vm158_vm1, %v58_v37  ;;  %817 = vmatprep.mubr.msk.f32.mxu0 %vm938_vm0, %v939_v33 }
  0x5f   :  { %838 = vmatprep.mubr.msk.f32.mxu1 %vm938_vm0, %v939_v33 }
  0x61   :  { %818 = vmatmul.mubr.msk.f32.gmra.mrb[30].mxu0 %vm158_vm1, %v28_v38 }
  0x62   :  { %839 = vmatmul.mubr.msk.f32.gmra.mrb[30].mxu1 %vm158_vm1, %v63_v39  ;;  %820 = vmatprep.mubr.msk.f32.mxu0 %vm938_vm0, %v939_v33 }
  0x63   :  { %841 = vmatprep.mubr.msk.f32.mxu1 %vm938_vm0, %v939_v33 }
  0x65   :  { %821 = vmatmul.mubr.msk.f32.gmra.mrb[32].mxu0 %vm158_vm1, %v33_v40 }
  0x66   :  { %842 = vmatmul.mubr.msk.f32.gmra.mrb[32].mxu1 %vm158_vm1, %v68_v41  ;;  %823 = vmatprep.mubr.msk.f32.mxu0 %vm938_vm0, %v939_v33 }
  0x67   :  { %844 = vmatprep.mubr.msk.f32.mxu1 %vm938_vm0, %v939_v33 }
  0x69   :  { %824 = vmatmul.mubr.msk.f32.gmra.mrb[34].mxu0 %vm158_vm1, %v38_v42 }
  0x6a   :  { %845 = vmatmul.mubr.msk.f32.gmra.mrb[34].mxu1 %vm158_vm1, %v73_v43  ;;  %826 = vmatprep.mubr.msk.f32.mxu0 %vm938_vm0, %v939_v33 }
  0x6b   :  { %847 = vmatprep.mubr.msk.f32.mxu1 %vm938_vm0, %v939_v33 }
  0x6d   :  { %827 = vmatmul.mubr.msk.f32.gmra.mrb[36].mxu0 %vm158_vm1, %v43_v44 }
  0x6e   :  { %848 = vmatmul.mubr.msk.f32.gmra.mrb[36].mxu1 %vm158_vm1, %v78_v45  ;;  %829 = vmatprep.mubr.msk.f32.mxu0 %vm938_vm0, %v939_v33 }
  0x71   :  { %830 = vmatmul.mubr.msk.f32.gmra.mrb[38].mxu0 %vm158_vm1, %v48_v46 }
  0xf8   :  { %v664_v47 = vpop.f32.mrb[0].mxu0 }
  0xf9   :  { %v665_v49 = vpop.f32.mrb[1].mxu0  ;;  %v735_v50 = vpop.f32.mrb[0].mxu1 }
  0xfa   :  { %v666_v51 = vadd.f32 %v665_v49, %v664_v47  ;;  %v736_v52 = vpop.f32.mrb[1].mxu1 }
  0xfb   :  { %v737_v53 = vadd.f32 %v736_v52, %v735_v50 }
  0xfc   :  { %v265_v54 = vadd.f32 %v666_v51, %v1400_v48  ;;  %v667_v55 = vpop.f32.mrb[2].mxu0 }
  0xfd   :  { %v668_v56 = vpop.f32.mrb[3].mxu0  ;;  %v738_v57 = vpop.f32.mrb[2].mxu1 }
  0xfe   :  { %v669_v58 = vadd.f32 %v668_v56, %v667_v55  ;;  %v739_v59 = vpop.f32.mrb[3].mxu1  ;;  %v1403_v60 = vadd.f32 %v737_v53, %v265_v54 }
  0xff   :  { %v740_v61 = vadd.f32 %v739_v59, %v738_v57 }
 0x100   :  { %v270_v62 = vadd.f32 %v669_v58, %v1400_v48  ;;  %v670_v63 = vpop.f32.mrb[4].mxu0 }
 0x101   :  { %v671_v0 = vpop.f32.mrb[5].mxu0  ;;  %v741_v1 = vpop.f32.mrb[4].mxu1 }
 0x102   :  { %v672_v2 = vadd.f32 %v671_v0, %v670_v63  ;;  %v742_v3 = vpop.f32.mrb[5].mxu1  ;;  %v1406_v4 = vadd.f32 %v740_v61, %v270_v62 }
 0x103   :  { %v743_v5 = vadd.f32 %v742_v3, %v741_v1 }
 0x104   :  { %v275_v6 = vadd.f32 %v672_v2, %v1400_v48  ;;  %v673_v7 = vpop.f32.mrb[6].mxu0 }
 0x105   :  { %v674_v8 = vpop.f32.mrb[7].mxu0  ;;  %v744_v9 = vpop.f32.mrb[6].mxu1 }
 0x106   :  { %v675_v10 = vadd.f32 %v674_v8, %v673_v7  ;;  %v745_v11 = vpop.f32.mrb[7].mxu1  ;;  %v1409_v12 = vadd.f32 %v743_v5, %v275_v6 }
 0x107   :  { %v746_v13 = vadd.f32 %v745_v11, %v744_v9 }
 0x108   :  { %v280_v14 = vadd.f32 %v675_v10, %v1400_v48  ;;  %v676_v15 = vpop.f32.mrb[8].mxu0 }
 0x109   :  { %v677_v16 = vpop.f32.mrb[9].mxu0  ;;  %v747_v17 = vpop.f32.mrb[8].mxu1 }
 0x10a   :  { %v678_v18 = vadd.f32 %v677_v16, %v676_v15  ;;  %v748_v19 = vpop.f32.mrb[9].mxu1  ;;  %v1412_v20 = vadd.f32 %v746_v13, %v280_v14 }
 0x10b   :  { %v749_v21 = vadd.f32 %v748_v19, %v747_v17 }
 0x10c   :  { %v285_v22 = vadd.f32 %v678_v18, %v1400_v48  ;;  %v679_v23 = vpop.f32.mrb[10].mxu0 }
 0x10d   :  { %v680_v24 = vpop.f32.mrb[11].mxu0  ;;  %v750_v25 = vpop.f32.mrb[10].mxu1 }
 0x10e   :  { %v681_v26 = vadd.f32 %v680_v24, %v679_v23  ;;  %v751_v27 = vpop.f32.mrb[11].mxu1  ;;  %v1415_v28 = vadd.f32 %v749_v21, %v285_v22 }
 0x10f   :  { %v752_v29 = vadd.f32 %v751_v27, %v750_v25 }
 0x110   :  { %v290_v30 = vadd.f32 %v681_v26, %v1400_v48  ;;  %v682_v31 = vpop.f32.mrb[12].mxu0 }
 0x111   :  { %v683_v32 = vpop.f32.mrb[13].mxu0  ;;  %v753_v33 = vpop.f32.mrb[12].mxu1 }
 0x112   :  { %v684_v34 = vadd.f32 %v683_v32, %v682_v31  ;;  %v754_v35 = vpop.f32.mrb[13].mxu1  ;;  %v1418_v36 = vadd.f32 %v752_v29, %v290_v30 }
 0x113   :  { %v755_v37 = vadd.f32 %v754_v35, %v753_v33 }
 0x114   :  { %v295_v38 = vadd.f32 %v684_v34, %v1400_v48  ;;  %v685_v39 = vpop.f32.mrb[14].mxu0 }
 0x115   :  { %v686_v40 = vpop.f32.mrb[15].mxu0  ;;  %v756_v41 = vpop.f32.mrb[14].mxu1 }
 0x116   :  { %v687_v42 = vadd.f32 %v686_v40, %v685_v39  ;;  %v757_v43 = vpop.f32.mrb[15].mxu1  ;;  %v1421_v44 = vadd.f32 %v755_v37, %v295_v38 }
 0x117   :  { %v758_v45 = vadd.f32 %v757_v43, %v756_v41 }
 0x118   :  { %v300_v46 = vadd.f32 %v687_v42, %v1400_v48  ;;  %v688_v47 = vpop.f32.mrb[16].mxu0 }
 0x119   :  { %v689_v49 = vpop.f32.mrb[17].mxu0  ;;  %v759_v50 = vpop.f32.mrb[16].mxu1 }
 0x11a   :  { %v690_v51 = vadd.f32 %v689_v49, %v688_v47  ;;  %v760_v52 = vpop.f32.mrb[17].mxu1  ;;  %v430_v53 = vadd.f32 %v758_v45, %v300_v46 }
 0x11b   :  { %v761_v54 = vadd.f32 %v760_v52, %v759_v50 }
 0x11c   :  { %v305_v55 = vadd.f32 %v690_v51, %v1400_v48  ;;  %v691_v56 = vpop.f32.mrb[18].mxu0 }
 0x11d   :  { %v692_v57 = vpop.f32.mrb[19].mxu0  ;;  %v762_v58 = vpop.f32.mrb[18].mxu1 }
 0x11e   :  { %v693_v59 = vadd.f32 %v692_v57, %v691_v56  ;;  %v763_v61 = vpop.f32.mrb[19].mxu1  ;;  %v435_v62 = vadd.f32 %v761_v54, %v305_v55 }
 0x11f   :  { %v764_v63 = vadd.f32 %v763_v61, %v762_v58 }
 0x120   :  { %v310_v0 = vadd.f32 %v693_v59, %v1400_v48  ;;  %v694_v1 = vpop.f32.mrb[20].mxu0 }
 0x121   :  { %v695_v2 = vpop.f32.mrb[21].mxu0  ;;  %v765_v3 = vpop.f32.mrb[20].mxu1 }
 0x122   :  { %v696_v5 = vadd.f32 %v695_v2, %v694_v1  ;;  %v766_v6 = vpop.f32.mrb[21].mxu1  ;;  %v440_v7 = vadd.f32 %v764_v63, %v310_v0 }
 0x123   :  { %v767_v8 = vadd.f32 %v766_v6, %v765_v3 }
 0x124   :  { %v315_v9 = vadd.f32 %v696_v5, %v1400_v48  ;;  %v697_v10 = vpop.f32.mrb[22].mxu0 }
 0x125   :  { %v698_v11 = vpop.f32.mrb[23].mxu0  ;;  %v768_v13 = vpop.f32.mrb[22].mxu1 }
 0x126   :  { %v699_v14 = vadd.f32 %v698_v11, %v697_v10  ;;  %v769_v15 = vpop.f32.mrb[23].mxu1  ;;  %v445_v16 = vadd.f32 %v767_v8, %v315_v9 }
 0x127   :  { %v770_v17 = vadd.f32 %v769_v15, %v768_v13 }
 0x128   :  { %v320_v18 = vadd.f32 %v699_v14, %v1400_v48  ;;  %v700_v19 = vpop.f32.mrb[24].mxu0 }
 0x129   :  { %v701_v21 = vpop.f32.mrb[25].mxu0  ;;  %v771_v22 = vpop.f32.mrb[24].mxu1 }
 0x12a   :  { %v702_v23 = vadd.f32 %v701_v21, %v700_v19  ;;  %v772_v24 = vpop.f32.mrb[25].mxu1  ;;  %v450_v25 = vadd.f32 %v770_v17, %v320_v18 }
 0x12b   :  { %v773_v26 = vadd.f32 %v772_v24, %v771_v22 }
 0x12c   :  { %v325_v27 = vadd.f32 %v702_v23, %v1400_v48  ;;  %v524_v29 = vpop.f32.mrb[26].mxu0 }
 0x12d   :  { %v525_v30 = vadd.f32 %v524_v29, %v1403_v60  ;;  %v559_v31 = vpop.f32.mrb[26].mxu1  ;;  %v813_v32 = vpop.f32.mrb[27].mxu0 }
 0x12e   :  { %v560_v33 = vadd.f32 %v559_v31, %v430_v53  ;;  %v834_v34 = vpop.f32.mrb[27].mxu1  ;;  %v455_v35 = vadd.f32 %v773_v26, %v325_v27 }
 0x12f   :  { %v588_v37 = vmax.f32 %v525_v30, 0.0 }
 0x130   :  { %v595_v38 = vmax.f32 %v560_v33, 0.0  ;;  %v529_v39 = vpop.f32.mrb[28].mxu0 }
 0x131   :  { %601 = vst.msk [vmem:[%s1491_s3] sm:$0xff] %vm158_vm1, %v588_v37  ;;  %v530_v40 = vadd.f32 %v529_v39, %v1406_v4  ;;  %v564_v41 = vpop.f32.mrb[28].mxu1  ;;  %v816_v48 = vpop.f32.mrb[29].mxu0 }
 0x132   :  { %608 = vst.msk [vmem:[%s1491_s3 + $0x38] sm:$0xff] %vm158_vm1, %v595_v38  ;;  %v565_v60 = vadd.f32 %v564_v41, %v435_v62  ;;  %v837_v42 = vpop.f32.mrb[29].mxu1 }
 0x133   :  { %v589_v43 = vmax.f32 %v530_v40, 0.0 }
 0x134   :  { %v596_v45 = vmax.f32 %v565_v60, 0.0  ;;  %v534_v46 = vpop.f32.mrb[30].mxu0 }
 0x135   :  { %602 = vst.msk [vmem:[%s1491_s3 + $0x8] sm:$0xff] %vm158_vm1, %v589_v43  ;;  %v535_v47 = vadd.f32 %v534_v46, %v1409_v12  ;;  %v569_v4 = vpop.f32.mrb[30].mxu1  ;;  %v819_v49 = vpop.f32.mrb[31].mxu0 }
 0x136   :  { %609 = vst.msk [vmem:[%s1491_s3 + $0x40] sm:$0xff] %vm158_vm1, %v596_v45  ;;  %v570_v50 = vadd.f32 %v569_v4, %v440_v7  ;;  %v840_v51 = vpop.f32.mrb[31].mxu1 }
 0x137   :  { %v590_v52 = vmax.f32 %v535_v47, 0.0 }
 0x138   :  { %v597_v53 = vmax.f32 %v570_v50, 0.0  ;;  %v539_v54 = vpop.f32.mrb[32].mxu0 }
 0x139   :  { %603 = vst.msk [vmem:[%s1491_s3 + $0x10] sm:$0xff] %vm158_vm1, %v590_v52  ;;  %v540_v55 = vadd.f32 %v539_v54, %v1412_v20  ;;  %v574_v12 = vpop.f32.mrb[32].mxu1  ;;  %v822_v56 = vpop.f32.mrb[33].mxu0 }
 0x13a   :  { %610 = vst.msk [vmem:[%s1491_s3 + $0x48] sm:$0xff] %vm158_vm1, %v597_v53  ;;  %v575_v57 = vadd.f32 %v574_v12, %v445_v16  ;;  %v843_v58 = vpop.f32.mrb[33].mxu1 }
 0x13b   :  { %v591_v59 = vmax.f32 %v540_v55, 0.0 }
 0x13c   :  { %v598_v61 = vmax.f32 %v575_v57, 0.0  ;;  %v544_v62 = vpop.f32.mrb[34].mxu0 }
 0x13d   :  { %604 = vst.msk [vmem:[%s1491_s3 + $0x18] sm:$0xff] %vm158_vm1, %v591_v59  ;;  %v545_v63 = vadd.f32 %v544_v62, %v1415_v28  ;;  %v579_v20 = vpop.f32.mrb[34].mxu1  ;;  %v825_v0 = vpop.f32.mrb[35].mxu0 }
 0x13e   :  { %611 = vst.msk [vmem:[%s1491_s3 + $0x50] sm:$0xff] %vm158_vm1, %v598_v61  ;;  %v580_v1 = vadd.f32 %v579_v20, %v450_v25  ;;  %v846_v2 = vpop.f32.mrb[35].mxu1 }
 0x13f   :  { %v592_v3 = vmax.f32 %v545_v63, 0.0 }
 0x140   :  { %v599_v5 = vmax.f32 %v580_v1, 0.0  ;;  %v549_v6 = vpop.f32.mrb[36].mxu0 }
 0x141   :  { %605 = vst.msk [vmem:[%s1491_s3 + $0x20] sm:$0xff] %vm158_vm1, %v592_v3  ;;  %v550_v7 = vadd.f32 %v549_v6, %v1418_v36  ;;  %v584_v28 = vpop.f32.mrb[36].mxu1  ;;  %v828_v8 = vpop.f32.mrb[37].mxu0 }
 0x142   :  { %612 = vst.msk [vmem:[%s1491_s3 + $0x58] sm:$0xff] %vm158_vm1, %v599_v5  ;;  %v585_v9 = vadd.f32 %v584_v28, %v455_v35  ;;  %v849_v10 = vpop.f32.mrb[37].mxu1 }
 0x143   :  { %v593_v11 = vmax.f32 %v550_v7, 0.0 }
 0x144   :  { %v600_v13 = vmax.f32 %v585_v9, 0.0  ;;  %v554_v14 = vpop.f32.mrb[38].mxu0 }
 0x145   :  { %606 = vst.msk [vmem:[%s1491_s3 + $0x28] sm:$0xff] %vm158_vm1, %v593_v11  ;;  %v555_v15 = vadd.f32 %v554_v14, %v1421_v44  ;;  %v831_v36 = vpop.f32.mrb[39].mxu0 }
 0x146   :  { %613 = vst.msk [vmem:[%s1491_s3 + $0x60] sm:$0xff] %vm158_vm1, %v600_v13 }
 0x147   :  { %v594_v16 = vmax.f32 %v555_v15, 0.0 }
 0x149   :  { %607 = vst.msk [vmem:[%s1491_s3 + $0x30] sm:$0xff] %vm158_vm1, %v594_v16 }

// kernel: dqn_forward.7
= control target key start
LH: loop header
LB: loop body
LE: loop exit
PB: predicated region body
PF: predicated region fallthrough
CT: control target
= control target key end

     0   :  { %10 = vsyncpa [#allocation4], 0  ;;  %s2512_s18 = smov 0   ;;  %s2945_s0 = inlined_call_operand.vmem [shape: f32[2,3200], index: 0, kind: input, shape index: {}]   ;;  %s2946_s1 = inlined_call_operand.vmem [shape: bf16[3200,512], index: 1, kind: input, shape index: {}]   ;;  %s2947_s2 = inlined_call_operand.vmem [shape: f32[1,512], index: 2, kind: input, shape index: {}]   ;;  %s2948_s3 = inlined_call_operand.vmem [shape: f32[512,4], index: 3, kind: input, shape index: {}]   ;;  %s2949_s4 = inlined_call_operand.vmem [shape: f32[1,4], index: 4, kind: input, shape index: {}]   ;;  %s2950_s5 = inlined_call_operand.hbm [shape: f32[2,4], index: 5, kind: output, shape index: {}]  }
   0x1 LB: > { %s2518_s19 = sadd.s32 4294967295, %s2476_s18   ;;  %p1546_p0 = scmp.ge.s32.totalorder %s2476_s18, 1  ;;  %s2476_s18 = sphi %s2512_s18, %s16_s18  }
   0x2   : > { %p196_p1 = scmp.lt.s32.totalorder %s2476_s18, 6 }
   0x4   : > { %p197_p2 = pnand %p1546_p0, %p196_p1 }
   0x5   : > { %s225_s20 = smul.u32 (!%p197_p2), 5, %s2518_s19  ;;  %p1550_p5 = scmp.ne.s32.totalorder (!%p197_p2), %s2518_s19, 0 }
   0x6   : > { %200 = sbr.rel (%p197_p2) target bundleno = 667 (0x29b), region = 40 }
   0x7   : > { %s231_s21 = smul.u32 (!%p197_p2), 80, %s2518_s19  ;;  %p226_p3 = scmp.lt.s32.totalorder (!%p197_p2), %s225_s20, 24 }
   0x9   : > { %p232_p4 = scmp.lt.s32.totalorder (!%p197_p2), %s231_s21, 399 }
   0xd   : > { %s2952_s20 = smov (!%p226_p3, %s225_s20), 24  ;;  %s2954_s21 = smov (!%p232_p4, %s231_s21), 399 }
   0xe   : > { %s1547_s22 = sshll.u32 %s2952_s20, 1  ;;  %s1558_s26 = sshll.u32 %s2954_s21, 4  ;;  %v2478_v0 = vmov (!%p1550_p5), 0.0  }
   0xf   : > { %s2527_s25 = scalar_lea.vmem %s2945_s0, %s1547_s22  ;;  %s2532_s29 = scalar_lea.vmem %s2946_s1, %s1558_s26  ;;  %242 = vst [vmem:[#allocation2] sm:$0xff] (!%p1550_p5), %v2478_v0 }
  0x10   : > { %241 = sbr.rel (%p1550_p5) target bundleno = 23 (0x17), region = 44 }
  0x17 PF: > { %v2199_v1 = vld [vmem:[%s2532_s29 + $0x4] ss:$16 sps:$4 sm:$0xff]   ;;  %v2201_v2 = vld [vmem:[%s2532_s29 + $0xc] ss:$16 sps:$4 sm:$0xff]   ;;  %v2203_v3 = vld [vmem:[%s2532_s29] ss:$16 sps:$4 sm:$0xff]   ;;  %v732_v39 = vlaneseq }
  0x18   : > { %1630 = vmatprep.subr.bf16.mxu0 %v2199_v1  ;;  %v2204_v4 = vld [vmem:[%s2532_s29 + $0x8] ss:$16 sps:$4 sm:$0xff]   ;;  %1790 = vmatprep.subr.bf16.mxu1 %v2201_v2  ;;  %v2205_v5 = vld [vmem:[%s2532_s29 + $0x24] ss:$16 sps:$4 sm:$0xff]   ;;  %v2207_v6 = vld [vmem:[%s2532_s29 + $0x2c] ss:$16 sps:$4 sm:$0xff]  }
  0x19   : > { %1632 = vmatpush1.bf16.msra.mxu0 %v2203_v3  ;;  %1792 = vmatpush1.bf16.msra.mxu1 %v2204_v4  ;;  %v2209_v7 = vld [vmem:[%s2532_s29 + $0x20] ss:$16 sps:$4 sm:$0xff]   ;;  %v2210_v8 = vld [vmem:[%s2532_s29 + $0x28] ss:$16 sps:$4 sm:$0xff]   ;;  %v2211_v9 = vld [vmem:[%s2532_s29 + $0x44] ss:$16 sps:$4 sm:$0xff]  }
  0x1a   : > { %1634 = vmatprep.subr.bf16.mxu0 %v2205_v5  ;;  %1794 = vmatprep.subr.bf16.mxu1 %v2207_v6  ;;  %v2213_v10 = vld [vmem:[%s2532_s29 + $0x4c] ss:$16 sps:$4 sm:$0xff]   ;;  %v2215_v11 = vld [vmem:[%s2532_s29 + $0x40] ss:$16 sps:$4 sm:$0xff]   ;;  %v2216_v12 = vld [vmem:[%s2532_s29 + $0x48] ss:$16 sps:$4 sm:$0xff]  }
  0x1b   : > { %v2217_v13 = vld [vmem:[%s2532_s29 + $0x64] ss:$16 sps:$4 sm:$0xff]   ;;  %v2219_v14 = vld [vmem:[%s2532_s29 + $0x6c] ss:$16 sps:$4 sm:$0xff]   ;;  %v2221_v15 = vld [vmem:[%s2532_s29 + $0x60] ss:$16 sps:$4 sm:$0xff]  }
  0x1c   : > { %v2222_v16 = vld [vmem:[%s2532_s29 + $0x68] ss:$16 sps:$4 sm:$0xff]   ;;  %v2223_v17 = vld [vmem:[%s2532_s29 + $0x84] ss:$16 sps:$4 sm:$0xff]   ;;  %v2225_v18 = vld [vmem:[%s2532_s29 + $0x8c] ss:$16 sps:$4 sm:$0xff]  }
  0x1d   : > { %1636 = vmatpush1.bf16.msra.mxu0 %v2209_v7  ;;  %1796 = vmatpush1.bf16.msra.mxu1 %v2210_v8  ;;  %v2227_v19 = vld [vmem:[%s2532_s29 + $0x80] ss:$16 sps:$4 sm:$0xff]   ;;  %v2228_v20 = vld [vmem:[%s2532_s29 + $0x88] ss:$16 sps:$4 sm:$0xff]   ;;  %v2229_v21 = vld [vmem:[%s2532_s29 + $0xa4] ss:$16 sps:$4 sm:$0xff]  }
  0x1e   : > { %1638 = vmatprep.subr.bf16.mxu0 %v2211_v9  ;;  %1798 = vmatprep.subr.bf16.mxu1 %v2213_v10  ;;  %v2231_v22 = vld [vmem:[%s2532_s29 + $0xac] ss:$16 sps:$4 sm:$0xff]   ;;  %v2233_v23 = vld [vmem:[%s2532_s29 + $0xa0] ss:$16 sps:$4 sm:$0xff]   ;;  %v2234_v24 = vld [vmem:[%s2532_s29 + $0xa8] ss:$16 sps:$4 sm:$0xff]  }
  0x1f   : > { %v2235_v25 = vld [vmem:[%s2532_s29 + $0xc4] ss:$16 sps:$4 sm:$0xff]   ;;  %v2237_v26 = vld [vmem:[%s2532_s29 + $0xcc] ss:$16 sps:$4 sm:$0xff]   ;;  %v2239_v27 = vld [vmem:[%s2532_s29 + $0xc0] ss:$16 sps:$4 sm:$0xff]  }
  0x20   : > { %v2240_v28 = vld [vmem:[%s2532_s29 + $0xc8] ss:$16 sps:$4 sm:$0xff]   ;;  %v2241_v29 = vld [vmem:[%s2532_s29 + $0xe4] ss:$16 sps:$4 sm:$0xff]   ;;  %v2243_v30 = vld [vmem:[%s2532_s29 + $0xec] ss:$16 sps:$4 sm:$0xff]  }
  0x21   : > { %1640 = vmatpush1.bf16.msra.mxu0 %v2215_v11  ;;  %1800 = vmatpush1.bf16.msra.mxu1 %v2216_v12  ;;  %v2245_v31 = vld [vmem:[%s2532_s29 + $0xe0] ss:$16 sps:$4 sm:$0xff]   ;;  %v2246_v32 = vld [vmem:[%s2532_s29 + $0xe8] ss:$16 sps:$4 sm:$0xff]   ;;  %v2247_v33 = vld [vmem:[%s2532_s29 + $0x104] ss:$16 sps:$4 sm:$0xff]  }
  0x22   : > { %1642 = vmatprep.subr.bf16.mxu0 %v2217_v13  ;;  %1802 = vmatprep.subr.bf16.mxu1 %v2219_v14  ;;  %v2249_v34 = vld [vmem:[%s2532_s29 + $0x10c] ss:$16 sps:$4 sm:$0xff]   ;;  %v2251_v35 = vld [vmem:[%s2532_s29 + $0x100] ss:$16 sps:$4 sm:$0xff]   ;;  %v2252_v36 = vld [vmem:[%s2532_s29 + $0x108] ss:$16 sps:$4 sm:$0xff]  }
  0x23   : > { %v2479_v37 = vmov 1983009808   ;;  %v2253_v40 = vld [vmem:[%s2532_s29 + $0x124] ss:$16 sps:$4 sm:$0xff]   ;;  %v2255_v41 = vld [vmem:[%s2532_s29 + $0x12c] ss:$16 sps:$4 sm:$0xff]  }
  0x24   : > { %v730_v38 = vunpack.c.l.s4 %v2479_v37  ;;  %v2257_v42 = vld [vmem:[%s2532_s29 + $0x120] ss:$16 sps:$4 sm:$0xff]   ;;  %v2574_v44 = vshrl.u32 %v732_v39, 7  ;;  %v2258_v45 = vld [vmem:[%s2532_s29 + $0x128] ss:$16 sps:$4 sm:$0xff]   ;;  %p1552_p6 = scmp.ne.s32.totalorder %s2518_s19, 4 }
  0x25   : > { %1644 = vmatpush1.bf16.msra.mxu0 %v2221_v15  ;;  %1804 = vmatpush1.bf16.msra.mxu1 %v2222_v16  ;;  %v2259_v46 = vld [vmem:[%s2532_s29 + $0x144] ss:$16 sps:$4 sm:$0xff]   ;;  %v2261_v47 = vld [vmem:[%s2532_s29 + $0x14c] ss:$16 sps:$4 sm:$0xff]   ;;  %v2263_v48 = vld [vmem:[%s2532_s29 + $0x140] ss:$16 sps:$4 sm:$0xff]  }
  0x26   : > { %1646 = vmatprep.subr.bf16.mxu0 %v2223_v17  ;;  %1806 = vmatprep.subr.bf16.mxu1 %v2225_v18  ;;  %v731_v43 = vunpack.c.0.s8 %v730_v38  ;;  %v2264_v49 = vld [vmem:[%s2532_s29 + $0x148] ss:$16 sps:$4 sm:$0xff]   ;;  %v2265_v51 = vld [vmem:[%s2532_s29 + $0x164] ss:$16 sps:$4 sm:$0xff]   ;;  %v2267_v52 = vld [vmem:[%s2532_s29 + $0x16c] ss:$16 sps:$4 sm:$0xff]  }
  0x27   : > { %v244_v53 = vld [vmem:[%s2527_s25] sm:$0xff]  ;;  %v2270_v56 = vld [vmem:[%s2532_s29 + $0x168] ss:$16 sps:$4 sm:$0xff]   ;;  %v2273_v58 = vld [vmem:[%s2532_s29 + $0x18c] ss:$16 sps:$4 sm:$0xff]   ;;  %vm1483_vm0 = vcmask (!%p1552_p6), 25600  }
  0x28   : > { %v2582_v50 = vsub.s32 %v731_v43, %v2574_v44  ;;  %v2269_v54 = vld [vmem:[%s2532_s29 + $0x160] ss:$16 sps:$4 sm:$0xff]   ;;  %v2271_v57 = vld [vmem:[%s2532_s29 + $0x184] ss:$16 sps:$4 sm:$0xff]   ;;  %v2276_v61 = vld [vmem:[%s2532_s29 + $0x188] ss:$16 sps:$4 sm:$0xff]   ;;  %v728_v8 = vcombine.high %v244_v53, %v244_v53 }
  0x29   : > { %1648 = vmatpush1.bf16.msra.mxu0 %v2227_v19  ;;  %1808 = vmatpush1.bf16.msra.mxu1 %v2228_v20  ;;  %v2275_v60 = vld [vmem:[%s2532_s29 + $0x180] ss:$16 sps:$4 sm:$0xff]   ;;  %v2277_v62 = vld [vmem:[%s2532_s29 + $0x1a4] ss:$16 sps:$4 sm:$0xff]   ;;  %v2279_v63 = vld [vmem:[%s2532_s29 + $0x1ac] ss:$16 sps:$4 sm:$0xff]  }
  0x2a   : > { %1650 = vmatprep.subr.bf16.mxu0 %v2229_v21  ;;  %1810 = vmatprep.subr.bf16.mxu1 %v2231_v22  ;;  %v735_v55 = vrot.slane %v244_v53, %v2582_v50  ;;  %v2281_v0 = vld [vmem:[%s2532_s29 + $0x1a0] ss:$16 sps:$4 sm:$0xff]   ;;  %v2282_v1 = vld [vmem:[%s2532_s29 + $0x1a8] ss:$16 sps:$4 sm:$0xff]   ;;  %v2283_v2 = vld [vmem:[%s2532_s29 + $0x1c4] ss:$16 sps:$4 sm:$0xff]   ;;  %v2609_v13 = vrot.slane %v728_v8, %v2582_v50 }
  0x2b   : > { %v2285_v3 = vld [vmem:[%s2532_s29 + $0x1cc] ss:$16 sps:$4 sm:$0xff]   ;;  %v2287_v4 = vld [vmem:[%s2532_s29 + $0x1c0] ss:$16 sps:$4 sm:$0xff]   ;;  %v2288_v5 = vld [vmem:[%s2532_s29 + $0x1c8] ss:$16 sps:$4 sm:$0xff]  }
  0x2c   : > { %v743_v59 = vcombine.high %v735_v55, %v735_v55  ;;  %v2289_v6 = vld [vmem:[%s2532_s29 + $0x1e4] ss:$16 sps:$4 sm:$0xff]   ;;  %v2291_v7 = vld [vmem:[%s2532_s29 + $0x1ec] ss:$16 sps:$4 sm:$0xff]   ;;  %v2293_v9 = vld [vmem:[%s2532_s29 + $0x1e0] ss:$16 sps:$4 sm:$0xff]   ;;  %v744_v18 = vcombine.high %v2609_v13, %v2609_v13 }
  0x2d   : > { %1652 = vmatpush1.bf16.msra.mxu0 %v2233_v23  ;;  %1812 = vmatpush1.bf16.msra.mxu1 %v2234_v24  ;;  %v2294_v10 = vld [vmem:[%s2532_s29 + $0x1e8] ss:$16 sps:$4 sm:$0xff]   ;;  %v2296_v11 = vld [vmem:[%s2532_s29 + $0x204] ss:$16 sps:$4 sm:$0xff]   ;;  %v2299_v12 = vld [vmem:[%s2532_s29 + $0x20c] ss:$16 sps:$4 sm:$0xff]  }
  0x2e   : > { %1654 = vmatprep.subr.bf16.mxu0 %v2235_v25  ;;  %1814 = vmatprep.subr.bf16.mxu1 %v2237_v26  ;;  %v2298_v14 = vld [vmem:[%s2532_s29 + $0x200] ss:$16 sps:$4 sm:$0xff]   ;;  %v2301_v15 = vld [vmem:[%s2532_s29 + $0x208] ss:$16 sps:$4 sm:$0xff]   ;;  %v2302_v16 = vld [vmem:[%s2532_s29 + $0x224] ss:$16 sps:$4 sm:$0xff]  }
  0x2f   : > { %821 = vmatprep.mubr.f32.mxu0 %v743_v59  ;;  %1034 = vmatprep.mubr.f32.mxu1 %v743_v59  ;;  %v2305_v17 = vld [vmem:[%s2532_s29 + $0x22c] ss:$16 sps:$4 sm:$0xff]   ;;  %v2304_v19 = vld [vmem:[%s2532_s29 + $0x220] ss:$16 sps:$4 sm:$0xff]   ;;  %v2307_v20 = vld [vmem:[%s2532_s29 + $0x228] ss:$16 sps:$4 sm:$0xff]  }
  0x30   : > { %v2308_v21 = vld [vmem:[%s2532_s29 + $0x244] ss:$16 sps:$4 sm:$0xff]   ;;  %v2311_v22 = vld [vmem:[%s2532_s29 + $0x24c] ss:$16 sps:$4 sm:$0xff]   ;;  %v2310_v23 = vld [vmem:[%s2532_s29 + $0x240] ss:$16 sps:$4 sm:$0xff]  }
  0x31   : > { %1656 = vmatpush1.bf16.msra.mxu0 %v2239_v27  ;;  %1816 = vmatpush1.bf16.msra.mxu1 %v2240_v28  ;;  %v2313_v24 = vld [vmem:[%s2532_s29 + $0x248] ss:$16 sps:$4 sm:$0xff]   ;;  %v2314_v25 = vld [vmem:[%s2532_s29 + $0x264] ss:$16 sps:$4 sm:$0xff]   ;;  %v2317_v26 = vld [vmem:[%s2532_s29 + $0x26c] ss:$16 sps:$4 sm:$0xff]  }
  0x32   : > { %1658 = vmatprep.subr.bf16.mxu0 %v2241_v29  ;;  %1818 = vmatprep.subr.bf16.mxu1 %v2243_v30  ;;  %v2316_v27 = vld [vmem:[%s2532_s29 + $0x260] ss:$16 sps:$4 sm:$0xff]   ;;  %v2319_v28 = vld [vmem:[%s2532_s29 + $0x268] ss:$16 sps:$4 sm:$0xff]   ;;  %v2320_v29 = vld [vmem:[%s2532_s29 + $0x284] ss:$16 sps:$4 sm:$0xff]  }
  0x33   : > { %v2323_v30 = vld [vmem:[%s2532_s29 + $0x28c] ss:$16 sps:$4 sm:$0xff]   ;;  %v2332_v37 = vld [vmem:[%s2532_s29 + $0x2c4] ss:$16 sps:$4 sm:$0xff]   ;;  %v2334_v39 = vld [vmem:[%s2532_s29 + $0x2c0] ss:$16 sps:$4 sm:$0xff]  }
  0x34   : > { %v2335_v38 = vld [vmem:[%s2532_s29 + $0x2cc] ss:$16 sps:$4 sm:$0xff]   ;;  %v2340_v43 = vld [vmem:[%s2532_s29 + $0x2e0] ss:$16 sps:$4 sm:$0xff]   ;;  %v2362_v59 = vld [vmem:[%s2532_s29 + $0x364] ss:$16 sps:$4 sm:$0xff]  }
  0x35   : > { %1660 = vmatpush1.bf16.msra.mxu0 %v2245_v31  ;;  %1820 = vmatpush1.bf16.msra.mxu1 %v2246_v32  ;;  %v2322_v31 = vld [vmem:[%s2532_s29 + $0x280] ss:$16 sps:$4 sm:$0xff]   ;;  %v2325_v32 = vld [vmem:[%s2532_s29 + $0x288] ss:$16 sps:$4 sm:$0xff]   ;;  %v2383_v8 = vld [vmem:[%s2532_s29 + $0x3cc] ss:$16 sps:$4 sm:$0xff]  }
  0x36   : > { %1662 = vmatprep.subr.bf16.mxu0 %v2247_v33  ;;  %1822 = vmatprep.subr.bf16.mxu1 %v2249_v34  ;;  %v2326_v33 = vld [vmem:[%s2532_s29 + $0x2a4] ss:$16 sps:$4 sm:$0xff]   ;;  %v2329_v34 = vld [vmem:[%s2532_s29 + $0x2ac] ss:$16 sps:$4 sm:$0xff]   ;;  %v2352_v53 = vld [vmem:[%s2532_s29 + $0x320] ss:$16 sps:$4 sm:$0xff]  }
  0x39   : > { %1664 = vmatpush1.bf16.msra.mxu0 %v2251_v35  ;;  %1824 = vmatpush1.bf16.msra.mxu1 %v2252_v36  ;;  %v2328_v35 = vld [vmem:[%s2532_s29 + $0x2a0] ss:$16 sps:$4 sm:$0xff]   ;;  %v2331_v36 = vld [vmem:[%s2532_s29 + $0x2a8] ss:$16 sps:$4 sm:$0xff]  }
  0x3a   : > { %1666 = vmatprep.subr.bf16.mxu0 %v2253_v40  ;;  %1826 = vmatprep.subr.bf16.mxu1 %v2255_v41  ;;  %v2337_v40 = vld [vmem:[%s2532_s29 + $0x2c8] ss:$16 sps:$4 sm:$0xff]   ;;  %v2338_v41 = vld [vmem:[%s2532_s29 + $0x2e4] ss:$16 sps:$4 sm:$0xff]  }
  0x3d   : > { %1668 = vmatpush1.bf16.msra.mxu0 %v2257_v42  ;;  %1828 = vmatpush1.bf16.msra.mxu1 %v2258_v45  ;;  %v2341_v42 = vld [vmem:[%s2532_s29 + $0x2ec] ss:$16 sps:$4 sm:$0xff]   ;;  %v2343_v45 = vld [vmem:[%s2532_s29 + $0x2e8] ss:$16 sps:$4 sm:$0xff]  }
  0x3e   : > { %1670 = vmatprep.subr.bf16.mxu0 %v2259_v46  ;;  %1830 = vmatprep.subr.bf16.mxu1 %v2261_v47  ;;  %v2344_v46 = vld [vmem:[%s2532_s29 + $0x304] ss:$16 sps:$4 sm:$0xff]   ;;  %v2347_v47 = vld [vmem:[%s2532_s29 + $0x30c] ss:$16 sps:$4 sm:$0xff]  }
  0x41   : > { %1672 = vmatpush1.bf16.msra.mxu0 %v2263_v48  ;;  %1832 = vmatpush1.bf16.msra.mxu1 %v2264_v49  ;;  %v2346_v48 = vld [vmem:[%s2532_s29 + $0x300] ss:$16 sps:$4 sm:$0xff]   ;;  %v2349_v49 = vld [vmem:[%s2532_s29 + $0x308] ss:$16 sps:$4 sm:$0xff]  }
  0x42   : > { %1674 = vmatprep.subr.bf16.mxu0 %v2265_v51  ;;  %1834 = vmatprep.subr.bf16.mxu1 %v2267_v52  ;;  %v2350_v51 = vld [vmem:[%s2532_s29 + $0x324] ss:$16 sps:$4 sm:$0xff]   ;;  %v2353_v52 = vld [vmem:[%s2532_s29 + $0x32c] ss:$16 sps:$4 sm:$0xff]  }
  0x45   : > { %1676 = vmatpush1.bf16.msra.mxu0 %v2269_v54  ;;  %1836 = vmatpush1.bf16.msra.mxu1 %v2270_v56  ;;  %v2355_v54 = vld [vmem:[%s2532_s29 + $0x328] ss:$16 sps:$4 sm:$0xff]   ;;  %v2359_v56 = vld [vmem:[%s2532_s29 + $0x34c] ss:$16 sps:$4 sm:$0xff]  }
  0x46   : > { %1678 = vmatprep.subr.bf16.mxu0 %v2271_v57  ;;  %1838 = vmatprep.subr.bf16.mxu1 %v2273_v58  ;;  %v2358_v57 = vld [vmem:[%s2532_s29 + $0x340] ss:$16 sps:$4 sm:$0xff]   ;;  %v2361_v58 = vld [vmem:[%s2532_s29 + $0x348] ss:$16 sps:$4 sm:$0xff]  }
  0x49   : > { %1680 = vmatpush1.bf16.msra.mxu0 %v2275_v60  ;;  %1840 = vmatpush1.bf16.msra.mxu1 %v2276_v61  ;;  %v2365_v60 = vld [vmem:[%s2532_s29 + $0x36c] ss:$16 sps:$4 sm:$0xff]   ;;  %v2364_v61 = vld [vmem:[%s2532_s29 + $0x360] ss:$16 sps:$4 sm:$0xff]  }
  0x4a   : > { %1682 = vmatprep.subr.bf16.mxu0 %v2277_v62  ;;  %1842 = vmatprep.subr.bf16.mxu1 %v2279_v63  ;;  %v2367_v62 = vld [vmem:[%s2532_s29 + $0x368] ss:$16 sps:$4 sm:$0xff]   ;;  %v2368_v63 = vld [vmem:[%s2532_s29 + $0x384] ss:$16 sps:$4 sm:$0xff]  }
  0x4d   : > { %1684 = vmatpush1.bf16.msra.mxu0 %v2281_v0  ;;  %1844 = vmatpush1.bf16.msra.mxu1 %v2282_v1  ;;  %v2371_v0 = vld [vmem:[%s2532_s29 + $0x38c] ss:$16 sps:$4 sm:$0xff]   ;;  %v2370_v1 = vld [vmem:[%s2532_s29 + $0x380] ss:$16 sps:$4 sm:$0xff]  }
  0x4e   : > { %1686 = vmatprep.subr.bf16.mxu0 %v2283_v2  ;;  %1846 = vmatprep.subr.bf16.mxu1 %v2285_v3  ;;  %v2373_v2 = vld [vmem:[%s2532_s29 + $0x388] ss:$16 sps:$4 sm:$0xff]   ;;  %v2374_v3 = vld [vmem:[%s2532_s29 + $0x3a4] ss:$16 sps:$4 sm:$0xff]  }
  0x51   : > { %1688 = vmatpush1.bf16.msra.mxu0 %v2287_v4  ;;  %1848 = vmatpush1.bf16.msra.mxu1 %v2288_v5  ;;  %v2377_v4 = vld [vmem:[%s2532_s29 + $0x3ac] ss:$16 sps:$4 sm:$0xff]   ;;  %v2376_v5 = vld [vmem:[%s2532_s29 + $0x3a0] ss:$16 sps:$4 sm:$0xff]  }
  0x52   : > { %1690 = vmatprep.subr.bf16.mxu0 %v2289_v6  ;;  %1850 = vmatprep.subr.bf16.mxu1 %v2291_v7  ;;  %v2379_v6 = vld [vmem:[%s2532_s29 + $0x3a8] ss:$16 sps:$4 sm:$0xff]   ;;  %v2380_v7 = vld [vmem:[%s2532_s29 + $0x3c4] ss:$16 sps:$4 sm:$0xff]  }
  0x55   : > { %1692 = vmatpush1.bf16.msra.mxu0 %v2293_v9  ;;  %1852 = vmatpush1.bf16.msra.mxu1 %v2294_v10  ;;  %v2382_v9 = vld [vmem:[%s2532_s29 + $0x3c0] ss:$16 sps:$4 sm:$0xff]   ;;  %v2385_v10 = vld [vmem:[%s2532_s29 + $0x3c8] ss:$16 sps:$4 sm:$0xff]  }
  0x56   : > { %1694 = vmatprep.subr.bf16.mxu0 %v2296_v11  ;;  %1854 = vmatprep.subr.bf16.mxu1 %v2299_v12  ;;  %v2386_v11 = vld [vmem:[%s2532_s29 + $0x3e4] ss:$16 sps:$4 sm:$0xff]   ;;  %v2389_v12 = vld [vmem:[%s2532_s29 + $0x3ec] ss:$16 sps:$4 sm:$0xff]  }
  0x58   : > { %822 = vmatmul.mubr.f32.vlgmr.msra.gmra.mrb[0].mxu0 %v735_v55  ;;  %1035 = vmatmul.mubr.f32.vlgmr.msra.gmra.mrb[0].mxu1 %v735_v55  ;;  %v2356_v55 = vld [vmem:[%s2532_s29 + $0x344] ss:$16 sps:$4 sm:$0xff]  }
  0x59   : > { %1696 = vmatpush1.bf16.msra.mxu0 %v2298_v14  ;;  %1856 = vmatpush1.bf16.msra.mxu1 %v2301_v15  ;;  %v2388_v14 = vld [vmem:[%s2532_s29 + $0x3e0] ss:$16 sps:$4 sm:$0xff]   ;;  %v2391_v15 = vld [vmem:[%s2532_s29 + $0x3e8] ss:$16 sps:$4 sm:$0xff]  }
  0x5a   : > { %1698 = vmatprep.subr.bf16.mxu0 %v2302_v16  ;;  %1858 = vmatprep.subr.bf16.mxu1 %v2305_v17  ;;  %v2392_v16 = vld [vmem:[%s2532_s29 + $0x404] ss:$16 sps:$4 sm:$0xff]   ;;  %v2395_v17 = vld [vmem:[%s2532_s29 + $0x40c] ss:$16 sps:$4 sm:$0xff]  }
  0x5b   : > { %892 = vmatprep.mubr.f32.mxu0 %v744_v18  ;;  %1105 = vmatprep.mubr.f32.mxu1 %v744_v18  ;;  %v2394_v18 = vld [vmem:[%s2532_s29 + $0x400] ss:$16 sps:$4 sm:$0xff]  }
  0x5d   : > { %1700 = vmatpush1.bf16.msra.mxu0 %v2304_v19  ;;  %1860 = vmatpush1.bf16.msra.mxu1 %v2307_v20  ;;  %v2397_v19 = vld [vmem:[%s2532_s29 + $0x408] ss:$16 sps:$4 sm:$0xff]   ;;  %v2398_v20 = vld [vmem:[%s2532_s29 + $0x424] ss:$16 sps:$4 sm:$0xff]  }
  0x5e   : > { %1702 = vmatprep.subr.bf16.mxu0 %v2308_v21  ;;  %1862 = vmatprep.subr.bf16.mxu1 %v2311_v22  ;;  %v2401_v21 = vld [vmem:[%s2532_s29 + $0x42c] ss:$16 sps:$4 sm:$0xff]   ;;  %v2400_v22 = vld [vmem:[%s2532_s29 + $0x420] ss:$16 sps:$4 sm:$0xff]  }
  0x61   : > { %1704 = vmatpush1.bf16.msra.mxu0 %v2310_v23  ;;  %1864 = vmatpush1.bf16.msra.mxu1 %v2313_v24  ;;  %v2403_v23 = vld [vmem:[%s2532_s29 + $0x428] ss:$16 sps:$4 sm:$0xff]   ;;  %v2404_v24 = vld [vmem:[%s2532_s29 + $0x444] ss:$16 sps:$4 sm:$0xff]  }
  0x62   : > { %1706 = vmatprep.subr.bf16.mxu0 %v2314_v25  ;;  %1866 = vmatprep.subr.bf16.mxu1 %v2317_v26  ;;  %v2407_v25 = vld [vmem:[%s2532_s29 + $0x44c] ss:$16 sps:$4 sm:$0xff]   ;;  %v2480_v26 = vmov 0.0  }
  0x65   : > { %1708 = vmatpush1.bf16.msra.mxu0 %v2316_v27  ;;  %1868 = vmatpush1.bf16.msra.mxu1 %v2319_v28  ;;  %v2409_v27 = vld [vmem:[%s2532_s29 + $0x448] ss:$16 sps:$4 sm:$0xff]   ;;  %v2410_v28 = vld [vmem:[%s2532_s29 + $0x464] ss:$16 sps:$4 sm:$0xff]  }
  0x66   : > { %1710 = vmatprep.subr.bf16.mxu0 %v2320_v29  ;;  %1870 = vmatprep.subr.bf16.mxu1 %v2323_v30  ;;  %v2413_v29 = vld [vmem:[%s2532_s29 + $0x46c] ss:$16 sps:$4 sm:$0xff]   ;;  %v2412_v30 = vld [vmem:[%s2532_s29 + $0x460] ss:$16 sps:$4 sm:$0xff]  }
  0x69   : > { %1712 = vmatpush1.bf16.msra.mxu0 %v2322_v31  ;;  %1872 = vmatpush1.bf16.msra.mxu1 %v2325_v32  ;;  %v2415_v31 = vld [vmem:[%s2532_s29 + $0x468] ss:$16 sps:$4 sm:$0xff]   ;;  %v2416_v32 = vld [vmem:[%s2532_s29 + $0x484] ss:$16 sps:$4 sm:$0xff]  }
  0x6a   : > { %1714 = vmatprep.subr.bf16.mxu0 %v2326_v33  ;;  %1874 = vmatprep.subr.bf16.mxu1 %v2329_v34  ;;  %v2419_v33 = vld [vmem:[%s2532_s29 + $0x48c] ss:$16 sps:$4 sm:$0xff]   ;;  %v2418_v34 = vld [vmem:[%s2532_s29 + $0x480] ss:$16 sps:$4 sm:$0xff]  }
  0x6d   : > { %1716 = vmatpush1.bf16.msra.mxu0 %v2328_v35  ;;  %1876 = vmatpush1.bf16.msra.mxu1 %v2331_v36  ;;  %v2421_v35 = vld [vmem:[%s2532_s29 + $0x488] ss:$16 sps:$4 sm:$0xff]   ;;  %v2422_v36 = vld [vmem:[%s2532_s29 + $0x4a4] ss:$16 sps:$4 sm:$0xff]  }
  0x6e   : > { %1718 = vmatprep.subr.bf16.mxu0 %v2332_v37  ;;  %1878 = vmatprep.subr.bf16.mxu1 %v2335_v38  ;;  %v2425_v37 = vld [vmem:[%s2532_s29 + $0x4ac] ss:$16 sps:$4 sm:$0xff]   ;;  %v2424_v38 = vld [vmem:[%s2532_s29 + $0x4a0] ss:$16 sps:$4 sm:$0xff]  }
  0x71   : > { %1720 = vmatpush1.bf16.msra.mxu0 %v2334_v39  ;;  %1880 = vmatpush1.bf16.msra.mxu1 %v2337_v40  ;;  %v2427_v39 = vld [vmem:[%s2532_s29 + $0x4a8] ss:$16 sps:$4 sm:$0xff]   ;;  %v2428_v40 = vld [vmem:[%s2532_s29 + $0x4c4] ss:$16 sps:$4 sm:$0xff]  }
  0x72   : > { %1722 = vmatprep.subr.bf16.mxu0 %v2338_v41  ;;  %1882 = vmatprep.subr.bf16.mxu1 %v2341_v42  ;;  %v2431_v41 = vld [vmem:[%s2532_s29 + $0x4cc] ss:$16 sps:$4 sm:$0xff]   ;;  %v2430_v42 = vld [vmem:[%s2532_s29 + $0x4c0] ss:$16 sps:$4 sm:$0xff]  }
  0x75   : > { %1724 = vmatpush1.bf16.msra.mxu0 %v2340_v43  ;;  %1884 = vmatpush1.bf16.msra.mxu1 %v2343_v45  ;;  %v2433_v43 = vld [vmem:[%s2532_s29 + $0x4c8] ss:$16 sps:$4 sm:$0xff]   ;;  %v2434_v45 = vld [vmem:[%s2532_s29 + $0x4e4] ss:$16 sps:$4 sm:$0xff]  }
  0x76   : > { %1726 = vmatprep.subr.bf16.mxu0 %v2344_v46  ;;  %1886 = vmatprep.subr.bf16.mxu1 %v2347_v47  ;;  %v2437_v46 = vld [vmem:[%s2532_s29 + $0x4ec] ss:$16 sps:$4 sm:$0xff]   ;;  %v2436_v47 = vld [vmem:[%s2532_s29 + $0x4e0] ss:$16 sps:$4 sm:$0xff]  }
  0x79   : > { %1728 = vmatpush1.bf16.msra.mxu0 %v2346_v48  ;;  %1888 = vmatpush1.bf16.msra.mxu1 %v2349_v49  ;;  %v2439_v48 = vld [vmem:[%s2532_s29 + $0x4e8] ss:$16 sps:$4 sm:$0xff]  }
  0x7a   : > { %1730 = vmatprep.subr.bf16.mxu0 %v2350_v51  ;;  %1890 = vmatprep.subr.bf16.mxu1 %v2353_v52  ;;  %v1551_v49 = vld.sshfl [vmem:[%s2527_s25 + $0x8] sm:$0x3 pattern:$0x76325410] }
  0x7d   : > { %1732 = vmatpush1.bf16.msra.mxu0 %v2352_v53  ;;  %1892 = vmatpush1.bf16.msra.mxu1 %v2355_v54 }
  0x7e   : > { %1734 = vmatprep.subr.bf16.mxu0 %v2356_v55  ;;  %1894 = vmatprep.subr.bf16.mxu1 %v2359_v56 }
  0x81   : > { %1736 = vmatpush1.bf16.msra.mxu0 %v2358_v57  ;;  %1896 = vmatpush1.bf16.msra.mxu1 %v2361_v58 }
  0x82   : > { %1738 = vmatprep.subr.bf16.mxu0 %v2362_v59  ;;  %1898 = vmatprep.subr.bf16.mxu1 %v2365_v60  ;;  %v243_v59 = vld [vmem:[#allocation2] sm:$0xff] }
  0x85   : > { %1740 = vmatpush1.bf16.msra.mxu0 %v2364_v61  ;;  %1900 = vmatpush1.bf16.msra.mxu1 %v2367_v62  ;;  %v1266_v62 = vld [vmem:[%s2948_s3 + $0x80] sm:$0xff] (!%p1552_p6) }
  0x86   : > { %1742 = vmatprep.subr.bf16.mxu0 %v2368_v63  ;;  %1902 = vmatprep.subr.bf16.mxu1 %v2371_v0  ;;  %v1267_v63 = vld [vmem:[%s2948_s3 + $0x88] sm:$0xff] (!%p1552_p6)  ;;  %v1250_v0 = vld [vmem:[%s2948_s3] sm:$0xff] (!%p1552_p6) }
  0x89   : > { %1744 = vmatpush1.bf16.msra.mxu0 %v2370_v1  ;;  %1904 = vmatpush1.bf16.msra.mxu1 %v2373_v2  ;;  %v1949_v1 = vpack.c.bf16 (!%p1552_p6), %v1267_v63, %v1266_v62  ;;  %v1251_v2 = vld [vmem:[%s2948_s3 + $0x8] sm:$0xff] (!%p1552_p6) }
  0x8a   : > { %1746 = vmatprep.subr.bf16.mxu0 %v2374_v3  ;;  %1906 = vmatprep.subr.bf16.mxu1 %v2377_v4  ;;  %v1298_v3 = vld [vmem:[%s2948_s3 + $0x180] sm:$0xff] (!%p1552_p6)  ;;  %v1299_v4 = vld [vmem:[%s2948_s3 + $0x188] sm:$0xff] (!%p1552_p6) }
  0x8d   : > { %1748 = vmatpush1.bf16.msra.mxu0 %v2376_v5  ;;  %1908 = vmatpush1.bf16.msra.mxu1 %v2379_v6  ;;  %v1951_v5 = vpack.c.bf16 (!%p1552_p6), %v1251_v2, %v1250_v0  ;;  %v1981_v6 = vpack.c.bf16 (!%p1552_p6), %v1299_v4, %v1298_v3  ;;  %v1261_v2 = vld [vmem:[%s2948_s3 + $0x58] sm:$0xff] (!%p1552_p6)  ;;  %v1292_v3 = vld [vmem:[%s2948_s3 + $0x150] sm:$0xff] (!%p1552_p6) }
  0x8e   : > { %1750 = vmatprep.subr.bf16.mxu0 %v2380_v7  ;;  %1910 = vmatprep.subr.bf16.mxu1 %v2383_v8  ;;  %v1282_v7 = vld [vmem:[%s2948_s3 + $0x100] sm:$0xff] (!%p1552_p6)  ;;  %v1283_v8 = vld [vmem:[%s2948_s3 + $0x108] sm:$0xff] (!%p1552_p6) }
  0x91   : > { %1752 = vmatpush1.bf16.msra.mxu0 %v2382_v9  ;;  %1912 = vmatpush1.bf16.msra.mxu1 %v2385_v10  ;;  %v1268_v9 = vld [vmem:[%s2948_s3 + $0x90] sm:$0xff] (!%p1552_p6)  ;;  %v1983_v10 = vpack.c.bf16 (!%p1552_p6), %v1283_v8, %v1282_v7  ;;  %v1279_v7 = vld [vmem:[%s2948_s3 + $0xe8] sm:$0xff] (!%p1552_p6)  ;;  %v1216_v8 = vsub.s32 (!%p1552_p6), 0, %v2574_v44 }
  0x92   : > { %1754 = vmatprep.subr.bf16.mxu0 %v2386_v11  ;;  %1914 = vmatprep.subr.bf16.mxu1 %v2389_v12  ;;  %v1269_v11 = vld [vmem:[%s2948_s3 + $0x98] sm:$0xff] (!%p1552_p6)  ;;  %v1252_v12 = vld [vmem:[%s2948_s3 + $0x10] sm:$0xff] (!%p1552_p6) }
  0x95   : > { %1756 = vmatpush1.bf16.msra.mxu0 %v2388_v14  ;;  %1916 = vmatpush1.bf16.msra.mxu1 %v2391_v15  ;;  %v1253_v14 = vld [vmem:[%s2948_s3 + $0x18] sm:$0xff] (!%p1552_p6)  ;;  %v1953_v15 = vpack.c.bf16 (!%p1552_p6), %v1269_v11, %v1268_v9  ;;  %v1220_v9 = vsub.s32 (!%p1552_p6), 1, %v2574_v44  ;;  %v1310_v11 = vld [vmem:[%s2948_s3 + $0x1e0] sm:$0xff] (!%p1552_p6) }
  0x96   : > { %1758 = vmatprep.subr.bf16.mxu0 %v2392_v16  ;;  %1918 = vmatprep.subr.bf16.mxu1 %v2395_v17  ;;  %v1955_v16 = vpack.c.bf16 (!%p1552_p6), %v1253_v14, %v1252_v12  ;;  %v1300_v17 = vld [vmem:[%s2948_s3 + $0x190] sm:$0xff] (!%p1552_p6)  ;;  %v1311_v12 = vld [vmem:[%s2948_s3 + $0x1e8] sm:$0xff] (!%p1552_p6)  ;;  %v1228_v14 = vsub.s32 (!%p1552_p6), 3, %v2574_v44 }
  0x98   : > { %893 = vmatmul.mubr.f32.vlgmr.msra.gmra.mrb[0].mxu0 %v2609_v13  ;;  %1106 = vmatmul.mubr.f32.vlgmr.msra.gmra.mrb[0].mxu1 %v2609_v13  ;;  %v2406_v13 = vld [vmem:[%s2532_s29 + $0x440] ss:$16 sps:$4 sm:$0xff]  }
  0x99   : > { %1760 = vmatpush1.bf16.msra.mxu0 %v2394_v18  ;;  %1920 = vmatpush1.bf16.msra.mxu1 %v2397_v19  ;;  %v1301_v18 = vld [vmem:[%s2948_s3 + $0x198] sm:$0xff] (!%p1552_p6)  ;;  %v1284_v19 = vld [vmem:[%s2948_s3 + $0x110] sm:$0xff] (!%p1552_p6) }
  0x9a   : > { %1762 = vmatprep.subr.bf16.mxu0 %v2398_v20  ;;  %1922 = vmatprep.subr.bf16.mxu1 %v2401_v21  ;;  %v1985_v20 = vpack.c.bf16 (!%p1552_p6), %v1301_v18, %v1300_v17  ;;  %v1285_v21 = vld [vmem:[%s2948_s3 + $0x118] sm:$0xff] (!%p1552_p6) }
  0x9b   : > { %963 = vmatprep.mubr.f32.mxu0 %v2480_v26  ;;  %1176 = vmatprep.mubr.f32.mxu1 %v2480_v26  ;;  %v1254_v26 = vld [vmem:[%s2948_s3 + $0x20] sm:$0xff] (!%p1552_p6) }
  0x9d   : > { %1764 = vmatpush1.bf16.msra.mxu0 %v2400_v22  ;;  %1924 = vmatpush1.bf16.msra.mxu1 %v2403_v23  ;;  %v1270_v22 = vld [vmem:[%s2948_s3 + $0xa0] sm:$0xff] (!%p1552_p6)  ;;  %v1271_v23 = vld [vmem:[%s2948_s3 + $0xa8] sm:$0xff] (!%p1552_p6) }
  0x9e   : > { %1766 = vmatprep.subr.bf16.mxu0 %v2404_v24  ;;  %1926 = vmatprep.subr.bf16.mxu1 %v2407_v25  ;;  %v1987_v24 = vpack.c.bf16 (!%p1552_p6), %v1285_v21, %v1284_v19  ;;  %v1957_v25 = vpack.c.bf16 (!%p1552_p6), %v1271_v23, %v1270_v22  ;;  %v1263_v19 = vld [vmem:[%s2948_s3 + $0x68] sm:$0xff] (!%p1552_p6)  ;;  %v2005_v21 = vpack.c.bf16 (!%p1552_p6), %v1311_v12, %v1310_v11  ;;  %v1280_v23 = vld [vmem:[%s2948_s3 + $0xf0] sm:$0xff] (!%p1552_p6) }
  0x9f   : > { %v1295_v22 = vld [vmem:[%s2948_s3 + $0x168] sm:$0xff] (!%p1552_p6) }
  0xa1   : > { %1768 = vmatpush1.bf16.msra.mxu0 %v2406_v13  ;;  %1928 = vmatpush1.bf16.msra.mxu1 %v2409_v27  ;;  %v1255_v13 = vld [vmem:[%s2948_s3 + $0x28] sm:$0xff] (!%p1552_p6)  ;;  %v1302_v27 = vld [vmem:[%s2948_s3 + $0x1a0] sm:$0xff] (!%p1552_p6) }
  0xa2   : > { %1770 = vmatprep.subr.bf16.mxu0 %v2410_v28  ;;  %1930 = vmatprep.subr.bf16.mxu1 %v2413_v29  ;;  %v1303_v28 = vld [vmem:[%s2948_s3 + $0x1a8] sm:$0xff] (!%p1552_p6)  ;;  %v1286_v29 = vld [vmem:[%s2948_s3 + $0x120] sm:$0xff] (!%p1552_p6) }
  0xa5   : > { %1772 = vmatpush1.bf16.msra.mxu0 %v2412_v30  ;;  %1932 = vmatpush1.bf16.msra.mxu1 %v2415_v31  ;;  %v1287_v30 = vld [vmem:[%s2948_s3 + $0x128] sm:$0xff] (!%p1552_p6)  ;;  %v1959_v31 = vpack.c.bf16 (!%p1552_p6), %v1255_v13, %v1254_v26 }
  0xa6   : > { %1774 = vmatprep.subr.bf16.mxu0 %v2416_v32  ;;  %1934 = vmatprep.subr.bf16.mxu1 %v2419_v33  ;;  %v1989_v32 = vpack.c.bf16 (!%p1552_p6), %v1303_v28, %v1302_v27  ;;  %v1272_v33 = vld [vmem:[%s2948_s3 + $0xb0] sm:$0xff] (!%p1552_p6)  ;;  %v1313_v28 = vld [vmem:[%s2948_s3 + $0x1f8] sm:$0xff] (!%p1552_p6) }
  0xa7   : > { %v1312_v27 = vld [vmem:[%s2948_s3 + $0x1f0] sm:$0xff] (!%p1552_p6) }
  0xa9   : > { %1776 = vmatpush1.bf16.msra.mxu0 %v2418_v34  ;;  %1936 = vmatpush1.bf16.msra.mxu1 %v2421_v35  ;;  %v1273_v34 = vld [vmem:[%s2948_s3 + $0xb8] sm:$0xff] (!%p1552_p6)  ;;  %v1256_v35 = vld [vmem:[%s2948_s3 + $0x30] sm:$0xff] (!%p1552_p6) }
  0xaa   : > { %1778 = vmatprep.subr.bf16.mxu0 %v2422_v36  ;;  %1938 = vmatprep.subr.bf16.mxu1 %v2425_v37  ;;  %v1991_v36 = vpack.c.bf16 (!%p1552_p6), %v1287_v30, %v1286_v29  ;;  %v1961_v37 = vpack.c.bf16 (!%p1552_p6), %v1273_v34, %v1272_v33  ;;  %v1264_v34 = vld [vmem:[%s2948_s3 + $0x70] sm:$0xff] (!%p1552_p6) }
  0xad   : > { %1780 = vmatpush1.bf16.msra.mxu0 %v2424_v38  ;;  %1940 = vmatpush1.bf16.msra.mxu1 %v2427_v39  ;;  %v1257_v38 = vld [vmem:[%s2948_s3 + $0x38] sm:$0xff] (!%p1552_p6)  ;;  %v1304_v39 = vld [vmem:[%s2948_s3 + $0x1b0] sm:$0xff] (!%p1552_p6) }
  0xae   : > { %1782 = vmatprep.subr.bf16.mxu0 %v2428_v40  ;;  %1942 = vmatprep.subr.bf16.mxu1 %v2431_v41  ;;  %v1305_v40 = vld [vmem:[%s2948_s3 + $0x1b8] sm:$0xff] (!%p1552_p6) }
  0xaf   : > { %v1993_v41 = vpack.c.bf16 (!%p1552_p6), %v1305_v40, %v1304_v39  ;;  %v1297_v39 = vld [vmem:[%s2948_s3 + $0x178] sm:$0xff] (!%p1552_p6) }
  0xb1   : > { %1784 = vmatpush1.bf16.msra.mxu0 %v2430_v42  ;;  %1944 = vmatpush1.bf16.msra.mxu1 %v2433_v43  ;;  %v1288_v42 = vld [vmem:[%s2948_s3 + $0x130] sm:$0xff] (!%p1552_p6)  ;;  %v1289_v43 = vld [vmem:[%s2948_s3 + $0x138] sm:$0xff] (!%p1552_p6) }
  0xb2   : > { %1786 = vmatprep.subr.bf16.mxu0 %v2434_v45  ;;  %1946 = vmatprep.subr.bf16.mxu1 %v2437_v46  ;;  %v1274_v45 = vld [vmem:[%s2948_s3 + $0xc0] sm:$0xff] (!%p1552_p6)  ;;  %v1275_v46 = vld [vmem:[%s2948_s3 + $0xc8] sm:$0xff] (!%p1552_p6) }
  0xb5   : > { %1788 = vmatpush1.bf16.msra.mxu0 %v2436_v47  ;;  %1948 = vmatpush1.bf16.msra.mxu1 %v2439_v48  ;;  %v1963_v47 = vpack.c.bf16 (!%p1552_p6), %v1257_v38, %v1256_v35  ;;  %v1306_v48 = vld [vmem:[%s2948_s3 + $0x1c0] sm:$0xff] (!%p1552_p6)  ;;  %v1265_v35 = vld [vmem:[%s2948_s3 + $0x78] sm:$0xff] (!%p1552_p6)  ;;  %v1296_v38 = vld [vmem:[%s2948_s3 + $0x170] sm:$0xff] (!%p1552_p6) }
  0xb6   : > { %1950 = vmatprep.subr.bf16.mxu0 (!%p1552_p6), %v1949_v1  ;;  %1982 = vmatprep.subr.bf16.mxu1 (!%p1552_p6), %v1981_v6  ;;  %v1260_v1 = vld [vmem:[%s2948_s3 + $0x50] sm:$0xff] (!%p1552_p6)  ;;  %v1278_v6 = vld [vmem:[%s2948_s3 + $0xe0] sm:$0xff] (!%p1552_p6) }
  0xb7   : > { %v1973_v18 = vpack.c.bf16 (!%p1552_p6), %v1279_v7, %v1278_v6 }
  0xb8   : > { %964 = vmatmul.mubr.f32.vlgmr.msra.gmra.mrb[0].mxu0 %v1551_v49  ;;  %1177 = vmatmul.mubr.f32.vlgmr.msra.gmra.mrb[0].mxu1 %v1551_v49  ;;  %v1307_v49 = vld [vmem:[%s2948_s3 + $0x1c8] sm:$0xff] (!%p1552_p6) }
  0xb9   : > { %1952 = vmatpush3.bf16.msra.mxu0 (!%p1552_p6), %v1951_v5  ;;  %1984 = vmatpush3.bf16.msra.mxu1 (!%p1552_p6), %v1983_v10  ;;  %v1293_v5 = vld [vmem:[%s2948_s3 + $0x158] sm:$0xff] (!%p1552_p6)  ;;  %v1224_v10 = vsub.s32 (!%p1552_p6), 2, %v2574_v44  ;;  %v1212_v44 = vld [vmem:[%s2947_s2] sm:$0xf] (!%p1552_p6) }
  0xba   : > { %1954 = vmatprep.subr.bf16.mxu0 (!%p1552_p6), %v1953_v15  ;;  %1986 = vmatprep.subr.bf16.mxu1 (!%p1552_p6), %v1985_v20  ;;  %v1971_v15 = vpack.c.bf16 (!%p1552_p6), %v1261_v2, %v1260_v1  ;;  %v2003_v17 = vpack.c.bf16 (!%p1552_p6), %v1293_v5, %v1292_v3  ;;  %v1294_v20 = vld [vmem:[%s2948_s3 + $0x160] sm:$0xff] (!%p1552_p6)  ;;  %v1221_v26 = vrot.slane (!%p1552_p6), %v1212_v44, %v1220_v9 }
  0xbb   : > { %v1225_v13 = vrot.slane (!%p1552_p6), %v1212_v44, %v1224_v10  ;;  %v1229_v29 = vrot.slane (!%p1552_p6), %v1212_v44, %v1228_v14 }
  0xbd   : > { %1956 = vmatpush3.bf16.msra.mxu0 (!%p1552_p6), %v1955_v16  ;;  %1988 = vmatpush3.bf16.msra.mxu1 (!%p1552_p6), %v1987_v24  ;;  %v1262_v16 = vld [vmem:[%s2948_s3 + $0x60] sm:$0xff] (!%p1552_p6)  ;;  %v1281_v24 = vld [vmem:[%s2948_s3 + $0xf8] sm:$0xff] (!%p1552_p6) }
  0xbe   : > { %1958 = vmatprep.subr.bf16.mxu0 (!%p1552_p6), %v1957_v25  ;;  %1990 = vmatprep.subr.bf16.mxu1 (!%p1552_p6), %v1989_v32  ;;  %v1217_v25 = vrot.slane (!%p1552_p6), %v1212_v44, %v1216_v8  ;;  %v1975_v30 = vpack.c.bf16 (!%p1552_p6), %v1263_v19, %v1262_v16  ;;  %v2007_v32 = vpack.c.bf16 (!%p1552_p6), %v1295_v22, %v1294_v20 }
  0xbf   : > { %v1977_v33 = vpack.c.bf16 (!%p1552_p6), %v1281_v24, %v1280_v23 }
  0xc1   : > { %1960 = vmatpush3.bf16.msra.mxu0 (!%p1552_p6), %v1959_v31  ;;  %1992 = vmatpush3.bf16.msra.mxu1 (!%p1552_p6), %v1991_v36  ;;  %v1230_v31 = vcombine.low (!%p1552_p6), %v1217_v25, %v1221_v26  ;;  %v1231_v36 = vcombine.low (!%p1552_p6), %v1225_v13, %v1229_v29 }
  0xc2   : > { %1962 = vmatprep.subr.bf16.mxu0 (!%p1552_p6), %v1961_v37  ;;  %1994 = vmatprep.subr.bf16.mxu1 (!%p1552_p6), %v1993_v41  ;;  %v2009_v37 = vpack.c.bf16 (!%p1552_p6), %v1313_v28, %v1312_v27 }
  0xc3   : > { %v1238_v40 = vrot.slane (!%p1552_p6), %v1230_v31, %v2582_v50  ;;  %v1245_v41 = vrot.slane (!%p1552_p6), %v1231_v36, %v2582_v50 }
  0xc5   : > { %1964 = vmatpush3.bf16.msra.mxu0 (!%p1552_p6), %v1963_v47 }
 0x18b   : > { %v965_v51 = vpop.f32.mrb[0].mxu0  ;;  %v1178_v52 = vpop.f32.mrb[0].mxu1 }
 0x18c   : > { %v967_v53 = vpop.f32.mrb[1].mxu0  ;;  %v1180_v54 = vpop.f32.mrb[1].mxu1 }
 0x18d   : > { %v1187_v55 = vcombine.low %v965_v51, %v967_v53  ;;  %v1188_v56 = vcombine.low %v1178_v52, %v1180_v54  ;;  %v1995_v51 = vpack.c.bf16 (!%p1552_p6), %v1289_v43, %v1288_v42  ;;  %v1965_v52 = vpack.c.bf16 (!%p1552_p6), %v1275_v46, %v1274_v45  ;;  %v1258_v53 = vld [vmem:[%s2948_s3 + $0x40] sm:$0xff] (!%p1552_p6)  ;;  %v1259_v54 = vld [vmem:[%s2948_s3 + $0x48] sm:$0xff] (!%p1552_p6) }
 0x18e   : > { %v1967_v62 = vpack.c.bf16 (!%p1552_p6), %v1259_v54, %v1258_v53  ;;  %v1979_v42 = vpack.c.bf16 (!%p1552_p6), %v1265_v35, %v1264_v34  ;;  %v2011_v45 = vpack.c.bf16 (!%p1552_p6), %v1297_v39, %v1296_v38  ;;  %v1246_v46 = vcombine.low (!%p1552_p6), %v1238_v40, %v1245_v41 }
 0x18f   : > { %v1195_v57 = vrot.slane %v1187_v55, %v2582_v50  ;;  %v1202_v58 = vrot.slane %v1188_v56, %v2582_v50  ;;  %1210 = sbr.rel (%p1552_p6) target bundleno = 642 (0x282), region = 48  ;;  %v1290_v55 = vld [vmem:[%s2948_s3 + $0x140] sm:$0xff] (!%p1552_p6)  ;;  %v1997_v56 = vpack.c.bf16 (!%p1552_p6), %v1307_v49, %v1306_v48  ;;  %1996 = vmatpush3.bf16.msra.mxu1 (!%p1552_p6), %v1995_v51  ;;  %1966 = vmatprep.subr.bf16.mxu0 (!%p1552_p6), %v1965_v52 }
 0x190   : > { %1968 = vmatpush3.bf16.msra.mxu0 (!%p1552_p6), %v1967_v62 }
 0x191   : > { %v1203_v60 = vcombine.low %v1195_v57, %v1202_v58  ;;  %v1291_v57 = vld [vmem:[%s2948_s3 + $0x148] sm:$0xff] (!%p1552_p6)  ;;  %v1276_v58 = vld [vmem:[%s2948_s3 + $0xd0] sm:$0xff] (!%p1552_p6)  ;;  %1998 = vmatprep.subr.bf16.mxu1 (!%p1552_p6), %v1997_v56  ;;  %v1553_v56 = vld [vmem:[%s2949_s4] ss:$0 sm:$0xff] (!%p1552_p6) }
 0x192   : > { %v1999_v63 = vpack.c.bf16 (!%p1552_p6), %v1291_v57, %v1290_v55 }
 0x193   : > { %v1205_v61 = vadd.f32 %v1203_v60, %v243_v59  ;;  %v1277_v59 = vld [vmem:[%s2948_s3 + $0xd8] sm:$0xff] (!%p1552_p6)  ;;  %v1308_v60 = vld [vmem:[%s2948_s3 + $0x1d0] sm:$0xff] (!%p1552_p6) }
 0x194   : > { %v1969_v0 = vpack.c.bf16 (!%p1552_p6), %v1277_v59, %v1276_v58  ;;  %2000 = vmatpush3.bf16.msra.mxu1 (!%p1552_p6), %v1999_v63 }
 0x195   : > { %1206 = vst [vmem:[#allocation2] sm:$0xff] %v1205_v61  ;;  %v1309_v61 = vld [vmem:[%s2948_s3 + $0x1d8] sm:$0xff] (!%p1552_p6) }
 0x196   : > { %v2001_v4 = vpack.c.bf16 %v1309_v61, %v1308_v60  ;;  %1970 = vmatprep.subr.bf16.mxu0 %v1969_v0 }
 0x197   : > { %1972 = vmatpush3.bf16.msra.mxu0 %v1971_v15 }
 0x198   : > { %2002 = vmatprep.subr.bf16.mxu1 %v2001_v4  ;;  %1974 = vmatprep.subr.bf16.mxu0 %v1973_v18 }
 0x199   : > { %2004 = vmatpush3.bf16.msra.mxu1 %v2003_v17 }
 0x19a   : > { %2006 = vmatprep.subr.bf16.mxu1 %v2005_v21 }
 0x19b   : > { %1976 = vmatpush3.bf16.msra.mxu0 %v1975_v30 }
 0x19c   : > { %v1211_v43 = vld [vmem:[#allocation2] sm:$0xff]  ;;  %1978 = vmatprep.subr.bf16.mxu0 %v1977_v33 }
 0x19d   : > { %2008 = vmatpush3.bf16.msra.mxu1 %v2007_v32  ;;  %v1248_v47 = vadd.f32 %v1246_v46, %v1211_v43 }
 0x19e   : > { %2010 = vmatprep.subr.bf16.mxu1 %v2009_v37 }
 0x19f   : > { %1980 = vmatpush3.bf16.msra.mxu0 %v1979_v42  ;;  %v1249_v48 = vmax.f32 %v1248_v47, 0.0 }
 0x1a1   : > { %2012 = vmatpush3.bf16.msra.mxu1 %v2011_v45  ;;  %v1329_v49 = vrot.slane %v1249_v48, %v2582_v50  ;;  %v1322_v51 = vcombine.high %v1249_v48, %v1249_v48 }
 0x1a3   : > { %v1337_v52 = vcombine.high %v1329_v49, %v1329_v49  ;;  %v1336_v53 = vrot.slane %v1322_v51, %v2582_v50 }
 0x1a5   : > { %1407 = vmatprep.mubr.f32.mxu0 %v1337_v52  ;;  %v1338_v54 = vcombine.high %v1336_v53, %v1336_v53 }
 0x1a6   : > { %1408 = vmatmul.mubr.f32.vlgmr.msra.gmra.mrb[0].mxu0 %v1329_v49 }
 0x1a7   : > { %1477 = vmatprep.mubr.f32.mxu1 %v1338_v54 }
 0x1a8   : > { %1478 = vmatmul.mubr.f32.vlgmr.msra.gmra.mrb[0].mxu1 %v1336_v53 }
 0x279   : > { %v1591_v55 = vpop.f32.mrb[0].mxu0 }
 0x27a   : > { %v1592_v57 = vpop.f32.mrb[1].mxu0 }
 0x27b   : > { %v1593_v58 = vadd.f32 %v1592_v57, %v1591_v55  ;;  %v1626_v59 = vpop.f32.mrb[0].mxu1 }
 0x27c   : > { %v1627_v60 = vpop.f32.mrb[1].mxu1 }
 0x27d   : > { %v1410_v61 = vadd.f32 %v1593_v58, %v1553_v56  ;;  %v1628_v62 = vadd.f32 %v1627_v60, %v1626_v59 }
 0x27f   : > { %v1480_v63 = vadd.f32 %v1628_v62, %v1410_v61 }
 0x281   : > { %1484 = vst.msk [vmem:[#allocation3] sm:$0x3] %vm1483_vm0, %v1480_v63 }
 0x282 PF: > { %p2185_p7 = scmp.eq.s32.totalorder %s2518_s19, 4  ;;  %s2481_s24 = smov [#allocation3]  }
 0x283   : > { %s1492_s25 = sshll.u32 %s2481_s24, 4  ;;  %s1493_s25 = int_to_ptr.vmem [resolvable:$true] %s1492_s25 }
 0x284   : > { %s2440_s26 = scalar_lea.vmem %s1493_s25, 32  ;;  %p2447_p11 = scmp.lt.s32.totalorder %s1493_s25, %s1493_s25 }
 0x285   : > { %p2441_p8 = scmp.ne.s32.totalorder %s1493_s25, %s2440_s26  ;;  %p2448_p12 = scmp.lt.s32.totalorder %s2440_s26, %s2440_s26 }
 0x287   : > { %p2442_p9 = pnand %p2441_p8, %p2185_p7  ;;  %p2449_p13 = por %p2448_p12, %p2447_p11 }
 0x289   : > { %p2443_p10 = pneg %p2442_p9 }
 0x28b   : > { %p2450_p0 = pnand %p2449_p13, %p2443_p10 }
 0x28d   : > { %2453 = shalt.err (!%p2450_p0)
}
 0x28e   : > { %s2454_s29 = scalar_lea.hbm %s2950_s5, 32 }
 0x28f   : > { %p2455_p1 = scmp.ne.s32.totalorder %s2950_s5, %s2454_s29  ;;  %p2460_p4 = scmp.lt.u32.totalorder %s2454_s29, %s2950_s5 }
 0x291   : > { %p2456_p2 = pnand %p2455_p1, %p2185_p7 }
 0x293   : > { %p2457_p3 = pneg %p2456_p2 }
 0x295   : > { %p2462_p5 = pnand %p2460_p4, %p2457_p3 }
 0x297   : > { %2465 = shalt.err (!%p2462_p5)
}
 0x298   : > { %2182 = dma.vmem_to_hbm [thread:$0]  (%p2185_p7), %s1493_s25, 32, %s2950_s5, [#allocation4]  }
 0x299   : > { %2471 = dma.done.wait (%p2185_p7), [#allocation4], 32  }
 0x29a   : > { %2473 = vsyncadd (%p2185_p7), [#allocation4], 4294967264 }
 0x29b PF: > { %s16_s18 = sadd.s32 1, %s2476_s18  }
 0x29c   : > { %p13_p6 = scmp.ge.s32.totalorder %s16_s18, 7  }
 0x29e   :  { %15 = sbr.rel (!%p13_p6) target bundleno = 1 (0x1), region = 78 }
 0x2a5   :  { %1505 = vsyncpa [#allocation4], 1 }
 0x2a6   :  { %1507 = vsyncpa [#allocation4 + $0x1], 1 }

</bundles_post_ra>
